<compile_context>
chip_gen: v6e
topology: v6e:2x2x1
jax: 0.10.0
libtpu: 0.0.40
codegen_flags: <defaults>
</compile_context>

<pallas_src>
import functools

import numpy as np
import jax
import jax.numpy as jnp
from jax import lax
from jax.experimental import pallas as pl
from jax.experimental.pallas import tpu as pltpu


LANE = 128     # vreg lane width
SUBLANE = 8    # fp32 sublane count


def _round_up(v, m):
    return (v + m - 1) // m * m


def ae_kernel(
    # ---- inputs ----------------------------------------------------------
    x_ref, mask_ref,
    wih_e_ref, whh_e_ref, be_ref, bhh_en_ref,
    wle_ref, ble_ref, wld_ref, bld_ref,
    wih_d_ref, whh_d_ref, bd_ref, bhh_dn_ref,
    wlo_ref, blo_ref,
    # ---- outputs ---------------------------------------------------------
    feat_ref, out_ref, loss_ref,
    # ---- scratch ----------------------------------------------------------
    gi_e, gi_d, hdec,
    *, use_linear, use_activation):
    T, Bp, Ip = x_ref.shape
    H = whh_e_ref.shape[0]
    G = 3 * H
    f32 = jnp.float32
    bf16 = jnp.bfloat16

    mask = mask_ref[...]                                   # (T, Bp, 1) f32
    x = x_ref[...]                                         # (T, Bp, Ip) f32

    # ---------- hoisted, gate-fused input projections ----------------------
    # encoder: gi_e = x @ [Wih_r|Wih_z|Wih_n]^T + [bih_r+bhh_r|bih_z+bhh_z|bih_n]
    x2 = x.reshape(T * Bp, Ip).astype(bf16)
    gi_e[...] = (jnp.dot(x2, wih_e_ref[...],
                         preferred_element_type=f32).reshape(T, Bp, G)
                 + be_ref[...])

    # decoder teacher forcing: step 0 sees zeros, step t>0 sees x[t-1] masked
    # past each sequence length.  Project only steps 0..T-2 and write them
    # directly into gi_d[1:T]; step 0 is just the bias.
    bd = bd_ref[...]                                       # (1, G)
    gi_d[0] = jnp.broadcast_to(bd, (Bp, G))
    if T > 1:
        xm2 = (x[:T - 1] * mask[:T - 1]).reshape((T - 1) * Bp, Ip).astype(bf16)
        gi_d[pl.ds(1, T - 1)] = (
            jnp.dot(xm2, wih_d_ref[...],
                    preferred_element_type=f32).reshape(T - 1, Bp, G) + bd)

    # ---------------- encoder GRU (one fused gh matmul per step) -----------
    bhh_en = bhh_en_ref[...]                               # (1, H)
    h0 = jnp.zeros((Bp, H), f32)

    def enc_body(t, carry):
        h, h_fin = carry
        gh = jnp.dot(h.astype(bf16), whh_e_ref[...],
                     preferred_element_type=f32)           # (Bp, 3H)
        gi_t = gi_e[t]                                     # (Bp, 3H)
        g = gi_t + gh
        r = jax.nn.sigmoid(g[:, :H])
        z = jax.nn.sigmoid(g[:, H:2 * H])
        n = jnp.tanh(gi_t[:, 2 * H:] + r * (gh[:, 2 * H:] + bhh_en))
        h_new = (1.0 - z) * n + z * h
        # freeze the hidden state at t == seq_len-1 (mask is exactly 0/1)
        m = mask_ref[t]                                    # (Bp, 1)
        h_fin = h_fin + m * (h_new - h_fin)
        return h_new, h_fin

    _, h_enc = lax.fori_loop(0, T, enc_body, (h0, h0), unroll=True)

    # ------------- linear_enc + sigmoid -> features (tiny, kept f32) -------
    feat = h_enc
    if use_linear:
        feat = (jnp.dot(feat, wle_ref[...],
                        preferred_element_type=f32) + ble_ref[...])
    if use_activation:
        feat = jax.nn.sigmoid(feat)
    feat_ref[...] = feat

    # ------------- decoder initial hidden (linear_dec, tiny, f32) ----------
    hidden = feat
    if use_linear:
        hidden = (jnp.dot(feat, wld_ref[...],
                          preferred_element_type=f32) + bld_ref[...])

    # ---------------- decoder GRU (teacher forcing) -------------------------
    bhh_dn = bhh_dn_ref[...]                               # (1, H)

    def dec_body(t, h):
        gh = jnp.dot(h.astype(bf16), whh_d_ref[...],
                     preferred_element_type=f32)           # (Bp, 3H)
        gi_t = gi_d[t]
        g = gi_t + gh
        r = jax.nn.sigmoid(g[:, :H])
        z = jax.nn.sigmoid(g[:, H:2 * H])
        n = jnp.tanh(gi_t[:, 2 * H:] + r * (gh[:, 2 * H:] + bhh_dn))
        h_new = (1.0 - z) * n + z * h
        hdec[t] = h_new                                    # dense store, no matmul
        return h_new

    lax.fori_loop(0, T, dec_body, hidden, unroll=True)

    # ------------- hoisted linear_out: one big matmul + bulk store ----------
    hmat = hdec[...].reshape(T * Bp, H).astype(bf16)
    y = (jnp.dot(hmat, wlo_ref[...],
                 preferred_element_type=f32).reshape(T, Bp, Ip)
         + blo_ref[...])
    out_ref[...] = y

    # ------------- masked MSE from the in-register f32 result ---------------
    diff = x - y                                           # padded lanes are 0
    loss_sum = jnp.sum(diff * diff * mask)
    denom = jnp.maximum(jnp.sum(mask), 1.0)
    loss_ref[...] = jnp.reshape(loss_sum / denom, (1, 1))


def _split_gates(w, H):
    return w[0:H], w[H:2 * H], w[2 * H:3 * H]


def init_params(key, input_size, hidden_size):
    I, H = input_size, hidden_size
    ks = jax.random.split(key, 14)
    sH = 1.0 / float(np.sqrt(H))
    s3 = 1.0 / float(np.sqrt(3.0))

    def u(k, shape, scale):
        return jax.random.uniform(k, shape, jnp.float32, -scale, scale)

    return dict(
        # encoder GRU
        wih_e=u(ks[0], (3 * H, I), sH), whh_e=u(ks[1], (3 * H, H), sH),
        bih_e=u(ks[2], (3 * H,), sH), bhh_e=u(ks[3], (3 * H,), sH),
        # linear_enc: hidden_size -> 3
        wle=u(ks[4], (3, H), sH), ble=u(ks[5], (3,), sH),
        # linear_dec: 3 -> hidden_size
        wld=u(ks[6], (H, 3), s3), bld=u(ks[7], (H,), s3),
        # decoder GRU
        wih_d=u(ks[8], (3 * H, I), sH), whh_d=u(ks[9], (3 * H, H), sH),
        bih_d=u(ks[10], (3 * H,), sH), bhh_d=u(ks[11], (3 * H,), sH),
        # linear_out: hidden_size -> input_size
        wlo=u(ks[12], (I, H), sH), blo=u(ks[13], (I,), sH),
    )


def autoencoder_forward(x, seq_lengths, params, *, use_linear=True,
                        use_activation=True):
    """x: (B, T, I) batch-first (PyTorch convention). Returns
    (loss, features(1,B,F), input(B,T,I), output(B,T,I))."""
    B, T, I = x.shape
    H = params["whh_e"].shape[1]
    F = 3 if use_linear else H
    Bp = _round_up(max(B, SUBLANE), SUBLANE)       # sublane-align batch
    Ip = _round_up(max(I, LANE), LANE)             # lane-align input/output dim
    Fp = LANE if use_linear else H                 # lane-dense feature output
    G = 3 * H

    f32 = jnp.float32
    bf16 = jnp.bfloat16

    # --- time-major, zero-padded input and (t < seq_len) validity mask -----
    x_tm = jnp.transpose(x, (1, 0, 2)).astype(f32)                # (T, B, I)
    x_pad = jnp.zeros((T, Bp, Ip), f32).at[:, :B, :I].set(x_tm)   # (T, Bp, Ip)
    sl = jnp.zeros((Bp,), jnp.int32).at[:B].set(seq_lengths.astype(jnp.int32))
    tt = jnp.arange(T, dtype=jnp.int32)[:, None]                  # (T, 1)
    mask = (tt < sl[None, :]).astype(f32)[:, :, None]             # (T, Bp, 1)

    def pad2(w, rows, cols):
        out = jnp.zeros((rows, cols), f32)
        return out.at[:w.shape[0], :w.shape[1]].set(w.astype(f32))

    def row(b, n):   # bias -> (1, n) f32, zero-padded lanes
        out = jnp.zeros((1, n), f32)
        return out.at[0, :b.shape[0]].set(b.astype(f32))

    def wih_pack(w_r, w_z, w_n):   # gate blocks (H, I) -> (Ip, 3H) bf16
        w = jnp.concatenate([w_r.T, w_z.T, w_n.T], axis=1)        # (I, 3H)
        return pad2(w, Ip, G).astype(bf16)

    def whh_pack(w_r, w_z, w_n):   # gate blocks (H, H) -> (H, 3H) bf16
        return jnp.concatenate([w_r.T, w_z.T, w_n.T], axis=1).astype(bf16)

    def bias_pack(b_r, b_z, b_n):  # per-gate biases -> (1, 3H) f32
        return jnp.concatenate([b_r, b_z, b_n]).astype(f32)[None, :]

    wih_e_r, wih_e_z, wih_e_n = _split_gates(params["wih_e"], H)
    whh_e_r, whh_e_z, whh_e_n = _split_gates(params["whh_e"], H)
    bih_e_r, bih_e_z, bih_e_n = _split_gates(params["bih_e"], H)
    bhh_e_r, bhh_e_z, bhh_e_n = _split_gates(params["bhh_e"], H)
    wih_d_r, wih_d_z, wih_d_n = _split_gates(params["wih_d"], H)
    whh_d_r, whh_d_z, whh_d_n = _split_gates(params["whh_d"], H)
    bih_d_r, bih_d_z, bih_d_n = _split_gates(params["bih_d"], H)
    bhh_d_r, bhh_d_z, bhh_d_n = _split_gates(params["bhh_d"], H)

    inputs = (
        x_pad, mask,
        # encoder GRU (gate-fused bf16 weights, folded biases)
        wih_pack(wih_e_r, wih_e_z, wih_e_n),
        whh_pack(whh_e_r, whh_e_z, whh_e_n),
        bias_pack(bih_e_r + bhh_e_r, bih_e_z + bhh_e_z, bih_e_n),
        row(bhh_e_n, H),
        # linear_enc / linear_dec (tiny bottleneck, kept f32)
        pad2(params["wle"].T, H, Fp), row(params["ble"], Fp),
        pad2(params["wld"].T, Fp, H), row(params["bld"], H),
        # decoder GRU
        wih_pack(wih_d_r, wih_d_z, wih_d_n),
        whh_pack(whh_d_r, whh_d_z, whh_d_n),
        bias_pack(bih_d_r + bhh_d_r, bih_d_z + bhh_d_z, bih_d_n),
        row(bhh_d_n, H),
        # linear_out
        pad2(params["wlo"].T, H, Ip).astype(bf16), row(params["blo"], Ip),
    )

    vmem = pl.BlockSpec(memory_space=pltpu.MemorySpace.VMEM)
    kernel = functools.partial(ae_kernel, use_linear=use_linear,
                               use_activation=use_activation)

    feat, out_tm, loss = pl.pallas_call(
        kernel,
        out_shape=(
            jax.ShapeDtypeStruct((Bp, Fp), f32),
            jax.ShapeDtypeStruct((T, Bp, Ip), f32),
            jax.ShapeDtypeStruct((1, 1), f32),
        ),
        in_specs=[vmem] * len(inputs),
        out_specs=(vmem, vmem, vmem),
        scratch_shapes=[
            pltpu.VMEM((T, Bp, G), f32),   # encoder gate-fused input proj
            pltpu.VMEM((T, Bp, G), f32),   # decoder gate-fused input proj
            pltpu.VMEM((T, Bp, H), f32),   # decoder hidden states
        ],
        compiler_params=pltpu.CompilerParams(
            vmem_limit_bytes=64 * 1024 * 1024),
    )(*inputs)

    output = jnp.transpose(out_tm[:, :B, :I], (1, 0, 2))          # (B, T, I)
    features = feat[None, :B, :F]                                 # (1, B, F)
    return loss[0, 0], features, x, output


# ---------------- pure-JAX fp32 reference (sanity check) ----------------
def reference_forward(x, seq_lengths, params, *, use_linear=True,
                      use_activation=True):
    B, T, I = x.shape
    H = params["whh_e"].shape[1]
    seq = seq_lengths.astype(jnp.int32)

    def gru(x_t, h, wih, whh, bih, bhh):
        gi = x_t @ wih.T + bih
        gh = h @ whh.T + bhh
        r = jax.nn.sigmoid(gi[:, :H] + gh[:, :H])
        z = jax.nn.sigmoid(gi[:, H:2 * H] + gh[:, H:2 * H])
        n = jnp.tanh(gi[:, 2 * H:] + r * gh[:, 2 * H:])
        return (1 - z) * n + z * h

    h = jnp.zeros((B, H), jnp.float32)
    h_fin = h
    for t in range(T):
        h = gru(x[:, t, :], h, params["wih_e"], params["whh_e"],
                params["bih_e"], params["bhh_e"])
        h_fin = jnp.where((t < seq)[:, None], h, h_fin)
    feat = h_fin
    if use_linear:
        feat = feat @ params["wle"].T + params["ble"]
    if use_activation:
        feat = jax.nn.sigmoid(feat)

    hidden = feat @ params["wld"].T + params["bld"] if use_linear else feat
    outs = []
    for t in range(T):
        if t == 0:
            in_data = jnp.zeros((B, I), jnp.float32)
        else:
            in_data = x[:, t - 1, :] * ((t - 1) < seq)[:, None].astype(jnp.float32)
        hidden = gru(in_data, hidden, params["wih_d"], params["whh_d"],
                     params["bih_d"], params["bhh_d"])
        outs.append(hidden @ params["wlo"].T + params["blo"])
    output = jnp.stack(outs, axis=1)                              # (B, T, I)
    mask = (jnp.arange(T)[None, :] < seq[:, None]).astype(jnp.float32)[:, :, None]
    loss = jnp.sum((x - output) ** 2 * mask) / jnp.sum(mask)
    return loss, feat[None], output


if __name__ == "__main__":
    B, T, I, H = 2, 8, 4, 32          # batch, seq, input_size, hidden_size
    key = jax.random.PRNGKey(0)
    kx, kp = jax.random.split(key)
    x = jax.random.normal(kx, (B, T, I), jnp.float32)
    seq_lengths = jnp.array([8, 5], jnp.int32)   # max == T (padded length)
    params = init_params(kp, I, H)

    loss, features, inp, output = autoencoder_forward(
        x, seq_lengths, params, use_linear=True, use_activation=True)
    jax.block_until_ready((loss, features, output))

    ref_loss, ref_feat, ref_out = reference_forward(
        x, seq_lengths, params, use_linear=True, use_activation=True)
    # Kernel uses bf16 MXU matmuls (f32 accumulation / carry) vs an fp32
    # reference, so tolerances account for bf16 rounding.
    np.testing.assert_allclose(np.asarray(loss), np.asarray(ref_loss),
                               rtol=2e-2, atol=2e-2)
    np.testing.assert_allclose(np.asarray(features), np.asarray(ref_feat),
                               rtol=2e-2, atol=2e-2)
    np.testing.assert_allclose(np.asarray(output), np.asarray(ref_out),
                               rtol=5e-2, atol=5e-2)

    print("KERNEL_OK")
</pallas_src>

<mosaic_0001>
module attributes {stable_mosaic.version = 11 : i64} {
  func.func @ae_kernel(%arg0: memref<8x8x128xf32, #tpu.memory_space<vmem>>, %arg1: memref<8x8x1xf32, #tpu.memory_space<vmem>>, %arg2: memref<128x96xbf16, #tpu.memory_space<vmem>>, %arg3: memref<32x96xbf16, #tpu.memory_space<vmem>>, %arg4: memref<1x96xf32, #tpu.memory_space<vmem>>, %arg5: memref<1x32xf32, #tpu.memory_space<vmem>>, %arg6: memref<32x128xf32, #tpu.memory_space<vmem>>, %arg7: memref<1x128xf32, #tpu.memory_space<vmem>>, %arg8: memref<128x32xf32, #tpu.memory_space<vmem>>, %arg9: memref<1x32xf32, #tpu.memory_space<vmem>>, %arg10: memref<128x96xbf16, #tpu.memory_space<vmem>>, %arg11: memref<32x96xbf16, #tpu.memory_space<vmem>>, %arg12: memref<1x96xf32, #tpu.memory_space<vmem>>, %arg13: memref<1x32xf32, #tpu.memory_space<vmem>>, %arg14: memref<32x128xbf16, #tpu.memory_space<vmem>>, %arg15: memref<1x128xf32, #tpu.memory_space<vmem>>, %arg16: memref<8x128xf32, #tpu.memory_space<vmem>>, %arg17: memref<8x8x128xf32, #tpu.memory_space<vmem>>, %arg18: memref<1x1xf32, #tpu.memory_space<vmem>>, %arg19: memref<8x8x96xf32, #tpu.memory_space<vmem>>, %arg20: memref<8x8x96xf32, #tpu.memory_space<vmem>>, %arg21: memref<8x8x32xf32, #tpu.memory_space<vmem>>) attributes {dimension_semantics = [], scalar_prefetch = 0 : i64, scratch_operands = 3 : i64, tpu.core_type = #tpu.core_type<tc>} {
    %c0 = arith.constant 0 : index
    %c0_0 = arith.constant 0 : index
    %c0_1 = arith.constant 0 : index
    %0 = vector.load %arg1[%c0, %c0_0, %c0_1] : memref<8x8x1xf32, #tpu.memory_space<vmem>>, vector<8x8x1xf32>
    %c0_2 = arith.constant 0 : index
    %c0_3 = arith.constant 0 : index
    %c0_4 = arith.constant 0 : index
    %1 = vector.load %arg0[%c0_2, %c0_3, %c0_4] : memref<8x8x128xf32, #tpu.memory_space<vmem>>, vector<8x8x128xf32>
    %2 = vector.shape_cast %1 : vector<8x8x128xf32> to vector<64x128xf32>
    %3 = arith.truncf %2 : vector<64x128xf32> to vector<64x128xbf16>
    %c0_5 = arith.constant 0 : index
    %c0_6 = arith.constant 0 : index
    %4 = vector.load %arg2[%c0_5, %c0_6] : memref<128x96xbf16, #tpu.memory_space<vmem>>, vector<128x96xbf16>
    %cst = arith.constant dense<0.000000e+00> : vector<64x96xf32>
    %5 = tpu.matmul %3, %4, %cst {dimension_numbers = #tpu.dot_dimension_numbers<[1], [0], [0], [1], [0, 0, 1, 1], [], []>} : vector<64x128xbf16>, vector<128x96xbf16>, vector<64x96xf32> -> vector<64x96xf32>
    %6 = vector.shape_cast %5 : vector<64x96xf32> to vector<8x8x96xf32>
    %c0_7 = arith.constant 0 : index
    %c0_8 = arith.constant 0 : index
    %7 = vector.load %arg4[%c0_7, %c0_8] : memref<1x96xf32, #tpu.memory_space<vmem>>, vector<1x96xf32>
    %8 = vector.shape_cast %7 : vector<1x96xf32> to vector<1x1x96xf32>
    %9 = vector.broadcast %8 : vector<1x1x96xf32> to vector<8x8x96xf32>
    %10 = arith.addf %6, %9 : vector<8x8x96xf32>
    %c0_9 = arith.constant 0 : index
    %c0_10 = arith.constant 0 : index
    %c0_11 = arith.constant 0 : index
    %11 = vector.load %arg19[%c0_9, %c0_10, %c0_11] : memref<8x8x96xf32, #tpu.memory_space<vmem>>, vector<8x8x96xf32>
    tpu.vector_store %arg19[%c0_9, %c0_10, %c0_11], %10 {strides = array<i32>} : memref<8x8x96xf32, #tpu.memory_space<vmem>>, vector<8x8x96xf32>,
    %c0_12 = arith.constant 0 : index
    %c0_13 = arith.constant 0 : index
    %12 = vector.load %arg12[%c0_12, %c0_13] : memref<1x96xf32, #tpu.memory_space<vmem>>, vector<1x96xf32>
    %13 = vector.shape_cast %12 : vector<1x96xf32> to vector<1x96xf32>
    %14 = vector.broadcast %13 : vector<1x96xf32> to vector<8x96xf32>
    %c0_14 = arith.constant 0 : index
    %c0_15 = arith.constant 0 : index
    %c0_16 = arith.constant 0 : index
    %15 = vector.load %arg20[%c0_14, %c0_15, %c0_16] : memref<8x8x96xf32, #tpu.memory_space<vmem>>, vector<1x8x96xf32>
    %16 = vector.shape_cast %15 : vector<1x8x96xf32> to vector<8x96xf32>
    %17 = vector.shape_cast %14 : vector<8x96xf32> to vector<1x8x96xf32>
    tpu.vector_store %arg20[%c0_14, %c0_15, %c0_16], %17 {strides = array<i32>} : memref<8x8x96xf32, #tpu.memory_space<vmem>>, vector<1x8x96xf32>,
    %18 = vector.extract_strided_slice %1 {offsets = [0, 0, 0], sizes = [7, 8, 128], strides = [1, 1, 1]} : vector<8x8x128xf32> to vector<7x8x128xf32>
    %19 = vector.extract_strided_slice %0 {offsets = [0, 0, 0], sizes = [7, 8, 1], strides = [1, 1, 1]} : vector<8x8x1xf32> to vector<7x8x1xf32>
    %20 = vector.broadcast %19 : vector<7x8x1xf32> to vector<7x8x128xf32>
    %21 = arith.mulf %18, %20 : vector<7x8x128xf32>
    %22 = vector.shape_cast %21 : vector<7x8x128xf32> to vector<56x128xf32>
    %23 = arith.truncf %22 : vector<56x128xf32> to vector<56x128xbf16>
    %c0_17 = arith.constant 0 : index
    %c0_18 = arith.constant 0 : index
    %24 = vector.load %arg10[%c0_17, %c0_18] : memref<128x96xbf16, #tpu.memory_space<vmem>>, vector<128x96xbf16>
    %cst_19 = arith.constant dense<0.000000e+00> : vector<56x96xf32>
    %25 = tpu.matmul %23, %24, %cst_19 {dimension_numbers = #tpu.dot_dimension_numbers<[1], [0], [0], [1], [0, 0, 1, 1], [], []>} : vector<56x128xbf16>, vector<128x96xbf16>, vector<56x96xf32> -> vector<56x96xf32>
    %26 = vector.shape_cast %25 : vector<56x96xf32> to vector<7x8x96xf32>
    %27 = vector.shape_cast %12 : vector<1x96xf32> to vector<1x1x96xf32>
    %28 = vector.broadcast %27 : vector<1x1x96xf32> to vector<7x8x96xf32>
    %29 = arith.addf %26, %28 : vector<7x8x96xf32>
    %c1 = arith.constant 1 : index
    %c0_20 = arith.constant 0 : index
    %c0_21 = arith.constant 0 : index
    %30 = vector.load %arg20[%c1, %c0_20, %c0_21] : memref<8x8x96xf32, #tpu.memory_space<vmem>>, vector<7x8x96xf32>
    tpu.vector_store %arg20[%c1, %c0_20, %c0_21], %29 {strides = array<i32>} : memref<8x8x96xf32, #tpu.memory_space<vmem>>, vector<7x8x96xf32>,
    %c0_22 = arith.constant 0 : index
    %c0_23 = arith.constant 0 : index
    %31 = vector.load %arg5[%c0_22, %c0_23] : memref<1x32xf32, #tpu.memory_space<vmem>>, vector<1x32xf32>
    %cst_24 = arith.constant 0.000000e+00 : f32
    %32 = vector.broadcast %cst_24 : f32 to vector<8x32xf32>
    %c0_i32 = arith.constant 0 : i32
    %33 = arith.truncf %32 : vector<8x32xf32> to vector<8x32xbf16>
    %c0_25 = arith.constant 0 : index
    %c0_26 = arith.constant 0 : index
    %34 = vector.load %arg3[%c0_25, %c0_26] : memref<32x96xbf16, #tpu.memory_space<vmem>>, vector<32x96xbf16>
    %cst_27 = arith.constant dense<0.000000e+00> : vector<8x96xf32>
    %35 = tpu.matmul %33, %34, %cst_27 {dimension_numbers = #tpu.dot_dimension_numbers<[1], [0], [0], [1], [0, 0, 1, 1], [], []>} : vector<8x32xbf16>, vector<32x96xbf16>, vector<8x96xf32> -> vector<8x96xf32>
    %36 = arith.index_cast %c0_i32 : i32 to index
    %c0_28 = arith.constant 0 : index
    %c0_29 = arith.constant 0 : index
    %37 = vector.load %arg19[%36, %c0_28, %c0_29] : memref<8x8x96xf32, #tpu.memory_space<vmem>>, vector<1x8x96xf32>
    %38 = vector.shape_cast %37 : vector<1x8x96xf32> to vector<8x96xf32>
    %39 = arith.addf %38, %35 : vector<8x96xf32>
    %40 = vector.extract_strided_slice %39 {offsets = [0, 0], sizes = [8, 32], strides = [1, 1]} : vector<8x96xf32> to vector<8x32xf32>
    %41 = arith.negf %40 : vector<8x32xf32>
    %42 = math.exp %41 : vector<8x32xf32>
    %cst_30 = arith.constant 1.000000e+00 : f32
    %43 = vector.broadcast %cst_30 : f32 to vector<8x32xf32>
    %44 = arith.addf %43, %42 : vector<8x32xf32>
    %45 = arith.divf %43, %44 : vector<8x32xf32>
    %46 = vector.extract_strided_slice %39 {offsets = [0, 32], sizes = [8, 32], strides = [1, 1]} : vector<8x96xf32> to vector<8x32xf32>
    %47 = arith.negf %46 : vector<8x32xf32>
    %48 = math.exp %47 : vector<8x32xf32>
    %cst_31 = arith.constant 1.000000e+00 : f32
    %49 = vector.broadcast %cst_31 : f32 to vector<8x32xf32>
    %50 = arith.addf %49, %48 : vector<8x32xf32>
    %51 = arith.divf %49, %50 : vector<8x32xf32>
    %52 = vector.extract_strided_slice %38 {offsets = [0, 64], sizes = [8, 32], strides = [1, 1]} : vector<8x96xf32> to vector<8x32xf32>
    %53 = vector.extract_strided_slice %35 {offsets = [0, 64], sizes = [8, 32], strides = [1, 1]} : vector<8x96xf32> to vector<8x32xf32>
    %54 = vector.broadcast %31 : vector<1x32xf32> to vector<8x32xf32>
    %55 = arith.addf %53, %54 : vector<8x32xf32>
    %56 = arith.mulf %45, %55 : vector<8x32xf32>
    %57 = arith.addf %52, %56 : vector<8x32xf32>
    %58 = math.tanh %57 : vector<8x32xf32>
    %cst_32 = arith.constant 1.000000e+00 : f32
    %59 = vector.broadcast %cst_32 : f32 to vector<8x32xf32>
    %60 = arith.subf %59, %51 : vector<8x32xf32>
    %61 = arith.mulf %60, %58 : vector<8x32xf32>
    %62 = arith.mulf %51, %32 : vector<8x32xf32>
    %63 = arith.addf %61, %62 : vector<8x32xf32>
    %64 = arith.index_cast %c0_i32 : i32 to index
    %c0_33 = arith.constant 0 : index
    %c0_34 = arith.constant 0 : index
    %65 = vector.load %arg1[%64, %c0_33, %c0_34] : memref<8x8x1xf32, #tpu.memory_space<vmem>>, vector<1x8x1xf32>
    %66 = vector.shape_cast %65 : vector<1x8x1xf32> to vector<8x1xf32>
    %67 = arith.subf %63, %32 : vector<8x32xf32>
    %68 = vector.broadcast %66 : vector<8x1xf32> to vector<8x32xf32>
    %69 = arith.mulf %68, %67 : vector<8x32xf32>
    %70 = arith.addf %32, %69 : vector<8x32xf32>
    %c1_i32 = arith.constant 1 : i32
    %71 = arith.truncf %63 : vector<8x32xf32> to vector<8x32xbf16>
    %c0_35 = arith.constant 0 : index
    %c0_36 = arith.constant 0 : index
    %72 = vector.load %arg3[%c0_35, %c0_36] : memref<32x96xbf16, #tpu.memory_space<vmem>>, vector<32x96xbf16>
    %cst_37 = arith.constant dense<0.000000e+00> : vector<8x96xf32>
    %73 = tpu.matmul %71, %72, %cst_37 {dimension_numbers = #tpu.dot_dimension_numbers<[1], [0], [0], [1], [0, 0, 1, 1], [], []>} : vector<8x32xbf16>, vector<32x96xbf16>, vector<8x96xf32> -> vector<8x96xf32>
    %74 = arith.index_cast %c1_i32 : i32 to index
    %c0_38 = arith.constant 0 : index
    %c0_39 = arith.constant 0 : index
    %75 = vector.load %arg19[%74, %c0_38, %c0_39] : memref<8x8x96xf32, #tpu.memory_space<vmem>>, vector<1x8x96xf32>
    %76 = vector.shape_cast %75 : vector<1x8x96xf32> to vector<8x96xf32>
    %77 = arith.addf %76, %73 : vector<8x96xf32>
    %78 = vector.extract_strided_slice %77 {offsets = [0, 0], sizes = [8, 32], strides = [1, 1]} : vector<8x96xf32> to vector<8x32xf32>
    %79 = arith.negf %78 : vector<8x32xf32>
    %80 = math.exp %79 : vector<8x32xf32>
    %cst_40 = arith.constant 1.000000e+00 : f32
    %81 = vector.broadcast %cst_40 : f32 to vector<8x32xf32>
    %82 = arith.addf %81, %80 : vector<8x32xf32>
    %83 = arith.divf %81, %82 : vector<8x32xf32>
    %84 = vector.extract_strided_slice %77 {offsets = [0, 32], sizes = [8, 32], strides = [1, 1]} : vector<8x96xf32> to vector<8x32xf32>
    %85 = arith.negf %84 : vector<8x32xf32>
    %86 = math.exp %85 : vector<8x32xf32>
    %cst_41 = arith.constant 1.000000e+00 : f32
    %87 = vector.broadcast %cst_41 : f32 to vector<8x32xf32>
    %88 = arith.addf %87, %86 : vector<8x32xf32>
    %89 = arith.divf %87, %88 : vector<8x32xf32>
    %90 = vector.extract_strided_slice %76 {offsets = [0, 64], sizes = [8, 32], strides = [1, 1]} : vector<8x96xf32> to vector<8x32xf32>
    %91 = vector.extract_strided_slice %73 {offsets = [0, 64], sizes = [8, 32], strides = [1, 1]} : vector<8x96xf32> to vector<8x32xf32>
    %92 = vector.broadcast %31 : vector<1x32xf32> to vector<8x32xf32>
    %93 = arith.addf %91, %92 : vector<8x32xf32>
    %94 = arith.mulf %83, %93 : vector<8x32xf32>
    %95 = arith.addf %90, %94 : vector<8x32xf32>
    %96 = math.tanh %95 : vector<8x32xf32>
    %cst_42 = arith.constant 1.000000e+00 : f32
    %97 = vector.broadcast %cst_42 : f32 to vector<8x32xf32>
    %98 = arith.subf %97, %89 : vector<8x32xf32>
    %99 = arith.mulf %98, %96 : vector<8x32xf32>
    %100 = arith.mulf %89, %63 : vector<8x32xf32>
    %101 = arith.addf %99, %100 : vector<8x32xf32>
    %102 = arith.index_cast %c1_i32 : i32 to index
    %c0_43 = arith.constant 0 : index
    %c0_44 = arith.constant 0 : index
    %103 = vector.load %arg1[%102, %c0_43, %c0_44] : memref<8x8x1xf32, #tpu.memory_space<vmem>>, vector<1x8x1xf32>
    %104 = vector.shape_cast %103 : vector<1x8x1xf32> to vector<8x1xf32>
    %105 = arith.subf %101, %70 : vector<8x32xf32>
    %106 = vector.broadcast %104 : vector<8x1xf32> to vector<8x32xf32>
    %107 = arith.mulf %106, %105 : vector<8x32xf32>
    %108 = arith.addf %70, %107 : vector<8x32xf32>
    %c2_i32 = arith.constant 2 : i32
    %109 = arith.truncf %101 : vector<8x32xf32> to vector<8x32xbf16>
    %c0_45 = arith.constant 0 : index
    %c0_46 = arith.constant 0 : index
    %110 = vector.load %arg3[%c0_45, %c0_46] : memref<32x96xbf16, #tpu.memory_space<vmem>>, vector<32x96xbf16>
    %cst_47 = arith.constant dense<0.000000e+00> : vector<8x96xf32>
    %111 = tpu.matmul %109, %110, %cst_47 {dimension_numbers = #tpu.dot_dimension_numbers<[1], [0], [0], [1], [0, 0, 1, 1], [], []>} : vector<8x32xbf16>, vector<32x96xbf16>, vector<8x96xf32> -> vector<8x96xf32>
    %112 = arith.index_cast %c2_i32 : i32 to index
    %c0_48 = arith.constant 0 : index
    %c0_49 = arith.constant 0 : index
    %113 = vector.load %arg19[%112, %c0_48, %c0_49] : memref<8x8x96xf32, #tpu.memory_space<vmem>>, vector<1x8x96xf32>
    %114 = vector.shape_cast %113 : vector<1x8x96xf32> to vector<8x96xf32>
    %115 = arith.addf %114, %111 : vector<8x96xf32>
    %116 = vector.extract_strided_slice %115 {offsets = [0, 0], sizes = [8, 32], strides = [1, 1]} : vector<8x96xf32> to vector<8x32xf32>
    %117 = arith.negf %116 : vector<8x32xf32>
    %118 = math.exp %117 : vector<8x32xf32>
    %cst_50 = arith.constant 1.000000e+00 : f32
    %119 = vector.broadcast %cst_50 : f32 to vector<8x32xf32>
    %120 = arith.addf %119, %118 : vector<8x32xf32>
    %121 = arith.divf %119, %120 : vector<8x32xf32>
    %122 = vector.extract_strided_slice %115 {offsets = [0, 32], sizes = [8, 32], strides = [1, 1]} : vector<8x96xf32> to vector<8x32xf32>
    %123 = arith.negf %122 : vector<8x32xf32>
    %124 = math.exp %123 : vector<8x32xf32>
    %cst_51 = arith.constant 1.000000e+00 : f32
    %125 = vector.broadcast %cst_51 : f32 to vector<8x32xf32>
    %126 = arith.addf %125, %124 : vector<8x32xf32>
    %127 = arith.divf %125, %126 : vector<8x32xf32>
    %128 = vector.extract_strided_slice %114 {offsets = [0, 64], sizes = [8, 32], strides = [1, 1]} : vector<8x96xf32> to vector<8x32xf32>
    %129 = vector.extract_strided_slice %111 {offsets = [0, 64], sizes = [8, 32], strides = [1, 1]} : vector<8x96xf32> to vector<8x32xf32>
    %130 = vector.broadcast %31 : vector<1x32xf32> to vector<8x32xf32>
    %131 = arith.addf %129, %130 : vector<8x32xf32>
    %132 = arith.mulf %121, %131 : vector<8x32xf32>
    %133 = arith.addf %128, %132 : vector<8x32xf32>
    %134 = math.tanh %133 : vector<8x32xf32>
    %cst_52 = arith.constant 1.000000e+00 : f32
    %135 = vector.broadcast %cst_52 : f32 to vector<8x32xf32>
    %136 = arith.subf %135, %127 : vector<8x32xf32>
    %137 = arith.mulf %136, %134 : vector<8x32xf32>
    %138 = arith.mulf %127, %101 : vector<8x32xf32>
    %139 = arith.addf %137, %138 : vector<8x32xf32>
    %140 = arith.index_cast %c2_i32 : i32 to index
    %c0_53 = arith.constant 0 : index
    %c0_54 = arith.constant 0 : index
    %141 = vector.load %arg1[%140, %c0_53, %c0_54] : memref<8x8x1xf32, #tpu.memory_space<vmem>>, vector<1x8x1xf32>
    %142 = vector.shape_cast %141 : vector<1x8x1xf32> to vector<8x1xf32>
    %143 = arith.subf %139, %108 : vector<8x32xf32>
    %144 = vector.broadcast %142 : vector<8x1xf32> to vector<8x32xf32>
    %145 = arith.mulf %144, %143 : vector<8x32xf32>
    %146 = arith.addf %108, %145 : vector<8x32xf32>
    %c3_i32 = arith.constant 3 : i32
    %147 = arith.truncf %139 : vector<8x32xf32> to vector<8x32xbf16>
    %c0_55 = arith.constant 0 : index
    %c0_56 = arith.constant 0 : index
    %148 = vector.load %arg3[%c0_55, %c0_56] : memref<32x96xbf16, #tpu.memory_space<vmem>>, vector<32x96xbf16>
    %cst_57 = arith.constant dense<0.000000e+00> : vector<8x96xf32>
    %149 = tpu.matmul %147, %148, %cst_57 {dimension_numbers = #tpu.dot_dimension_numbers<[1], [0], [0], [1], [0, 0, 1, 1], [], []>} : vector<8x32xbf16>, vector<32x96xbf16>, vector<8x96xf32> -> vector<8x96xf32>
    %150 = arith.index_cast %c3_i32 : i32 to index
    %c0_58 = arith.constant 0 : index
    %c0_59 = arith.constant 0 : index
    %151 = vector.load %arg19[%150, %c0_58, %c0_59] : memref<8x8x96xf32, #tpu.memory_space<vmem>>, vector<1x8x96xf32>
    %152 = vector.shape_cast %151 : vector<1x8x96xf32> to vector<8x96xf32>
    %153 = arith.addf %152, %149 : vector<8x96xf32>
    %154 = vector.extract_strided_slice %153 {offsets = [0, 0], sizes = [8, 32], strides = [1, 1]} : vector<8x96xf32> to vector<8x32xf32>
    %155 = arith.negf %154 : vector<8x32xf32>
    %156 = math.exp %155 : vector<8x32xf32>
    %cst_60 = arith.constant 1.000000e+00 : f32
    %157 = vector.broadcast %cst_60 : f32 to vector<8x32xf32>
    %158 = arith.addf %157, %156 : vector<8x32xf32>
    %159 = arith.divf %157, %158 : vector<8x32xf32>
    %160 = vector.extract_strided_slice %153 {offsets = [0, 32], sizes = [8, 32], strides = [1, 1]} : vector<8x96xf32> to vector<8x32xf32>
    %161 = arith.negf %160 : vector<8x32xf32>
    %162 = math.exp %161 : vector<8x32xf32>
    %cst_61 = arith.constant 1.000000e+00 : f32
    %163 = vector.broadcast %cst_61 : f32 to vector<8x32xf32>
    %164 = arith.addf %163, %162 : vector<8x32xf32>
    %165 = arith.divf %163, %164 : vector<8x32xf32>
    %166 = vector.extract_strided_slice %152 {offsets = [0, 64], sizes = [8, 32], strides = [1, 1]} : vector<8x96xf32> to vector<8x32xf32>
    %167 = vector.extract_strided_slice %149 {offsets = [0, 64], sizes = [8, 32], strides = [1, 1]} : vector<8x96xf32> to vector<8x32xf32>
    %168 = vector.broadcast %31 : vector<1x32xf32> to vector<8x32xf32>
    %169 = arith.addf %167, %168 : vector<8x32xf32>
    %170 = arith.mulf %159, %169 : vector<8x32xf32>
    %171 = arith.addf %166, %170 : vector<8x32xf32>
    %172 = math.tanh %171 : vector<8x32xf32>
    %cst_62 = arith.constant 1.000000e+00 : f32
    %173 = vector.broadcast %cst_62 : f32 to vector<8x32xf32>
    %174 = arith.subf %173, %165 : vector<8x32xf32>
    %175 = arith.mulf %174, %172 : vector<8x32xf32>
    %176 = arith.mulf %165, %139 : vector<8x32xf32>
    %177 = arith.addf %175, %176 : vector<8x32xf32>
    %178 = arith.index_cast %c3_i32 : i32 to index
    %c0_63 = arith.constant 0 : index
    %c0_64 = arith.constant 0 : index
    %179 = vector.load %arg1[%178, %c0_63, %c0_64] : memref<8x8x1xf32, #tpu.memory_space<vmem>>, vector<1x8x1xf32>
    %180 = vector.shape_cast %179 : vector<1x8x1xf32> to vector<8x1xf32>
    %181 = arith.subf %177, %146 : vector<8x32xf32>
    %182 = vector.broadcast %180 : vector<8x1xf32> to vector<8x32xf32>
    %183 = arith.mulf %182, %181 : vector<8x32xf32>
    %184 = arith.addf %146, %183 : vector<8x32xf32>
    %c4_i32 = arith.constant 4 : i32
    %185 = arith.truncf %177 : vector<8x32xf32> to vector<8x32xbf16>
    %c0_65 = arith.constant 0 : index
    %c0_66 = arith.constant 0 : index
    %186 = vector.load %arg3[%c0_65, %c0_66] : memref<32x96xbf16, #tpu.memory_space<vmem>>, vector<32x96xbf16>
    %cst_67 = arith.constant dense<0.000000e+00> : vector<8x96xf32>
    %187 = tpu.matmul %185, %186, %cst_67 {dimension_numbers = #tpu.dot_dimension_numbers<[1], [0], [0], [1], [0, 0, 1, 1], [], []>} : vector<8x32xbf16>, vector<32x96xbf16>, vector<8x96xf32> -> vector<8x96xf32>
    %188 = arith.index_cast %c4_i32 : i32 to index
    %c0_68 = arith.constant 0 : index
    %c0_69 = arith.constant 0 : index
    %189 = vector.load %arg19[%188, %c0_68, %c0_69] : memref<8x8x96xf32, #tpu.memory_space<vmem>>, vector<1x8x96xf32>
    %190 = vector.shape_cast %189 : vector<1x8x96xf32> to vector<8x96xf32>
    %191 = arith.addf %190, %187 : vector<8x96xf32>
    %192 = vector.extract_strided_slice %191 {offsets = [0, 0], sizes = [8, 32], strides = [1, 1]} : vector<8x96xf32> to vector<8x32xf32>
    %193 = arith.negf %192 : vector<8x32xf32>
    %194 = math.exp %193 : vector<8x32xf32>
    %cst_70 = arith.constant 1.000000e+00 : f32
    %195 = vector.broadcast %cst_70 : f32 to vector<8x32xf32>
    %196 = arith.addf %195, %194 : vector<8x32xf32>
    %197 = arith.divf %195, %196 : vector<8x32xf32>
    %198 = vector.extract_strided_slice %191 {offsets = [0, 32], sizes = [8, 32], strides = [1, 1]} : vector<8x96xf32> to vector<8x32xf32>
    %199 = arith.negf %198 : vector<8x32xf32>
    %200 = math.exp %199 : vector<8x32xf32>
    %cst_71 = arith.constant 1.000000e+00 : f32
    %201 = vector.broadcast %cst_71 : f32 to vector<8x32xf32>
    %202 = arith.addf %201, %200 : vector<8x32xf32>
    %203 = arith.divf %201, %202 : vector<8x32xf32>
    %204 = vector.extract_strided_slice %190 {offsets = [0, 64], sizes = [8, 32], strides = [1, 1]} : vector<8x96xf32> to vector<8x32xf32>
    %205 = vector.extract_strided_slice %187 {offsets = [0, 64], sizes = [8, 32], strides = [1, 1]} : vector<8x96xf32> to vector<8x32xf32>
    %206 = vector.broadcast %31 : vector<1x32xf32> to vector<8x32xf32>
    %207 = arith.addf %205, %206 : vector<8x32xf32>
    %208 = arith.mulf %197, %207 : vector<8x32xf32>
    %209 = arith.addf %204, %208 : vector<8x32xf32>
    %210 = math.tanh %209 : vector<8x32xf32>
    %cst_72 = arith.constant 1.000000e+00 : f32
    %211 = vector.broadcast %cst_72 : f32 to vector<8x32xf32>
    %212 = arith.subf %211, %203 : vector<8x32xf32>
    %213 = arith.mulf %212, %210 : vector<8x32xf32>
    %214 = arith.mulf %203, %177 : vector<8x32xf32>
    %215 = arith.addf %213, %214 : vector<8x32xf32>
    %216 = arith.index_cast %c4_i32 : i32 to index
    %c0_73 = arith.constant 0 : index
    %c0_74 = arith.constant 0 : index
    %217 = vector.load %arg1[%216, %c0_73, %c0_74] : memref<8x8x1xf32, #tpu.memory_space<vmem>>, vector<1x8x1xf32>
    %218 = vector.shape_cast %217 : vector<1x8x1xf32> to vector<8x1xf32>
    %219 = arith.subf %215, %184 : vector<8x32xf32>
    %220 = vector.broadcast %218 : vector<8x1xf32> to vector<8x32xf32>
    %221 = arith.mulf %220, %219 : vector<8x32xf32>
    %222 = arith.addf %184, %221 : vector<8x32xf32>
    %c5_i32 = arith.constant 5 : i32
    %223 = arith.truncf %215 : vector<8x32xf32> to vector<8x32xbf16>
    %c0_75 = arith.constant 0 : index
    %c0_76 = arith.constant 0 : index
    %224 = vector.load %arg3[%c0_75, %c0_76] : memref<32x96xbf16, #tpu.memory_space<vmem>>, vector<32x96xbf16>
    %cst_77 = arith.constant dense<0.000000e+00> : vector<8x96xf32>
    %225 = tpu.matmul %223, %224, %cst_77 {dimension_numbers = #tpu.dot_dimension_numbers<[1], [0], [0], [1], [0, 0, 1, 1], [], []>} : vector<8x32xbf16>, vector<32x96xbf16>, vector<8x96xf32> -> vector<8x96xf32>
    %226 = arith.index_cast %c5_i32 : i32 to index
    %c0_78 = arith.constant 0 : index
    %c0_79 = arith.constant 0 : index
    %227 = vector.load %arg19[%226, %c0_78, %c0_79] : memref<8x8x96xf32, #tpu.memory_space<vmem>>, vector<1x8x96xf32>
    %228 = vector.shape_cast %227 : vector<1x8x96xf32> to vector<8x96xf32>
    %229 = arith.addf %228, %225 : vector<8x96xf32>
    %230 = vector.extract_strided_slice %229 {offsets = [0, 0], sizes = [8, 32], strides = [1, 1]} : vector<8x96xf32> to vector<8x32xf32>
    %231 = arith.negf %230 : vector<8x32xf32>
    %232 = math.exp %231 : vector<8x32xf32>
    %cst_80 = arith.constant 1.000000e+00 : f32
    %233 = vector.broadcast %cst_80 : f32 to vector<8x32xf32>
    %234 = arith.addf %233, %232 : vector<8x32xf32>
    %235 = arith.divf %233, %234 : vector<8x32xf32>
    %236 = vector.extract_strided_slice %229 {offsets = [0, 32], sizes = [8, 32], strides = [1, 1]} : vector<8x96xf32> to vector<8x32xf32>
    %237 = arith.negf %236 : vector<8x32xf32>
    %238 = math.exp %237 : vector<8x32xf32>
    %cst_81 = arith.constant 1.000000e+00 : f32
    %239 = vector.broadcast %cst_81 : f32 to vector<8x32xf32>
    %240 = arith.addf %239, %238 : vector<8x32xf32>
    %241 = arith.divf %239, %240 : vector<8x32xf32>
    %242 = vector.extract_strided_slice %228 {offsets = [0, 64], sizes = [8, 32], strides = [1, 1]} : vector<8x96xf32> to vector<8x32xf32>
    %243 = vector.extract_strided_slice %225 {offsets = [0, 64], sizes = [8, 32], strides = [1, 1]} : vector<8x96xf32> to vector<8x32xf32>
    %244 = vector.broadcast %31 : vector<1x32xf32> to vector<8x32xf32>
    %245 = arith.addf %243, %244 : vector<8x32xf32>
    %246 = arith.mulf %235, %245 : vector<8x32xf32>
    %247 = arith.addf %242, %246 : vector<8x32xf32>
    %248 = math.tanh %247 : vector<8x32xf32>
    %cst_82 = arith.constant 1.000000e+00 : f32
    %249 = vector.broadcast %cst_82 : f32 to vector<8x32xf32>
    %250 = arith.subf %249, %241 : vector<8x32xf32>
    %251 = arith.mulf %250, %248 : vector<8x32xf32>
    %252 = arith.mulf %241, %215 : vector<8x32xf32>
    %253 = arith.addf %251, %252 : vector<8x32xf32>
    %254 = arith.index_cast %c5_i32 : i32 to index
    %c0_83 = arith.constant 0 : index
    %c0_84 = arith.constant 0 : index
    %255 = vector.load %arg1[%254, %c0_83, %c0_84] : memref<8x8x1xf32, #tpu.memory_space<vmem>>, vector<1x8x1xf32>
    %256 = vector.shape_cast %255 : vector<1x8x1xf32> to vector<8x1xf32>
    %257 = arith.subf %253, %222 : vector<8x32xf32>
    %258 = vector.broadcast %256 : vector<8x1xf32> to vector<8x32xf32>
    %259 = arith.mulf %258, %257 : vector<8x32xf32>
    %260 = arith.addf %222, %259 : vector<8x32xf32>
    %c6_i32 = arith.constant 6 : i32
    %261 = arith.truncf %253 : vector<8x32xf32> to vector<8x32xbf16>
    %c0_85 = arith.constant 0 : index
    %c0_86 = arith.constant 0 : index
    %262 = vector.load %arg3[%c0_85, %c0_86] : memref<32x96xbf16, #tpu.memory_space<vmem>>, vector<32x96xbf16>
    %cst_87 = arith.constant dense<0.000000e+00> : vector<8x96xf32>
    %263 = tpu.matmul %261, %262, %cst_87 {dimension_numbers = #tpu.dot_dimension_numbers<[1], [0], [0], [1], [0, 0, 1, 1], [], []>} : vector<8x32xbf16>, vector<32x96xbf16>, vector<8x96xf32> -> vector<8x96xf32>
    %264 = arith.index_cast %c6_i32 : i32 to index
    %c0_88 = arith.constant 0 : index
    %c0_89 = arith.constant 0 : index
    %265 = vector.load %arg19[%264, %c0_88, %c0_89] : memref<8x8x96xf32, #tpu.memory_space<vmem>>, vector<1x8x96xf32>
    %266 = vector.shape_cast %265 : vector<1x8x96xf32> to vector<8x96xf32>
    %267 = arith.addf %266, %263 : vector<8x96xf32>
    %268 = vector.extract_strided_slice %267 {offsets = [0, 0], sizes = [8, 32], strides = [1, 1]} : vector<8x96xf32> to vector<8x32xf32>
    %269 = arith.negf %268 : vector<8x32xf32>
    %270 = math.exp %269 : vector<8x32xf32>
    %cst_90 = arith.constant 1.000000e+00 : f32
    %271 = vector.broadcast %cst_90 : f32 to vector<8x32xf32>
    %272 = arith.addf %271, %270 : vector<8x32xf32>
    %273 = arith.divf %271, %272 : vector<8x32xf32>
    %274 = vector.extract_strided_slice %267 {offsets = [0, 32], sizes = [8, 32], strides = [1, 1]} : vector<8x96xf32> to vector<8x32xf32>
    %275 = arith.negf %274 : vector<8x32xf32>
    %276 = math.exp %275 : vector<8x32xf32>
    %cst_91 = arith.constant 1.000000e+00 : f32
    %277 = vector.broadcast %cst_91 : f32 to vector<8x32xf32>
    %278 = arith.addf %277, %276 : vector<8x32xf32>
    %279 = arith.divf %277, %278 : vector<8x32xf32>
    %280 = vector.extract_strided_slice %266 {offsets = [0, 64], sizes = [8, 32], strides = [1, 1]} : vector<8x96xf32> to vector<8x32xf32>
    %281 = vector.extract_strided_slice %263 {offsets = [0, 64], sizes = [8, 32], strides = [1, 1]} : vector<8x96xf32> to vector<8x32xf32>
    %282 = vector.broadcast %31 : vector<1x32xf32> to vector<8x32xf32>
    %283 = arith.addf %281, %282 : vector<8x32xf32>
    %284 = arith.mulf %273, %283 : vector<8x32xf32>
    %285 = arith.addf %280, %284 : vector<8x32xf32>
    %286 = math.tanh %285 : vector<8x32xf32>
    %cst_92 = arith.constant 1.000000e+00 : f32
    %287 = vector.broadcast %cst_92 : f32 to vector<8x32xf32>
    %288 = arith.subf %287, %279 : vector<8x32xf32>
    %289 = arith.mulf %288, %286 : vector<8x32xf32>
    %290 = arith.mulf %279, %253 : vector<8x32xf32>
    %291 = arith.addf %289, %290 : vector<8x32xf32>
    %292 = arith.index_cast %c6_i32 : i32 to index
    %c0_93 = arith.constant 0 : index
    %c0_94 = arith.constant 0 : index
    %293 = vector.load %arg1[%292, %c0_93, %c0_94] : memref<8x8x1xf32, #tpu.memory_space<vmem>>, vector<1x8x1xf32>
    %294 = vector.shape_cast %293 : vector<1x8x1xf32> to vector<8x1xf32>
    %295 = arith.subf %291, %260 : vector<8x32xf32>
    %296 = vector.broadcast %294 : vector<8x1xf32> to vector<8x32xf32>
    %297 = arith.mulf %296, %295 : vector<8x32xf32>
    %298 = arith.addf %260, %297 : vector<8x32xf32>
    %c7_i32 = arith.constant 7 : i32
    %299 = arith.truncf %291 : vector<8x32xf32> to vector<8x32xbf16>
    %c0_95 = arith.constant 0 : index
    %c0_96 = arith.constant 0 : index
    %300 = vector.load %arg3[%c0_95, %c0_96] : memref<32x96xbf16, #tpu.memory_space<vmem>>, vector<32x96xbf16>
    %cst_97 = arith.constant dense<0.000000e+00> : vector<8x96xf32>
    %301 = tpu.matmul %299, %300, %cst_97 {dimension_numbers = #tpu.dot_dimension_numbers<[1], [0], [0], [1], [0, 0, 1, 1], [], []>} : vector<8x32xbf16>, vector<32x96xbf16>, vector<8x96xf32> -> vector<8x96xf32>
    %302 = arith.index_cast %c7_i32 : i32 to index
    %c0_98 = arith.constant 0 : index
    %c0_99 = arith.constant 0 : index
    %303 = vector.load %arg19[%302, %c0_98, %c0_99] : memref<8x8x96xf32, #tpu.memory_space<vmem>>, vector<1x8x96xf32>
    %304 = vector.shape_cast %303 : vector<1x8x96xf32> to vector<8x96xf32>
    %305 = arith.addf %304, %301 : vector<8x96xf32>
    %306 = vector.extract_strided_slice %305 {offsets = [0, 0], sizes = [8, 32], strides = [1, 1]} : vector<8x96xf32> to vector<8x32xf32>
    %307 = arith.negf %306 : vector<8x32xf32>
    %308 = math.exp %307 : vector<8x32xf32>
    %cst_100 = arith.constant 1.000000e+00 : f32
    %309 = vector.broadcast %cst_100 : f32 to vector<8x32xf32>
    %310 = arith.addf %309, %308 : vector<8x32xf32>
    %311 = arith.divf %309, %310 : vector<8x32xf32>
    %312 = vector.extract_strided_slice %305 {offsets = [0, 32], sizes = [8, 32], strides = [1, 1]} : vector<8x96xf32> to vector<8x32xf32>
    %313 = arith.negf %312 : vector<8x32xf32>
    %314 = math.exp %313 : vector<8x32xf32>
    %cst_101 = arith.constant 1.000000e+00 : f32
    %315 = vector.broadcast %cst_101 : f32 to vector<8x32xf32>
    %316 = arith.addf %315, %314 : vector<8x32xf32>
    %317 = arith.divf %315, %316 : vector<8x32xf32>
    %318 = vector.extract_strided_slice %304 {offsets = [0, 64], sizes = [8, 32], strides = [1, 1]} : vector<8x96xf32> to vector<8x32xf32>
    %319 = vector.extract_strided_slice %301 {offsets = [0, 64], sizes = [8, 32], strides = [1, 1]} : vector<8x96xf32> to vector<8x32xf32>
    %320 = vector.broadcast %31 : vector<1x32xf32> to vector<8x32xf32>
    %321 = arith.addf %319, %320 : vector<8x32xf32>
    %322 = arith.mulf %311, %321 : vector<8x32xf32>
    %323 = arith.addf %318, %322 : vector<8x32xf32>
    %324 = math.tanh %323 : vector<8x32xf32>
    %cst_102 = arith.constant 1.000000e+00 : f32
    %325 = vector.broadcast %cst_102 : f32 to vector<8x32xf32>
    %326 = arith.subf %325, %317 : vector<8x32xf32>
    %327 = arith.mulf %326, %324 : vector<8x32xf32>
    %328 = arith.mulf %317, %291 : vector<8x32xf32>
    %329 = arith.addf %327, %328 : vector<8x32xf32>
    %330 = arith.index_cast %c7_i32 : i32 to index
    %c0_103 = arith.constant 0 : index
    %c0_104 = arith.constant 0 : index
    %331 = vector.load %arg1[%330, %c0_103, %c0_104] : memref<8x8x1xf32, #tpu.memory_space<vmem>>, vector<1x8x1xf32>
    %332 = vector.shape_cast %331 : vector<1x8x1xf32> to vector<8x1xf32>
    %333 = arith.subf %329, %298 : vector<8x32xf32>
    %334 = vector.broadcast %332 : vector<8x1xf32> to vector<8x32xf32>
    %335 = arith.mulf %334, %333 : vector<8x32xf32>
    %336 = arith.addf %298, %335 : vector<8x32xf32>
    %c8_i32 = arith.constant 8 : i32
    %c0_105 = arith.constant 0 : index
    %c0_106 = arith.constant 0 : index
    %337 = vector.load %arg6[%c0_105, %c0_106] : memref<32x128xf32, #tpu.memory_space<vmem>>, vector<32x128xf32>
    %cst_107 = arith.constant dense<0.000000e+00> : vector<8x128xf32>
    %338 = tpu.matmul %336, %337, %cst_107 {dimension_numbers = #tpu.dot_dimension_numbers<[1], [0], [0], [1], [0, 0, 1, 1], [], []>} : vector<8x32xf32>, vector<32x128xf32>, vector<8x128xf32> -> vector<8x128xf32>
    %c0_108 = arith.constant 0 : index
    %c0_109 = arith.constant 0 : index
    %339 = vector.load %arg7[%c0_108, %c0_109] : memref<1x128xf32, #tpu.memory_space<vmem>>, vector<1x128xf32>
    %340 = vector.broadcast %339 : vector<1x128xf32> to vector<8x128xf32>
    %341 = arith.addf %338, %340 : vector<8x128xf32>
    %342 = arith.negf %341 : vector<8x128xf32>
    %343 = math.exp %342 : vector<8x128xf32>
    %cst_110 = arith.constant 1.000000e+00 : f32
    %344 = vector.broadcast %cst_110 : f32 to vector<8x128xf32>
    %345 = arith.addf %344, %343 : vector<8x128xf32>
    %346 = arith.divf %344, %345 : vector<8x128xf32>
    %c0_111 = arith.constant 0 : index
    %c0_112 = arith.constant 0 : index
    %347 = vector.load %arg16[%c0_111, %c0_112] : memref<8x128xf32, #tpu.memory_space<vmem>>, vector<8x128xf32>
    tpu.vector_store %arg16[%c0_111, %c0_112], %346 {strides = array<i32>} : memref<8x128xf32, #tpu.memory_space<vmem>>, vector<8x128xf32>,
    %c0_113 = arith.constant 0 : index
    %c0_114 = arith.constant 0 : index
    %348 = vector.load %arg8[%c0_113, %c0_114] : memref<128x32xf32, #tpu.memory_space<vmem>>, vector<128x32xf32>
    %cst_115 = arith.constant dense<0.000000e+00> : vector<8x32xf32>
    %349 = tpu.matmul %346, %348, %cst_115 {dimension_numbers = #tpu.dot_dimension_numbers<[1], [0], [0], [1], [0, 0, 1, 1], [], []>} : vector<8x128xf32>, vector<128x32xf32>, vector<8x32xf32> -> vector<8x32xf32>
    %c0_116 = arith.constant 0 : index
    %c0_117 = arith.constant 0 : index
    %350 = vector.load %arg9[%c0_116, %c0_117] : memref<1x32xf32, #tpu.memory_space<vmem>>, vector<1x32xf32>
    %351 = vector.broadcast %350 : vector<1x32xf32> to vector<8x32xf32>
    %352 = arith.addf %349, %351 : vector<8x32xf32>
    %c0_118 = arith.constant 0 : index
    %c0_119 = arith.constant 0 : index
    %353 = vector.load %arg13[%c0_118, %c0_119] : memref<1x32xf32, #tpu.memory_space<vmem>>, vector<1x32xf32>
    %c0_i32_120 = arith.constant 0 : i32
    %354 = arith.truncf %352 : vector<8x32xf32> to vector<8x32xbf16>
    %c0_121 = arith.constant 0 : index
    %c0_122 = arith.constant 0 : index
    %355 = vector.load %arg11[%c0_121, %c0_122] : memref<32x96xbf16, #tpu.memory_space<vmem>>, vector<32x96xbf16>
    %cst_123 = arith.constant dense<0.000000e+00> : vector<8x96xf32>
    %356 = tpu.matmul %354, %355, %cst_123 {dimension_numbers = #tpu.dot_dimension_numbers<[1], [0], [0], [1], [0, 0, 1, 1], [], []>} : vector<8x32xbf16>, vector<32x96xbf16>, vector<8x96xf32> -> vector<8x96xf32>
    %357 = arith.index_cast %c0_i32_120 : i32 to index
    %c0_124 = arith.constant 0 : index
    %c0_125 = arith.constant 0 : index
    %358 = vector.load %arg20[%357, %c0_124, %c0_125] : memref<8x8x96xf32, #tpu.memory_space<vmem>>, vector<1x8x96xf32>
    %359 = vector.shape_cast %358 : vector<1x8x96xf32> to vector<8x96xf32>
    %360 = arith.addf %359, %356 : vector<8x96xf32>
    %361 = vector.extract_strided_slice %360 {offsets = [0, 0], sizes = [8, 32], strides = [1, 1]} : vector<8x96xf32> to vector<8x32xf32>
    %362 = arith.negf %361 : vector<8x32xf32>
    %363 = math.exp %362 : vector<8x32xf32>
    %cst_126 = arith.constant 1.000000e+00 : f32
    %364 = vector.broadcast %cst_126 : f32 to vector<8x32xf32>
    %365 = arith.addf %364, %363 : vector<8x32xf32>
    %366 = arith.divf %364, %365 : vector<8x32xf32>
    %367 = vector.extract_strided_slice %360 {offsets = [0, 32], sizes = [8, 32], strides = [1, 1]} : vector<8x96xf32> to vector<8x32xf32>
    %368 = arith.negf %367 : vector<8x32xf32>
    %369 = math.exp %368 : vector<8x32xf32>
    %cst_127 = arith.constant 1.000000e+00 : f32
    %370 = vector.broadcast %cst_127 : f32 to vector<8x32xf32>
    %371 = arith.addf %370, %369 : vector<8x32xf32>
    %372 = arith.divf %370, %371 : vector<8x32xf32>
    %373 = vector.extract_strided_slice %359 {offsets = [0, 64], sizes = [8, 32], strides = [1, 1]} : vector<8x96xf32> to vector<8x32xf32>
    %374 = vector.extract_strided_slice %356 {offsets = [0, 64], sizes = [8, 32], strides = [1, 1]} : vector<8x96xf32> to vector<8x32xf32>
    %375 = vector.broadcast %353 : vector<1x32xf32> to vector<8x32xf32>
    %376 = arith.addf %374, %375 : vector<8x32xf32>
    %377 = arith.mulf %366, %376 : vector<8x32xf32>
    %378 = arith.addf %373, %377 : vector<8x32xf32>
    %379 = math.tanh %378 : vector<8x32xf32>
    %cst_128 = arith.constant 1.000000e+00 : f32
    %380 = vector.broadcast %cst_128 : f32 to vector<8x32xf32>
    %381 = arith.subf %380, %372 : vector<8x32xf32>
    %382 = arith.mulf %381, %379 : vector<8x32xf32>
    %383 = arith.mulf %372, %352 : vector<8x32xf32>
    %384 = arith.addf %382, %383 : vector<8x32xf32>
    %385 = arith.index_cast %c0_i32_120 : i32 to index
    %c0_129 = arith.constant 0 : index
    %c0_130 = arith.constant 0 : index
    %386 = vector.load %arg21[%385, %c0_129, %c0_130] : memref<8x8x32xf32, #tpu.memory_space<vmem>>, vector<1x8x32xf32>
    %387 = vector.shape_cast %386 : vector<1x8x32xf32> to vector<8x32xf32>
    %388 = vector.shape_cast %384 : vector<8x32xf32> to vector<1x8x32xf32>
    tpu.vector_store %arg21[%385, %c0_129, %c0_130], %388 {strides = array<i32>} : memref<8x8x32xf32, #tpu.memory_space<vmem>>, vector<1x8x32xf32>,
    %c1_i32_131 = arith.constant 1 : i32
    %389 = arith.truncf %384 : vector<8x32xf32> to vector<8x32xbf16>
    %c0_132 = arith.constant 0 : index
    %c0_133 = arith.constant 0 : index
    %390 = vector.load %arg11[%c0_132, %c0_133] : memref<32x96xbf16, #tpu.memory_space<vmem>>, vector<32x96xbf16>
    %cst_134 = arith.constant dense<0.000000e+00> : vector<8x96xf32>
    %391 = tpu.matmul %389, %390, %cst_134 {dimension_numbers = #tpu.dot_dimension_numbers<[1], [0], [0], [1], [0, 0, 1, 1], [], []>} : vector<8x32xbf16>, vector<32x96xbf16>, vector<8x96xf32> -> vector<8x96xf32>
    %392 = arith.index_cast %c1_i32_131 : i32 to index
    %c0_135 = arith.constant 0 : index
    %c0_136 = arith.constant 0 : index
    %393 = vector.load %arg20[%392, %c0_135, %c0_136] : memref<8x8x96xf32, #tpu.memory_space<vmem>>, vector<1x8x96xf32>
    %394 = vector.shape_cast %393 : vector<1x8x96xf32> to vector<8x96xf32>
    %395 = arith.addf %394, %391 : vector<8x96xf32>
    %396 = vector.extract_strided_slice %395 {offsets = [0, 0], sizes = [8, 32], strides = [1, 1]} : vector<8x96xf32> to vector<8x32xf32>
    %397 = arith.negf %396 : vector<8x32xf32>
    %398 = math.exp %397 : vector<8x32xf32>
    %cst_137 = arith.constant 1.000000e+00 : f32
    %399 = vector.broadcast %cst_137 : f32 to vector<8x32xf32>
    %400 = arith.addf %399, %398 : vector<8x32xf32>
    %401 = arith.divf %399, %400 : vector<8x32xf32>
    %402 = vector.extract_strided_slice %395 {offsets = [0, 32], sizes = [8, 32], strides = [1, 1]} : vector<8x96xf32> to vector<8x32xf32>
    %403 = arith.negf %402 : vector<8x32xf32>
    %404 = math.exp %403 : vector<8x32xf32>
    %cst_138 = arith.constant 1.000000e+00 : f32
    %405 = vector.broadcast %cst_138 : f32 to vector<8x32xf32>
    %406 = arith.addf %405, %404 : vector<8x32xf32>
    %407 = arith.divf %405, %406 : vector<8x32xf32>
    %408 = vector.extract_strided_slice %394 {offsets = [0, 64], sizes = [8, 32], strides = [1, 1]} : vector<8x96xf32> to vector<8x32xf32>
    %409 = vector.extract_strided_slice %391 {offsets = [0, 64], sizes = [8, 32], strides = [1, 1]} : vector<8x96xf32> to vector<8x32xf32>
    %410 = vector.broadcast %353 : vector<1x32xf32> to vector<8x32xf32>
    %411 = arith.addf %409, %410 : vector<8x32xf32>
    %412 = arith.mulf %401, %411 : vector<8x32xf32>
    %413 = arith.addf %408, %412 : vector<8x32xf32>
    %414 = math.tanh %413 : vector<8x32xf32>
    %cst_139 = arith.constant 1.000000e+00 : f32
    %415 = vector.broadcast %cst_139 : f32 to vector<8x32xf32>
    %416 = arith.subf %415, %407 : vector<8x32xf32>
    %417 = arith.mulf %416, %414 : vector<8x32xf32>
    %418 = arith.mulf %407, %384 : vector<8x32xf32>
    %419 = arith.addf %417, %418 : vector<8x32xf32>
    %420 = arith.index_cast %c1_i32_131 : i32 to index
    %c0_140 = arith.constant 0 : index
    %c0_141 = arith.constant 0 : index
    %421 = vector.load %arg21[%420, %c0_140, %c0_141] : memref<8x8x32xf32, #tpu.memory_space<vmem>>, vector<1x8x32xf32>
    %422 = vector.shape_cast %421 : vector<1x8x32xf32> to vector<8x32xf32>
    %423 = vector.shape_cast %419 : vector<8x32xf32> to vector<1x8x32xf32>
    tpu.vector_store %arg21[%420, %c0_140, %c0_141], %423 {strides = array<i32>} : memref<8x8x32xf32, #tpu.memory_space<vmem>>, vector<1x8x32xf32>,
    %c2_i32_142 = arith.constant 2 : i32
    %424 = arith.truncf %419 : vector<8x32xf32> to vector<8x32xbf16>
    %c0_143 = arith.constant 0 : index
    %c0_144 = arith.constant 0 : index
    %425 = vector.load %arg11[%c0_143, %c0_144] : memref<32x96xbf16, #tpu.memory_space<vmem>>, vector<32x96xbf16>
    %cst_145 = arith.constant dense<0.000000e+00> : vector<8x96xf32>
    %426 = tpu.matmul %424, %425, %cst_145 {dimension_numbers = #tpu.dot_dimension_numbers<[1], [0], [0], [1], [0, 0, 1, 1], [], []>} : vector<8x32xbf16>, vector<32x96xbf16>, vector<8x96xf32> -> vector<8x96xf32>
    %427 = arith.index_cast %c2_i32_142 : i32 to index
    %c0_146 = arith.constant 0 : index
    %c0_147 = arith.constant 0 : index
    %428 = vector.load %arg20[%427, %c0_146, %c0_147] : memref<8x8x96xf32, #tpu.memory_space<vmem>>, vector<1x8x96xf32>
    %429 = vector.shape_cast %428 : vector<1x8x96xf32> to vector<8x96xf32>
    %430 = arith.addf %429, %426 : vector<8x96xf32>
    %431 = vector.extract_strided_slice %430 {offsets = [0, 0], sizes = [8, 32], strides = [1, 1]} : vector<8x96xf32> to vector<8x32xf32>
    %432 = arith.negf %431 : vector<8x32xf32>
    %433 = math.exp %432 : vector<8x32xf32>
    %cst_148 = arith.constant 1.000000e+00 : f32
    %434 = vector.broadcast %cst_148 : f32 to vector<8x32xf32>
    %435 = arith.addf %434, %433 : vector<8x32xf32>
    %436 = arith.divf %434, %435 : vector<8x32xf32>
    %437 = vector.extract_strided_slice %430 {offsets = [0, 32], sizes = [8, 32], strides = [1, 1]} : vector<8x96xf32> to vector<8x32xf32>
    %438 = arith.negf %437 : vector<8x32xf32>
    %439 = math.exp %438 : vector<8x32xf32>
    %cst_149 = arith.constant 1.000000e+00 : f32
    %440 = vector.broadcast %cst_149 : f32 to vector<8x32xf32>
    %441 = arith.addf %440, %439 : vector<8x32xf32>
    %442 = arith.divf %440, %441 : vector<8x32xf32>
    %443 = vector.extract_strided_slice %429 {offsets = [0, 64], sizes = [8, 32], strides = [1, 1]} : vector<8x96xf32> to vector<8x32xf32>
    %444 = vector.extract_strided_slice %426 {offsets = [0, 64], sizes = [8, 32], strides = [1, 1]} : vector<8x96xf32> to vector<8x32xf32>
    %445 = vector.broadcast %353 : vector<1x32xf32> to vector<8x32xf32>
    %446 = arith.addf %444, %445 : vector<8x32xf32>
    %447 = arith.mulf %436, %446 : vector<8x32xf32>
    %448 = arith.addf %443, %447 : vector<8x32xf32>
    %449 = math.tanh %448 : vector<8x32xf32>
    %cst_150 = arith.constant 1.000000e+00 : f32
    %450 = vector.broadcast %cst_150 : f32 to vector<8x32xf32>
    %451 = arith.subf %450, %442 : vector<8x32xf32>
    %452 = arith.mulf %451, %449 : vector<8x32xf32>
    %453 = arith.mulf %442, %419 : vector<8x32xf32>
    %454 = arith.addf %452, %453 : vector<8x32xf32>
    %455 = arith.index_cast %c2_i32_142 : i32 to index
    %c0_151 = arith.constant 0 : index
    %c0_152 = arith.constant 0 : index
    %456 = vector.load %arg21[%455, %c0_151, %c0_152] : memref<8x8x32xf32, #tpu.memory_space<vmem>>, vector<1x8x32xf32>
    %457 = vector.shape_cast %456 : vector<1x8x32xf32> to vector<8x32xf32>
    %458 = vector.shape_cast %454 : vector<8x32xf32> to vector<1x8x32xf32>
    tpu.vector_store %arg21[%455, %c0_151, %c0_152], %458 {strides = array<i32>} : memref<8x8x32xf32, #tpu.memory_space<vmem>>, vector<1x8x32xf32>,
    %c3_i32_153 = arith.constant 3 : i32
    %459 = arith.truncf %454 : vector<8x32xf32> to vector<8x32xbf16>
    %c0_154 = arith.constant 0 : index
    %c0_155 = arith.constant 0 : index
    %460 = vector.load %arg11[%c0_154, %c0_155] : memref<32x96xbf16, #tpu.memory_space<vmem>>, vector<32x96xbf16>
    %cst_156 = arith.constant dense<0.000000e+00> : vector<8x96xf32>
    %461 = tpu.matmul %459, %460, %cst_156 {dimension_numbers = #tpu.dot_dimension_numbers<[1], [0], [0], [1], [0, 0, 1, 1], [], []>} : vector<8x32xbf16>, vector<32x96xbf16>, vector<8x96xf32> -> vector<8x96xf32>
    %462 = arith.index_cast %c3_i32_153 : i32 to index
    %c0_157 = arith.constant 0 : index
    %c0_158 = arith.constant 0 : index
    %463 = vector.load %arg20[%462, %c0_157, %c0_158] : memref<8x8x96xf32, #tpu.memory_space<vmem>>, vector<1x8x96xf32>
    %464 = vector.shape_cast %463 : vector<1x8x96xf32> to vector<8x96xf32>
    %465 = arith.addf %464, %461 : vector<8x96xf32>
    %466 = vector.extract_strided_slice %465 {offsets = [0, 0], sizes = [8, 32], strides = [1, 1]} : vector<8x96xf32> to vector<8x32xf32>
    %467 = arith.negf %466 : vector<8x32xf32>
    %468 = math.exp %467 : vector<8x32xf32>
    %cst_159 = arith.constant 1.000000e+00 : f32
    %469 = vector.broadcast %cst_159 : f32 to vector<8x32xf32>
    %470 = arith.addf %469, %468 : vector<8x32xf32>
    %471 = arith.divf %469, %470 : vector<8x32xf32>
    %472 = vector.extract_strided_slice %465 {offsets = [0, 32], sizes = [8, 32], strides = [1, 1]} : vector<8x96xf32> to vector<8x32xf32>
    %473 = arith.negf %472 : vector<8x32xf32>
    %474 = math.exp %473 : vector<8x32xf32>
    %cst_160 = arith.constant 1.000000e+00 : f32
    %475 = vector.broadcast %cst_160 : f32 to vector<8x32xf32>
    %476 = arith.addf %475, %474 : vector<8x32xf32>
    %477 = arith.divf %475, %476 : vector<8x32xf32>
    %478 = vector.extract_strided_slice %464 {offsets = [0, 64], sizes = [8, 32], strides = [1, 1]} : vector<8x96xf32> to vector<8x32xf32>
    %479 = vector.extract_strided_slice %461 {offsets = [0, 64], sizes = [8, 32], strides = [1, 1]} : vector<8x96xf32> to vector<8x32xf32>
    %480 = vector.broadcast %353 : vector<1x32xf32> to vector<8x32xf32>
    %481 = arith.addf %479, %480 : vector<8x32xf32>
    %482 = arith.mulf %471, %481 : vector<8x32xf32>
    %483 = arith.addf %478, %482 : vector<8x32xf32>
    %484 = math.tanh %483 : vector<8x32xf32>
    %cst_161 = arith.constant 1.000000e+00 : f32
    %485 = vector.broadcast %cst_161 : f32 to vector<8x32xf32>
    %486 = arith.subf %485, %477 : vector<8x32xf32>
    %487 = arith.mulf %486, %484 : vector<8x32xf32>
    %488 = arith.mulf %477, %454 : vector<8x32xf32>
    %489 = arith.addf %487, %488 : vector<8x32xf32>
    %490 = arith.index_cast %c3_i32_153 : i32 to index
    %c0_162 = arith.constant 0 : index
    %c0_163 = arith.constant 0 : index
    %491 = vector.load %arg21[%490, %c0_162, %c0_163] : memref<8x8x32xf32, #tpu.memory_space<vmem>>, vector<1x8x32xf32>
    %492 = vector.shape_cast %491 : vector<1x8x32xf32> to vector<8x32xf32>
    %493 = vector.shape_cast %489 : vector<8x32xf32> to vector<1x8x32xf32>
    tpu.vector_store %arg21[%490, %c0_162, %c0_163], %493 {strides = array<i32>} : memref<8x8x32xf32, #tpu.memory_space<vmem>>, vector<1x8x32xf32>,
    %c4_i32_164 = arith.constant 4 : i32
    %494 = arith.truncf %489 : vector<8x32xf32> to vector<8x32xbf16>
    %c0_165 = arith.constant 0 : index
    %c0_166 = arith.constant 0 : index
    %495 = vector.load %arg11[%c0_165, %c0_166] : memref<32x96xbf16, #tpu.memory_space<vmem>>, vector<32x96xbf16>
    %cst_167 = arith.constant dense<0.000000e+00> : vector<8x96xf32>
    %496 = tpu.matmul %494, %495, %cst_167 {dimension_numbers = #tpu.dot_dimension_numbers<[1], [0], [0], [1], [0, 0, 1, 1], [], []>} : vector<8x32xbf16>, vector<32x96xbf16>, vector<8x96xf32> -> vector<8x96xf32>
    %497 = arith.index_cast %c4_i32_164 : i32 to index
    %c0_168 = arith.constant 0 : index
    %c0_169 = arith.constant 0 : index
    %498 = vector.load %arg20[%497, %c0_168, %c0_169] : memref<8x8x96xf32, #tpu.memory_space<vmem>>, vector<1x8x96xf32>
    %499 = vector.shape_cast %498 : vector<1x8x96xf32> to vector<8x96xf32>
    %500 = arith.addf %499, %496 : vector<8x96xf32>
    %501 = vector.extract_strided_slice %500 {offsets = [0, 0], sizes = [8, 32], strides = [1, 1]} : vector<8x96xf32> to vector<8x32xf32>
    %502 = arith.negf %501 : vector<8x32xf32>
    %503 = math.exp %502 : vector<8x32xf32>
    %cst_170 = arith.constant 1.000000e+00 : f32
    %504 = vector.broadcast %cst_170 : f32 to vector<8x32xf32>
    %505 = arith.addf %504, %503 : vector<8x32xf32>
    %506 = arith.divf %504, %505 : vector<8x32xf32>
    %507 = vector.extract_strided_slice %500 {offsets = [0, 32], sizes = [8, 32], strides = [1, 1]} : vector<8x96xf32> to vector<8x32xf32>
    %508 = arith.negf %507 : vector<8x32xf32>
    %509 = math.exp %508 : vector<8x32xf32>
    %cst_171 = arith.constant 1.000000e+00 : f32
    %510 = vector.broadcast %cst_171 : f32 to vector<8x32xf32>
    %511 = arith.addf %510, %509 : vector<8x32xf32>
    %512 = arith.divf %510, %511 : vector<8x32xf32>
    %513 = vector.extract_strided_slice %499 {offsets = [0, 64], sizes = [8, 32], strides = [1, 1]} : vector<8x96xf32> to vector<8x32xf32>
    %514 = vector.extract_strided_slice %496 {offsets = [0, 64], sizes = [8, 32], strides = [1, 1]} : vector<8x96xf32> to vector<8x32xf32>
    %515 = vector.broadcast %353 : vector<1x32xf32> to vector<8x32xf32>
    %516 = arith.addf %514, %515 : vector<8x32xf32>
    %517 = arith.mulf %506, %516 : vector<8x32xf32>
    %518 = arith.addf %513, %517 : vector<8x32xf32>
    %519 = math.tanh %518 : vector<8x32xf32>
    %cst_172 = arith.constant 1.000000e+00 : f32
    %520 = vector.broadcast %cst_172 : f32 to vector<8x32xf32>
    %521 = arith.subf %520, %512 : vector<8x32xf32>
    %522 = arith.mulf %521, %519 : vector<8x32xf32>
    %523 = arith.mulf %512, %489 : vector<8x32xf32>
    %524 = arith.addf %522, %523 : vector<8x32xf32>
    %525 = arith.index_cast %c4_i32_164 : i32 to index
    %c0_173 = arith.constant 0 : index
    %c0_174 = arith.constant 0 : index
    %526 = vector.load %arg21[%525, %c0_173, %c0_174] : memref<8x8x32xf32, #tpu.memory_space<vmem>>, vector<1x8x32xf32>
    %527 = vector.shape_cast %526 : vector<1x8x32xf32> to vector<8x32xf32>
    %528 = vector.shape_cast %524 : vector<8x32xf32> to vector<1x8x32xf32>
    tpu.vector_store %arg21[%525, %c0_173, %c0_174], %528 {strides = array<i32>} : memref<8x8x32xf32, #tpu.memory_space<vmem>>, vector<1x8x32xf32>,
    %c5_i32_175 = arith.constant 5 : i32
    %529 = arith.truncf %524 : vector<8x32xf32> to vector<8x32xbf16>
    %c0_176 = arith.constant 0 : index
    %c0_177 = arith.constant 0 : index
    %530 = vector.load %arg11[%c0_176, %c0_177] : memref<32x96xbf16, #tpu.memory_space<vmem>>, vector<32x96xbf16>
    %cst_178 = arith.constant dense<0.000000e+00> : vector<8x96xf32>
    %531 = tpu.matmul %529, %530, %cst_178 {dimension_numbers = #tpu.dot_dimension_numbers<[1], [0], [0], [1], [0, 0, 1, 1], [], []>} : vector<8x32xbf16>, vector<32x96xbf16>, vector<8x96xf32> -> vector<8x96xf32>
    %532 = arith.index_cast %c5_i32_175 : i32 to index
    %c0_179 = arith.constant 0 : index
    %c0_180 = arith.constant 0 : index
    %533 = vector.load %arg20[%532, %c0_179, %c0_180] : memref<8x8x96xf32, #tpu.memory_space<vmem>>, vector<1x8x96xf32>
    %534 = vector.shape_cast %533 : vector<1x8x96xf32> to vector<8x96xf32>
    %535 = arith.addf %534, %531 : vector<8x96xf32>
    %536 = vector.extract_strided_slice %535 {offsets = [0, 0], sizes = [8, 32], strides = [1, 1]} : vector<8x96xf32> to vector<8x32xf32>
    %537 = arith.negf %536 : vector<8x32xf32>
    %538 = math.exp %537 : vector<8x32xf32>
    %cst_181 = arith.constant 1.000000e+00 : f32
    %539 = vector.broadcast %cst_181 : f32 to vector<8x32xf32>
    %540 = arith.addf %539, %538 : vector<8x32xf32>
    %541 = arith.divf %539, %540 : vector<8x32xf32>
    %542 = vector.extract_strided_slice %535 {offsets = [0, 32], sizes = [8, 32], strides = [1, 1]} : vector<8x96xf32> to vector<8x32xf32>
    %543 = arith.negf %542 : vector<8x32xf32>
    %544 = math.exp %543 : vector<8x32xf32>
    %cst_182 = arith.constant 1.000000e+00 : f32
    %545 = vector.broadcast %cst_182 : f32 to vector<8x32xf32>
    %546 = arith.addf %545, %544 : vector<8x32xf32>
    %547 = arith.divf %545, %546 : vector<8x32xf32>
    %548 = vector.extract_strided_slice %534 {offsets = [0, 64], sizes = [8, 32], strides = [1, 1]} : vector<8x96xf32> to vector<8x32xf32>
    %549 = vector.extract_strided_slice %531 {offsets = [0, 64], sizes = [8, 32], strides = [1, 1]} : vector<8x96xf32> to vector<8x32xf32>
    %550 = vector.broadcast %353 : vector<1x32xf32> to vector<8x32xf32>
    %551 = arith.addf %549, %550 : vector<8x32xf32>
    %552 = arith.mulf %541, %551 : vector<8x32xf32>
    %553 = arith.addf %548, %552 : vector<8x32xf32>
    %554 = math.tanh %553 : vector<8x32xf32>
    %cst_183 = arith.constant 1.000000e+00 : f32
    %555 = vector.broadcast %cst_183 : f32 to vector<8x32xf32>
    %556 = arith.subf %555, %547 : vector<8x32xf32>
    %557 = arith.mulf %556, %554 : vector<8x32xf32>
    %558 = arith.mulf %547, %524 : vector<8x32xf32>
    %559 = arith.addf %557, %558 : vector<8x32xf32>
    %560 = arith.index_cast %c5_i32_175 : i32 to index
    %c0_184 = arith.constant 0 : index
    %c0_185 = arith.constant 0 : index
    %561 = vector.load %arg21[%560, %c0_184, %c0_185] : memref<8x8x32xf32, #tpu.memory_space<vmem>>, vector<1x8x32xf32>
    %562 = vector.shape_cast %561 : vector<1x8x32xf32> to vector<8x32xf32>
    %563 = vector.shape_cast %559 : vector<8x32xf32> to vector<1x8x32xf32>
    tpu.vector_store %arg21[%560, %c0_184, %c0_185], %563 {strides = array<i32>} : memref<8x8x32xf32, #tpu.memory_space<vmem>>, vector<1x8x32xf32>,
    %c6_i32_186 = arith.constant 6 : i32
    %564 = arith.truncf %559 : vector<8x32xf32> to vector<8x32xbf16>
    %c0_187 = arith.constant 0 : index
    %c0_188 = arith.constant 0 : index
    %565 = vector.load %arg11[%c0_187, %c0_188] : memref<32x96xbf16, #tpu.memory_space<vmem>>, vector<32x96xbf16>
    %cst_189 = arith.constant dense<0.000000e+00> : vector<8x96xf32>
    %566 = tpu.matmul %564, %565, %cst_189 {dimension_numbers = #tpu.dot_dimension_numbers<[1], [0], [0], [1], [0, 0, 1, 1], [], []>} : vector<8x32xbf16>, vector<32x96xbf16>, vector<8x96xf32> -> vector<8x96xf32>
    %567 = arith.index_cast %c6_i32_186 : i32 to index
    %c0_190 = arith.constant 0 : index
    %c0_191 = arith.constant 0 : index
    %568 = vector.load %arg20[%567, %c0_190, %c0_191] : memref<8x8x96xf32, #tpu.memory_space<vmem>>, vector<1x8x96xf32>
    %569 = vector.shape_cast %568 : vector<1x8x96xf32> to vector<8x96xf32>
    %570 = arith.addf %569, %566 : vector<8x96xf32>
    %571 = vector.extract_strided_slice %570 {offsets = [0, 0], sizes = [8, 32], strides = [1, 1]} : vector<8x96xf32> to vector<8x32xf32>
    %572 = arith.negf %571 : vector<8x32xf32>
    %573 = math.exp %572 : vector<8x32xf32>
    %cst_192 = arith.constant 1.000000e+00 : f32
    %574 = vector.broadcast %cst_192 : f32 to vector<8x32xf32>
    %575 = arith.addf %574, %573 : vector<8x32xf32>
    %576 = arith.divf %574, %575 : vector<8x32xf32>
    %577 = vector.extract_strided_slice %570 {offsets = [0, 32], sizes = [8, 32], strides = [1, 1]} : vector<8x96xf32> to vector<8x32xf32>
    %578 = arith.negf %577 : vector<8x32xf32>
    %579 = math.exp %578 : vector<8x32xf32>
    %cst_193 = arith.constant 1.000000e+00 : f32
    %580 = vector.broadcast %cst_193 : f32 to vector<8x32xf32>
    %581 = arith.addf %580, %579 : vector<8x32xf32>
    %582 = arith.divf %580, %581 : vector<8x32xf32>
    %583 = vector.extract_strided_slice %569 {offsets = [0, 64], sizes = [8, 32], strides = [1, 1]} : vector<8x96xf32> to vector<8x32xf32>
    %584 = vector.extract_strided_slice %566 {offsets = [0, 64], sizes = [8, 32], strides = [1, 1]} : vector<8x96xf32> to vector<8x32xf32>
    %585 = vector.broadcast %353 : vector<1x32xf32> to vector<8x32xf32>
    %586 = arith.addf %584, %585 : vector<8x32xf32>
    %587 = arith.mulf %576, %586 : vector<8x32xf32>
    %588 = arith.addf %583, %587 : vector<8x32xf32>
    %589 = math.tanh %588 : vector<8x32xf32>
    %cst_194 = arith.constant 1.000000e+00 : f32
    %590 = vector.broadcast %cst_194 : f32 to vector<8x32xf32>
    %591 = arith.subf %590, %582 : vector<8x32xf32>
    %592 = arith.mulf %591, %589 : vector<8x32xf32>
    %593 = arith.mulf %582, %559 : vector<8x32xf32>
    %594 = arith.addf %592, %593 : vector<8x32xf32>
    %595 = arith.index_cast %c6_i32_186 : i32 to index
    %c0_195 = arith.constant 0 : index
    %c0_196 = arith.constant 0 : index
    %596 = vector.load %arg21[%595, %c0_195, %c0_196] : memref<8x8x32xf32, #tpu.memory_space<vmem>>, vector<1x8x32xf32>
    %597 = vector.shape_cast %596 : vector<1x8x32xf32> to vector<8x32xf32>
    %598 = vector.shape_cast %594 : vector<8x32xf32> to vector<1x8x32xf32>
    tpu.vector_store %arg21[%595, %c0_195, %c0_196], %598 {strides = array<i32>} : memref<8x8x32xf32, #tpu.memory_space<vmem>>, vector<1x8x32xf32>,
    %c7_i32_197 = arith.constant 7 : i32
    %599 = arith.truncf %594 : vector<8x32xf32> to vector<8x32xbf16>
    %c0_198 = arith.constant 0 : index
    %c0_199 = arith.constant 0 : index
    %600 = vector.load %arg11[%c0_198, %c0_199] : memref<32x96xbf16, #tpu.memory_space<vmem>>, vector<32x96xbf16>
    %cst_200 = arith.constant dense<0.000000e+00> : vector<8x96xf32>
    %601 = tpu.matmul %599, %600, %cst_200 {dimension_numbers = #tpu.dot_dimension_numbers<[1], [0], [0], [1], [0, 0, 1, 1], [], []>} : vector<8x32xbf16>, vector<32x96xbf16>, vector<8x96xf32> -> vector<8x96xf32>
    %602 = arith.index_cast %c7_i32_197 : i32 to index
    %c0_201 = arith.constant 0 : index
    %c0_202 = arith.constant 0 : index
    %603 = vector.load %arg20[%602, %c0_201, %c0_202] : memref<8x8x96xf32, #tpu.memory_space<vmem>>, vector<1x8x96xf32>
    %604 = vector.shape_cast %603 : vector<1x8x96xf32> to vector<8x96xf32>
    %605 = arith.addf %604, %601 : vector<8x96xf32>
    %606 = vector.extract_strided_slice %605 {offsets = [0, 0], sizes = [8, 32], strides = [1, 1]} : vector<8x96xf32> to vector<8x32xf32>
    %607 = arith.negf %606 : vector<8x32xf32>
    %608 = math.exp %607 : vector<8x32xf32>
    %cst_203 = arith.constant 1.000000e+00 : f32
    %609 = vector.broadcast %cst_203 : f32 to vector<8x32xf32>
    %610 = arith.addf %609, %608 : vector<8x32xf32>
    %611 = arith.divf %609, %610 : vector<8x32xf32>
    %612 = vector.extract_strided_slice %605 {offsets = [0, 32], sizes = [8, 32], strides = [1, 1]} : vector<8x96xf32> to vector<8x32xf32>
    %613 = arith.negf %612 : vector<8x32xf32>
    %614 = math.exp %613 : vector<8x32xf32>
    %cst_204 = arith.constant 1.000000e+00 : f32
    %615 = vector.broadcast %cst_204 : f32 to vector<8x32xf32>
    %616 = arith.addf %615, %614 : vector<8x32xf32>
    %617 = arith.divf %615, %616 : vector<8x32xf32>
    %618 = vector.extract_strided_slice %604 {offsets = [0, 64], sizes = [8, 32], strides = [1, 1]} : vector<8x96xf32> to vector<8x32xf32>
    %619 = vector.extract_strided_slice %601 {offsets = [0, 64], sizes = [8, 32], strides = [1, 1]} : vector<8x96xf32> to vector<8x32xf32>
    %620 = vector.broadcast %353 : vector<1x32xf32> to vector<8x32xf32>
    %621 = arith.addf %619, %620 : vector<8x32xf32>
    %622 = arith.mulf %611, %621 : vector<8x32xf32>
    %623 = arith.addf %618, %622 : vector<8x32xf32>
    %624 = math.tanh %623 : vector<8x32xf32>
    %cst_205 = arith.constant 1.000000e+00 : f32
    %625 = vector.broadcast %cst_205 : f32 to vector<8x32xf32>
    %626 = arith.subf %625, %617 : vector<8x32xf32>
    %627 = arith.mulf %626, %624 : vector<8x32xf32>
    %628 = arith.mulf %617, %594 : vector<8x32xf32>
    %629 = arith.addf %627, %628 : vector<8x32xf32>
    %630 = arith.index_cast %c7_i32_197 : i32 to index
    %c0_206 = arith.constant 0 : index
    %c0_207 = arith.constant 0 : index
    %631 = vector.load %arg21[%630, %c0_206, %c0_207] : memref<8x8x32xf32, #tpu.memory_space<vmem>>, vector<1x8x32xf32>
    %632 = vector.shape_cast %631 : vector<1x8x32xf32> to vector<8x32xf32>
    %633 = vector.shape_cast %629 : vector<8x32xf32> to vector<1x8x32xf32>
    tpu.vector_store %arg21[%630, %c0_206, %c0_207], %633 {strides = array<i32>} : memref<8x8x32xf32, #tpu.memory_space<vmem>>, vector<1x8x32xf32>,
    %c8_i32_208 = arith.constant 8 : i32
    %c0_209 = arith.constant 0 : index
    %c0_210 = arith.constant 0 : index
    %c0_211 = arith.constant 0 : index
    %634 = vector.load %arg21[%c0_209, %c0_210, %c0_211] : memref<8x8x32xf32, #tpu.memory_space<vmem>>, vector<8x8x32xf32>
    %635 = vector.shape_cast %634 : vector<8x8x32xf32> to vector<64x32xf32>
    %636 = arith.truncf %635 : vector<64x32xf32> to vector<64x32xbf16>
    %c0_212 = arith.constant 0 : index
    %c0_213 = arith.constant 0 : index
    %637 = vector.load %arg14[%c0_212, %c0_213] : memref<32x128xbf16, #tpu.memory_space<vmem>>, vector<32x128xbf16>
    %cst_214 = arith.constant dense<0.000000e+00> : vector<64x128xf32>
    %638 = tpu.matmul %636, %637, %cst_214 {dimension_numbers = #tpu.dot_dimension_numbers<[1], [0], [0], [1], [0, 0, 1, 1], [], []>} : vector<64x32xbf16>, vector<32x128xbf16>, vector<64x128xf32> -> vector<64x128xf32>
    %639 = vector.shape_cast %638 : vector<64x128xf32> to vector<8x8x128xf32>
    %c0_215 = arith.constant 0 : index
    %c0_216 = arith.constant 0 : index
    %640 = vector.load %arg15[%c0_215, %c0_216] : memref<1x128xf32, #tpu.memory_space<vmem>>, vector<1x128xf32>
    %641 = vector.shape_cast %640 : vector<1x128xf32> to vector<1x1x128xf32>
    %642 = vector.broadcast %641 : vector<1x1x128xf32> to vector<8x8x128xf32>
    %643 = arith.addf %639, %642 : vector<8x8x128xf32>
    %c0_217 = arith.constant 0 : index
    %c0_218 = arith.constant 0 : index
    %c0_219 = arith.constant 0 : index
    %644 = vector.load %arg17[%c0_217, %c0_218, %c0_219] : memref<8x8x128xf32, #tpu.memory_space<vmem>>, vector<8x8x128xf32>
    tpu.vector_store %arg17[%c0_217, %c0_218, %c0_219], %643 {strides = array<i32>} : memref<8x8x128xf32, #tpu.memory_space<vmem>>, vector<8x8x128xf32>,
    %645 = arith.subf %1, %643 : vector<8x8x128xf32>
    %646 = arith.mulf %645, %645 : vector<8x8x128xf32>
    %647 = vector.broadcast %0 : vector<8x8x1xf32> to vector<8x8x128xf32>
    %648 = arith.mulf %646, %647 : vector<8x8x128xf32>
    %649 = vector.shape_cast %648 : vector<8x8x128xf32> to vector<1x8x8x128xf32>
    %cst_220 = arith.constant dense<0.000000e+00> : vector<1xf32>
    %650 = vector.multi_reduction <add>, %649, %cst_220 [1, 2, 3] : vector<1x8x8x128xf32> to vector<1xf32>
    %651 = vector.shape_cast %650 : vector<1xf32> to vector<1x1x1x1xf32>
    %652 = vector.extract %651[0, 0, 0, 0] : f32 from vector<1x1x1x1xf32>
    %653 = vector.shape_cast %0 : vector<8x8x1xf32> to vector<1x8x8x1xf32>
    %cst_221 = arith.constant dense<0.000000e+00> : vector<1xf32>
    %654 = vector.multi_reduction <add>, %653, %cst_221 [1, 2, 3] : vector<1x8x8x1xf32> to vector<1xf32>
    %655 = vector.shape_cast %654 : vector<1xf32> to vector<1x1x1x1xf32>
    %656 = vector.extract %655[0, 0, 0, 0] : f32 from vector<1x1x1x1xf32>
    %cst_222 = arith.constant 1.000000e+00 : f32
    %657 = arith.maximumf %656, %cst_222 : f32
    %658 = arith.divf %652, %657 : f32
    %659 = vector.broadcast %658 : f32 to vector<1x1xf32>
    %c0_223 = arith.constant 0 : index
    %c0_224 = arith.constant 0 : index
    %660 = vector.load %arg18[%c0_223, %c0_224] : memref<1x1xf32, #tpu.memory_space<vmem>>, vector<1x1xf32>
    tpu.vector_store %arg18[%c0_223, %c0_224], %659 {strides = array<i32>} : memref<1x1xf32, #tpu.memory_space<vmem>>, vector<1x1xf32>,
    return
  }
}

</mosaic_0001>

<bundles_post_ra>
// kernel: tpu_custom_call.1
= control target key start
LH: loop header
LB: loop body
LE: loop exit
PB: predicated region body
PF: predicated region fallthrough
CT: control target
= control target key end

     0   :  { %s3848_s0 = inlined_call_operand.vmem [shape: f32[8,8,128], index: 0, kind: input, shape index: {}]   ;;  %s3849_s1 = inlined_call_operand.vmem [shape: f32[8,8,1], index: 1, kind: input, shape index: {}]   ;;  %s3850_s2 = inlined_call_operand.vmem [shape: bf16[128,96], index: 2, kind: input, shape index: {}]   ;;  %s3851_s3 = inlined_call_operand.vmem [shape: bf16[32,96], index: 3, kind: input, shape index: {}]   ;;  %s3852_s4 = inlined_call_operand.vmem [shape: f32[1,96], index: 4, kind: input, shape index: {}]   ;;  %s3853_s5 = inlined_call_operand.vmem [shape: f32[1,32], index: 5, kind: input, shape index: {}]   ;;  %s3854_s6 = inlined_call_operand.vmem [shape: f32[32,128], index: 6, kind: input, shape index: {}]   ;;  %s3855_s7 = inlined_call_operand.vmem [shape: f32[1,128], index: 7, kind: input, shape index: {}]   ;;  %s3856_s8 = inlined_call_operand.vmem [shape: f32[128,32], index: 8, kind: input, shape index: {}]   ;;  %s3857_s9 = inlined_call_operand.vmem [shape: f32[1,32], index: 9, kind: input, shape index: {}]   ;;  %s3858_s10 = inlined_call_operand.vmem [shape: bf16[128,96], index: 10, kind: input, shape index: {}]   ;;  %s3859_s11 = inlined_call_operand.vmem [shape: bf16[32,96], index: 11, kind: input, shape index: {}]   ;;  %s3860_s12 = inlined_call_operand.vmem [shape: f32[1,96], index: 12, kind: input, shape index: {}]   ;;  %s3861_s13 = inlined_call_operand.vmem [shape: f32[1,32], index: 13, kind: input, shape index: {}]   ;;  %s3862_s14 = inlined_call_operand.vmem [shape: bf16[32,128], index: 14, kind: input, shape index: {}]   ;;  %s3863_s15 = inlined_call_operand.vmem [shape: f32[1,128], index: 15, kind: input, shape index: {}]   ;;  %s3864_s16 = inlined_call_operand.hbm [shape: f32[8,128], index: 16, kind: output, shape index: {0}]   ;;  %s3865_s17 = inlined_call_operand.hbm [shape: f32[8,8,128], index: 17, kind: output, shape index: {1}]   ;;  %s3866_s18 = inlined_call_operand.hbm [shape: f32[1,1], index: 18, kind: output, shape index: {2}]  }
   0x1   :  { %3870 = sst [smem:[#allocation12_spill]] %s3848_s0 }
   0x2   :  { %3871 = sst [smem:[#allocation13_spill]] %s3849_s1 }
   0x3   :  { %3872 = sst [smem:[#allocation14_spill]] %s3850_s2 }
   0x4   :  { %24 = vsyncpa [#allocation6], 0  ;;  %s3873_s29 = sld [smem:[#allocation14_spill]]  ;;  %v3020_v2 = vmov 0   ;;  %v2383_v9 = vld [vmem:[%s3853_s5] ss:$0 sm:$0xff] }
   0x5   :  { %2802 = vset.pattern.permute.xlu1 %v3020_v2  ;;  %2801 = vset.pattern.permute.xlu0 %v3020_v2  ;;  %s3874_s23 = sld [smem:[#allocation12_spill]]  ;;  %s3021_s0 = smov 64  }
   0x6   :  { %503 = vrot.lane.b32.xlu0 %v2383_v9, %s3021_s0 }
   0xa   :  { %v2803_v0 = vld [vmem:[%s3873_s29 + $0x38] sm:$0xff]   ;;  %v2804_v1 = vld [vmem:[%s3873_s29 + $0x30] sm:$0xff]   ;;  %v2805_v3 = vld [vmem:[%s3873_s29 + $0x28] sm:$0xff]  }
   0xb   :  { %2549 = vmatprep.subr.bf16.mxu0 %v2803_v0  ;;  %v2806_v4 = vld [vmem:[%s3873_s29 + $0x20] sm:$0xff]   ;;  %v3147_v6 = vld [vmem:[%s3874_s23 + $0x8] sm:$0xff]  ;;  %v2807_v8 = vld [vmem:[%s3873_s29 + $0x18] sm:$0xff]  }
   0xc   :  { %2550 = vmatpush3.bf16.msra.mxu0 %v2803_v0  ;;  %v3142_v5 = vld [vmem:[%s3874_s23] sm:$0xff]  ;;  %v2808_v10 = vld [vmem:[%s3873_s29 + $0x10] sm:$0xff]   ;;  %v2809_v11 = vld [vmem:[%s3873_s29 + $0x8] sm:$0xff]  }
   0xd   :  { %2551 = vmatprep.subr.bf16.mxu0 %v2804_v1  ;;  %v75_v7 = vpack.c.bf16 %v3147_v6, %v3142_v5  ;;  %v2810_v12 = vld [vmem:[%s3873_s29] sm:$0xff]   ;;  %v3170_v13 = vld [vmem:[%s3874_s23 + $0x10] sm:$0xff]  ;;  %v3175_v14 = vld [vmem:[%s3874_s23 + $0x18] sm:$0xff] }
   0xe   :  { %v3180_v15 = vld [vmem:[%s3874_s23 + $0x20] sm:$0xff]  ;;  %v3185_v16 = vld [vmem:[%s3874_s23 + $0x28] sm:$0xff]  ;;  %v76_v17 = vpack.c.bf16 %v3175_v14, %v3170_v13 }
   0xf   :  { %2565 = vmatprep.mubr.bf16.mxu0 %v75_v7 }
  0x10   :  { %2552 = vmatpush3.bf16.msra.mxu0 %v2804_v1 }
  0x11   :  { %2553 = vmatprep.subr.bf16.mxu0 %v2805_v3 }
  0x14   :  { %2554 = vmatpush3.bf16.msra.mxu0 %v2805_v3 }
  0x15   :  { %2555 = vmatprep.subr.bf16.mxu0 %v2806_v4 }
  0x18   :  { %2556 = vmatpush3.bf16.msra.mxu0 %v2806_v4 }
  0x19   :  { %2557 = vmatprep.subr.bf16.mxu0 %v2807_v8 }
  0x1c   :  { %2558 = vmatpush3.bf16.msra.mxu0 %v2807_v8 }
  0x1d   :  { %2559 = vmatprep.subr.bf16.mxu0 %v2808_v10 }
  0x20   :  { %2560 = vmatpush3.bf16.msra.mxu0 %v2808_v10 }
  0x21   :  { %2561 = vmatprep.subr.bf16.mxu0 %v2809_v11 }
  0x24   :  { %2562 = vmatpush3.bf16.msra.mxu0 %v2809_v11 }
  0x25   :  { %2563 = vmatprep.subr.bf16.mxu0 %v2810_v12 }
  0x26   :  { %25 = vsyncpa [#allocation8], 0  ;;  %v3192_v18 = vld [vmem:[%s3851_s3 + $0x8] sm:$0xff]   ;;  %v77_v19 = vpack.c.bf16 %v3185_v16, %v3180_v15  ;;  %v3022_v20 = vmov 0.0   ;;  %v3201_v21 = vld [vmem:[%s3874_s23 + $0x30] sm:$0xff]  ;;  %vm3023_vm0 = vmmov 0  }
  0x27   :  { %v74_v22 = vld [vmem:[%s3874_s23 + $0x38] sm:$0xff]  ;;  %v3209_v23 = vld [vmem:[%s3851_s3] sm:$0xff]   ;;  %vm223_vm1 = vcmask 785408   ;;  %s3875_s27 = sld [smem:[#allocation13_spill]]  ;;  %v2814_v62 = vld [vmem:[%s3858_s10 + $0x30] sm:$0xff]   ;;  %s3024_s24 = smov 96  }
  0x28   :  { %2564 = vmatpush3.bf16.msra.mxu0 %v2810_v12  ;;  %v78_v24 = vpack.c.bf16 %v74_v22, %v3201_v21  ;;  %v2370_v25 = vld [vmem:[%s3852_s4] ss:$0 sm:$0xff]  ;;  %v2813_v61 = vld [vmem:[%s3858_s10 + $0x38] sm:$0xff]   ;;  %v2815_v63 = vld [vmem:[%s3858_s10 + $0x28] sm:$0xff]   ;;  %vm446_vm2 = vcmask 261120   ;;  %vm2286_vm3 = vcmask 7168  }
  0x29   :  { %2597 = vmatprep.subr.bf16.mxu0 %v3022_v20  ;;  %2573 = vmatprep.subr.bf16.mxu1 %v2813_v61  ;;  %v2817_v4 = vld [vmem:[%s3858_s10 + $0x18] sm:$0xff]   ;;  %v2818_v8 = vld [vmem:[%s3858_s10 + $0x10] sm:$0xff]   ;;  %v2819_v10 = vld [vmem:[%s3858_s10 + $0x8] sm:$0xff]   ;;  %s3027_s3 = smov [#allocation5]  }
  0x2a   :  { %2574 = vmatpush3.bf16.msra.mxu1 %v2813_v61  ;;  %v2820_v11 = vld [vmem:[%s3858_s10] sm:$0xff]  }
  0x2b   :  { %2566 = vmatmul.mubr.bf16.vlgmr.msra.gmra.mxu0 %v76_v17  ;;  %2575 = vmatprep.subr.bf16.mxu1 %v2814_v62  ;;  %v3310_v12 = vld [vmem:[%s3860_s12] ss:$0 sm:$0xff] }
  0x2c   :  { %2598 = vmatpush3.bf16.msra.mxu0 %v3192_v18  ;;  %2569 = vmatprep.mubr.bf16.mxu0 %v77_v19  ;;  %239 = vst.msk [vmem:[#allocation3] sm:$0xff] %vm223_vm1, %v3310_v12 }
  0x2d   :  { %2599 = vmatprep.subr.bf16.mxu0 %v3022_v20  ;;  %v3242_v56 = vld [vmem:[%s3875_s27] sm:$0xff]  ;;  %v3248_v57 = vld [vmem:[%s3875_s27 + $0x18] sm:$0xff]  ;;  %v3254_v58 = vld [vmem:[%s3875_s27 + $0x28] sm:$0xff] }
  0x2e   :  { %2576 = vmatpush3.bf16.msra.mxu1 %v2814_v62  ;;  %v3270_v1 = vld [vmem:[%s3875_s27 + $0x8] sm:$0xff]  ;;  %v3279_v3 = vld [vmem:[%s3875_s27 + $0x10] sm:$0xff]  ;;  %v3288_v7 = vld [vmem:[%s3875_s27 + $0x20] sm:$0xff] }
  0x2f   :  { %2577 = vmatprep.subr.bf16.mxu1 %v2815_v63  ;;  %v3297_v9 = vld [vmem:[%s3875_s27 + $0x30] sm:$0xff] }
  0x30   :  { %2600 = vmatpush3.bf16.msra.mxu0 %v3209_v23 }
  0x31   :  { %2613 = vmatprep.subr.bf16.mxu0 %v3022_v20 }
  0x32   :  { %2578 = vmatpush3.bf16.msra.mxu1 %v2815_v63 }
  0x33   :  { %2570 = vmatmul.mubr.bf16.gmra.mxu0 %v78_v24 }
  0x34   :  { %2601 = vmatprep.mubr.msk.bf16.mxu0 %vm3023_vm0, %v3022_v20 }
  0x3b   :  { %2602 = vmatmul.mubr.bf16.vlgmr.msra.gmra.mxu0 %v3020_v2  ;;  %v2816_v2 = vld [vmem:[%s3858_s10 + $0x20] sm:$0xff]  }
  0x3c   :  { %2614 = vmatpush3.bf16.msra.mxu0 %v3192_v18  ;;  %2617 = vmatprep.mubr.msk.bf16.mxu0 %vm3023_vm0, %v3022_v20 }
  0x3d   :  { %2615 = vmatprep.subr.bf16.mxu0 %v3022_v20  ;;  %2579 = vmatprep.subr.bf16.mxu1 %v2816_v2 }
  0x3e   :  { %2580 = vmatpush3.bf16.msra.mxu1 %v2816_v2 }
  0x3f   :  { %2581 = vmatprep.subr.bf16.mxu1 %v2817_v4 }
  0x40   :  { %2616 = vmatpush3.bf16.msra.mxu0 %v3209_v23 }
  0x41   :  { %2629 = vmatprep.subr.bf16.mxu0 %v3022_v20 }
  0x42   :  { %2582 = vmatpush3.bf16.msra.mxu1 %v2817_v4 }
  0x43   :  { %2583 = vmatprep.subr.bf16.mxu1 %v2818_v8 }
  0x46   :  { %2584 = vmatpush3.bf16.msra.mxu1 %v2818_v8 }
  0x47   :  { %2585 = vmatprep.subr.bf16.mxu1 %v2819_v10 }
  0x4a   :  { %2586 = vmatpush3.bf16.msra.mxu1 %v2819_v10 }
  0x4b   :  { %2587 = vmatprep.subr.bf16.mxu1 %v2820_v11 }
  0x4e   :  { %2588 = vmatpush3.bf16.msra.mxu1 %v2820_v11 }
  0x4f   :  { %2605 = vmatprep.subr.bf16.mxu1 %v3022_v20 }
  0x78   :  { %v3232_v41 = vpop.permute.xlu0 %503 }
  0xeb   :  { %v2567_v26 = vpop.f32.mrf.mxu0 }
  0xec   :  { %v217_v27 = vadd.f32 %v2567_v26, %v2370_v25 }
  0xed   :  { %v177_v28 = vpop.f32.mrf.mxu0 }
  0xee   :  { %226 = vst.msk [vmem:[#allocation2 + $0x10] sm:$0xff] %vm223_vm1, %v217_v27  ;;  %v215_v29 = vadd.f32 %v2370_v25, %v177_v28 }
  0xef   :  { %v2568_v30 = vpop.f32.mrf.mxu0 }
  0xf0   :  { %224 = vst.msk [vmem:[#allocation2] sm:$0xff] %vm223_vm1, %v215_v29  ;;  %v218_v31 = vadd.f32 %v2568_v30, %v2370_v25 }
  0xf1   :  { %v180_v32 = vpop.f32.mrf.mxu0 }
  0xf2   :  { %227 = vst.msk [vmem:[#allocation2 + $0x18] sm:$0xff] %vm223_vm1, %v218_v31  ;;  %v216_v33 = vadd.f32 %v2370_v25, %v180_v32 }
  0xf3   :  { %v2571_v34 = vpop.f32.mrf.mxu0 }
  0xf4   :  { %225 = vst.msk [vmem:[#allocation2 + $0x8] sm:$0xff] %vm223_vm1, %v216_v33  ;;  %v221_v35 = vadd.f32 %v2571_v34, %v2370_v25 }
  0xf5   :  { %v193_v36 = vpop.f32.mrf.mxu0 }
  0xf6   :  { %230 = vst.msk [vmem:[#allocation2 + $0x30] sm:$0xff] %vm223_vm1, %v221_v35  ;;  %v219_v37 = vadd.f32 %v2370_v25, %v193_v36 }
  0xf7   :  { %v2572_v38 = vpop.f32.mrf.mxu0  ;;  %v490_v48 = vld [vmem:[#allocation2] sm:$0xff] }
  0xf8   :  { %228 = vst.msk [vmem:[#allocation2 + $0x20] sm:$0xff] %vm223_vm1, %v219_v37  ;;  %v222_v39 = vadd.f32 %v2572_v38, %v2370_v25 }
  0xf9   :  { %v196_v40 = vpop.f32.mrf.mxu0 }
  0xfa   :  { %231 = vst.msk [vmem:[#allocation2 + $0x38] sm:$0xff] %vm223_vm1, %v222_v39  ;;  %v220_v42 = vadd.f32 %v2370_v25, %v196_v40 }
  0xfb   :  { %v484_v43 = vpop.f32.mrf.mxu0  ;;  %v582_v63 = vld [vmem:[#allocation2 + $0x8] sm:$0xff] }
  0xfc   :  { %229 = vst.msk [vmem:[#allocation2 + $0x28] sm:$0xff] %vm223_vm1, %v220_v42  ;;  %v506_v44 = vadd.f32 %v3232_v41, %v484_v43  ;;  %v491_v49 = vadd.f32 %v490_v48, %v484_v43 }
  0xfd   :  { %v2603_v45 = vpop.f32.mrf.mxu0 }
  0xfe   :  { %508 = vrot.lane.b32.xlu0 %v506_v44, %s3021_s0  ;;  %v2382_v50 = vmul.f32 -1.442695, %v491_v49 }
  0xff   :  { %v487_v46 = vpop.f32.mrf.mxu0 }
 0x100   :  { %2839 = vpow2.f32 %v2382_v50 }
 0x101   :  { %v2604_v47 = vpop.f32.mrf.mxu0 }
 0x102   :  { %242 = vperm.xlu0 %2801, %v3242_v56  }
 0x106   :  { %257 = vperm.xlu0 %2801, %v3248_v57  }
 0x10a   :  { %267 = vperm.xlu0 %2801, %v3254_v58  }
 0x10d   :  { %v2840_v51 = vpop.eup %2839 }
 0x10e   :  { %v495_v52 = vadd.f32 1.0, %v2840_v51 }
 0x110   :  { %2841 = vrcp.f32 %v495_v52 }
 0x11d   :  { %v2842_v53 = vpop.eup %2841 }
 0x11e   :  { %v518_v17 = vsub.f32 1.0, %v2842_v53  ;;  %v524_v22 = vmul.f32 0.0, %v2842_v53 }
 0x170   :  { %v509_v54 = vpop.permute.xlu0 %508 }
 0x171   :  { %v511_v55 = vmul.f32 %v2842_v53, %v509_v54 }
 0x173   :  { %513 = vrot.lane.b32.xlu1 %v511_v55, %s3021_s0 }
 0x17d   :  { %v3319_v27 = vpop.permute.xlu0 %242 }
 0x17e   :  { %v275_v28 = vmul.f32 %v3319_v27, %v3142_v5 }
 0x181   :  { %v3325_v30 = vpop.permute.xlu0 %257 }
 0x182   :  { %v278_v32 = vmul.f32 %v3325_v30, %v3175_v14 }
 0x185   :  { %v3333_v35 = vpop.permute.xlu0 %267 }
 0x186   :  { %v280_v37 = vmul.f32 %v3333_v35, %v3185_v16 }
 0x1e5   :  { %v514_v59 = vpop.permute.xlu1 %513 }
 0x1e6   :  { %v516_v60 = vadd.f32 %v514_v59, %v490_v48 }
 0x1e8   :  { %2843 = vtanh.f32 %v516_v60 }
 0x1f5   :  { %v2844_v0 = vpop.eup %2843 }
 0x1f6   :  { %520 = vrot.lane.b32.xlu1 %v2844_v0, %s3024_s24 }
 0x1fa   :  { %247 = vperm.xlu1 %2802, %v3270_v1  }
 0x1fe   :  { %252 = vperm.xlu1 %2802, %v3279_v3  }
 0x202   :  { %262 = vperm.xlu1 %2802, %v3288_v7  }
 0x206   :  { %272 = vperm.xlu1 %2802, %v3297_v9  }
 0x268   :  { %v521_v19 = vpop.permute.xlu1 %520 }
 0x269   :  { %v523_v24 = vmul.f32 %v521_v19, %v518_v17 }
 0x26b   :  { %v3314_v25 = vadd.f32 %v524_v22, %v523_v24 }
 0x26d   :  { %v534_v26 = vpack.c.bf16 %v3314_v25, %v3314_v25 }
 0x26f   :  { %536 = vrot.lane.b32.xlu0 %v534_v26, %s3024_s24 }
 0x275   :  { %v3323_v29 = vpop.permute.xlu1 %247 }
 0x276   :  { %v276_v31 = vmul.f32 %v3323_v29, %v3147_v6 }
 0x278   :  { %v282_v33 = vpack.c.bf16 %v276_v31, %v275_v28 }
 0x279   :  { %v3331_v34 = vpop.permute.xlu1 %252 }
 0x27a   :  { %v277_v36 = vmul.f32 %v3331_v34, %v3170_v13  ;;  %2589 = vmatprep.mubr.bf16.mxu1 %v282_v33 }
 0x27c   :  { %v283_v5 = vpack.c.bf16 %v278_v32, %v277_v36 }
 0x27d   :  { %v3339_v38 = vpop.permute.xlu1 %262 }
 0x27e   :  { %v279_v6 = vmul.f32 %v3339_v38, %v3180_v15  ;;  %2590 = vmatmul.mubr.bf16.vlgmr.msra.gmra.mxu1 %v283_v5 }
 0x27f   :  { %2606 = vmatpush3.bf16.msra.mxu1 %v3192_v18 }
 0x280   :  { %v284_v14 = vpack.c.bf16 %v280_v37, %v279_v6  ;;  %2607 = vmatprep.subr.bf16.mxu1 %v3022_v20 }
 0x281   :  { %v3345_v39 = vpop.permute.xlu1 %272 }
 0x282   :  { %v281_v13 = vmul.f32 %v3345_v39, %v3201_v21  ;;  %2593 = vmatprep.mubr.bf16.mxu1 %v284_v14 }
 0x283   :  { %2608 = vmatpush3.bf16.msra.mxu1 %v3209_v23 }
 0x284   :  { %v285_v16 = vpack.c.bf16 %v281_v13, %v281_v13  ;;  %2621 = vmatprep.subr.bf16.mxu1 %v3022_v20 }
 0x286   :  { %2594 = vmatmul.mubr.bf16.gmra.mxu1 %v285_v16  ;;  %v668_v16 = vld [vmem:[#allocation2 + $0x10] sm:$0xff] }
 0x287   :  { %2609 = vmatprep.mubr.msk.bf16.mxu1 %vm3023_vm0, %v3022_v20 }
 0x2e1   :  { %v537_v15 = vpop.permute.xlu0 %536 }
 0x2e2   :  { %2610 = vmatmul.mubr.msk.bf16.vlgmr.msra.gmra.mxu1 %vm446_vm2, %v537_v15 }
 0x2e3   :  { %2622 = vmatpush3.bf16.msra.mxu1 %v3192_v18  ;;  %2625 = vmatprep.mubr.msk.bf16.mxu1 %vm3023_vm0, %v3022_v20 }
 0x2e4   :  { %2623 = vmatprep.subr.bf16.mxu1 %v3022_v20 }
 0x2e7   :  { %2624 = vmatpush3.bf16.msra.mxu1 %v3209_v23 }
 0x2e8   :  { %2637 = vmatprep.subr.bf16.mxu1 %v3022_v20 }
 0x33e   :  { %v2591_v21 = vpop.f32.mrf.mxu1 }
 0x33f   :  { %v416_v40 = vadd.f32 %v2591_v21, %v3310_v12 }
 0x340   :  { %v384_v42 = vpop.f32.mrf.mxu1 }
 0x341   :  { %424 = vst.msk [vmem:[#allocation3 + $0x18] sm:$0xff] %vm223_vm1, %v416_v40  ;;  %v414_v43 = vadd.f32 %v3310_v12, %v384_v42 }
 0x342   :  { %v2592_v44 = vpop.f32.mrf.mxu1 }
 0x343   :  { %422 = vst.msk [vmem:[#allocation3 + $0x8] sm:$0xff] %vm223_vm1, %v414_v43  ;;  %v417_v45 = vadd.f32 %v2592_v44, %v3310_v12 }
 0x344   :  { %v387_v46 = vpop.f32.mrf.mxu1 }
 0x345   :  { %425 = vst.msk [vmem:[#allocation3 + $0x20] sm:$0xff] %vm223_vm1, %v417_v45  ;;  %v415_v47 = vadd.f32 %v3310_v12, %v387_v46 }
 0x346   :  { %v2595_v48 = vpop.f32.mrf.mxu1 }
 0x347   :  { %423 = vst.msk [vmem:[#allocation3 + $0x10] sm:$0xff] %vm223_vm1, %v415_v47  ;;  %v420_v49 = vadd.f32 %v2595_v48, %v3310_v12 }
 0x348   :  { %v400_v50 = vpop.f32.mrf.mxu1 }
 0x349   :  { %428 = vst.msk [vmem:[#allocation3 + $0x38] sm:$0xff] %vm223_vm1, %v420_v49  ;;  %v418_v51 = vadd.f32 %v3310_v12, %v400_v50 }
 0x34a   :  { %v2596_v52 = vpop.f32.mrf.mxu1 }
 0x34b   :  { %426 = vst.msk [vmem:[#allocation3 + $0x28] sm:$0xff] %vm223_vm1, %v418_v51 }
 0x34c   :  { %v403_v53 = vpop.f32.mrf.mxu1 }
 0x34d   :  { %v419_v54 = vadd.f32 %v3310_v12, %v403_v53 }
 0x34f   :  { %427 = vst.msk [vmem:[#allocation3 + $0x30] sm:$0xff] %vm223_vm1, %v419_v54 }
 0x3a2   :  { %v575_v55 = vpop.f32.mrf.mxu1 }
 0x3a3   :  { %v590_v59 = vadd.f32 %v575_v55, %v3232_v41  ;;  %v583_v0 = vadd.f32 %v582_v63, %v575_v55 }
 0x3a4   :  { %v2611_v60 = vpop.f32.mrf.mxu1 }
 0x3a5   :  { %592 = vrot.lane.b32.xlu1 %v590_v59, %s3021_s0  ;;  %v2385_v2 = vmul.f32 -1.442695, %v583_v0  ;;  %v754_v0 = vld [vmem:[#allocation2 + $0x18] sm:$0xff] }
 0x3a6   :  { %v578_v61 = vpop.f32.mrf.mxu1 }
 0x3a7   :  { %2845 = vpow2.f32 %v2385_v2 }
 0x3a8   :  { %v2612_v62 = vpop.f32.mrf.mxu1 }
 0x3b4   :  { %v2846_v4 = vpop.eup %2845 }
 0x3b5   :  { %v587_v8 = vadd.f32 1.0, %v2846_v4 }
 0x3b7   :  { %2847 = vrcp.f32 %v587_v8 }
 0x3c4   :  { %v2848_v10 = vpop.eup %2847 }
 0x3c5   :  { %v602_v24 = vsub.f32 1.0, %v2848_v10  ;;  %v608_v28 = vmul.f32 %v2848_v10, %v3314_v25 }
 0x417   :  { %v593_v11 = vpop.permute.xlu1 %592 }
 0x418   :  { %v595_v12 = vmul.f32 %v2848_v10, %v593_v11 }
 0x41a   :  { %597 = vrot.lane.b32.xlu0 %v595_v12, %s3021_s0 }
 0x48c   :  { %v598_v17 = vpop.permute.xlu0 %597 }
 0x48d   :  { %v600_v19 = vadd.f32 %v598_v17, %v582_v63 }
 0x48f   :  { %2849 = vtanh.f32 %v600_v19 }
 0x49c   :  { %v2850_v22 = vpop.eup %2849 }
 0x49d   :  { %604 = vrot.lane.b32.xlu1 %v2850_v22, %s3024_s24 }
 0x50f   :  { %v605_v26 = vpop.permute.xlu1 %604 }
 0x510   :  { %v607_v31 = vmul.f32 %v605_v26, %v602_v24 }
 0x512   :  { %v3379_v32 = vadd.f32 %v608_v28, %v607_v31 }
 0x514   :  { %v620_v33 = vpack.c.bf16 %v3379_v32, %v3379_v32 }
 0x516   :  { %622 = vrot.lane.b32.xlu0 %v620_v33, %s3024_s24 }
 0x588   :  { %v623_v36 = vpop.permute.xlu0 %622 }
 0x589   :  { %2618 = vmatmul.mubr.msk.bf16.vlgmr.msra.gmra.mxu0 %vm446_vm2, %v623_v36 }
 0x58a   :  { %2630 = vmatpush3.bf16.msra.mxu0 %v3192_v18  ;;  %2633 = vmatprep.mubr.msk.bf16.mxu0 %vm3023_vm0, %v3022_v20 }
 0x58b   :  { %2631 = vmatprep.subr.bf16.mxu0 %v3022_v20 }
 0x58e   :  { %2632 = vmatpush3.bf16.msra.mxu0 %v3209_v23 }
 0x58f   :  { %2645 = vmatprep.subr.bf16.mxu0 %v3022_v20 }
 0x649   :  { %v661_v5 = vpop.f32.mrf.mxu0 }
 0x64a   :  { %v676_v37 = vadd.f32 %v661_v5, %v3232_v41  ;;  %v669_v15 = vadd.f32 %v668_v16, %v661_v5 }
 0x64b   :  { %v2619_v6 = vpop.f32.mrf.mxu0 }
 0x64c   :  { %678 = vrot.lane.b32.xlu1 %v676_v37, %s3021_s0  ;;  %v2388_v21 = vmul.f32 -1.442695, %v669_v15 }
 0x64d   :  { %v664_v14 = vpop.f32.mrf.mxu0 }
 0x64e   :  { %2851 = vpow2.f32 %v2388_v21  ;;  %v840_v21 = vld [vmem:[#allocation2 + $0x20] sm:$0xff] }
 0x64f   :  { %v2620_v13 = vpop.f32.mrf.mxu0 }
 0x65b   :  { %v2852_v40 = vpop.eup %2851 }
 0x65c   :  { %v673_v42 = vadd.f32 1.0, %v2852_v40 }
 0x65e   :  { %2853 = vrcp.f32 %v673_v42 }
 0x66b   :  { %v2854_v43 = vpop.eup %2853 }
 0x66c   :  { %v688_v49 = vsub.f32 1.0, %v2854_v43  ;;  %v694_v51 = vmul.f32 %v2854_v43, %v3379_v32 }
 0x6be   :  { %v679_v44 = vpop.permute.xlu1 %678 }
 0x6bf   :  { %v681_v45 = vmul.f32 %v2854_v43, %v679_v44 }
 0x6c1   :  { %683 = vrot.lane.b32.xlu0 %v681_v45, %s3021_s0 }
 0x733   :  { %v684_v46 = vpop.permute.xlu0 %683 }
 0x734   :  { %v686_v47 = vadd.f32 %v684_v46, %v668_v16 }
 0x736   :  { %2855 = vtanh.f32 %v686_v47 }
 0x743   :  { %v2856_v48 = vpop.eup %2855 }
 0x744   :  { %690 = vrot.lane.b32.xlu1 %v2856_v48, %s3024_s24 }
 0x7b6   :  { %v691_v50 = vpop.permute.xlu1 %690 }
 0x7b7   :  { %v693_v52 = vmul.f32 %v691_v50, %v688_v49 }
 0x7b9   :  { %v3396_v53 = vadd.f32 %v694_v51, %v693_v52 }
 0x7bb   :  { %v706_v54 = vpack.c.bf16 %v3396_v53, %v3396_v53 }
 0x7bd   :  { %708 = vrot.lane.b32.xlu0 %v706_v54, %s3024_s24 }
 0x82f   :  { %v709_v55 = vpop.permute.xlu0 %708 }
 0x830   :  { %2626 = vmatmul.mubr.msk.bf16.vlgmr.msra.gmra.mxu1 %vm446_vm2, %v709_v55 }
 0x831   :  { %2638 = vmatpush3.bf16.msra.mxu1 %v3192_v18  ;;  %2641 = vmatprep.mubr.msk.bf16.mxu1 %vm3023_vm0, %v3022_v20 }
 0x832   :  { %2639 = vmatprep.subr.bf16.mxu1 %v3022_v20 }
 0x835   :  { %2640 = vmatpush3.bf16.msra.mxu1 %v3209_v23 }
 0x836   :  { %2653 = vmatprep.subr.bf16.mxu1 %v3022_v20 }
 0x8f0   :  { %v747_v59 = vpop.f32.mrf.mxu1 }
 0x8f1   :  { %v762_v60 = vadd.f32 %v747_v59, %v3232_v41  ;;  %v755_v2 = vadd.f32 %v754_v0, %v747_v59 }
 0x8f2   :  { %v2627_v61 = vpop.f32.mrf.mxu1 }
 0x8f3   :  { %764 = vrot.lane.b32.xlu1 %v762_v60, %s3021_s0  ;;  %v2391_v4 = vmul.f32 -1.442695, %v755_v2 }
 0x8f4   :  { %v750_v62 = vpop.f32.mrf.mxu1 }
 0x8f5   :  { %2857 = vpow2.f32 %v2391_v4 }
 0x8f6   :  { %v2628_v63 = vpop.f32.mrf.mxu1 }
 0x902   :  { %v2858_v8 = vpop.eup %2857 }
 0x903   :  { %v759_v10 = vadd.f32 1.0, %v2858_v8  ;;  %v926_v8 = vld [vmem:[#allocation2 + $0x28] sm:$0xff] }
 0x905   :  { %2859 = vrcp.f32 %v759_v10 }
 0x912   :  { %v2860_v11 = vpop.eup %2859 }
 0x913   :  { %v774_v26 = vsub.f32 1.0, %v2860_v11  ;;  %v780_v31 = vmul.f32 %v2860_v11, %v3396_v53 }
 0x965   :  { %v765_v12 = vpop.permute.xlu1 %764 }
 0x966   :  { %v767_v17 = vmul.f32 %v2860_v11, %v765_v12 }
 0x968   :  { %769 = vrot.lane.b32.xlu0 %v767_v17, %s3021_s0 }
 0x9da   :  { %v770_v19 = vpop.permute.xlu0 %769 }
 0x9db   :  { %v772_v22 = vadd.f32 %v770_v19, %v754_v0 }
 0x9dd   :  { %2861 = vtanh.f32 %v772_v22 }
 0x9ea   :  { %v2862_v24 = vpop.eup %2861 }
 0x9eb   :  { %776 = vrot.lane.b32.xlu1 %v2862_v24, %s3024_s24 }
 0xa5d   :  { %v777_v28 = vpop.permute.xlu1 %776 }
 0xa5e   :  { %v779_v33 = vmul.f32 %v777_v28, %v774_v26 }
 0xa60   :  { %v3413_v36 = vadd.f32 %v780_v31, %v779_v33 }
 0xa62   :  { %v792_v5 = vpack.c.bf16 %v3413_v36, %v3413_v36 }
 0xa64   :  { %794 = vrot.lane.b32.xlu0 %v792_v5, %s3024_s24 }
 0xad6   :  { %v795_v37 = vpop.permute.xlu0 %794 }
 0xad7   :  { %2634 = vmatmul.mubr.msk.bf16.vlgmr.msra.gmra.mxu0 %vm446_vm2, %v795_v37 }
 0xad8   :  { %2646 = vmatpush3.bf16.msra.mxu0 %v3192_v18  ;;  %2649 = vmatprep.mubr.msk.bf16.mxu0 %vm3023_vm0, %v3022_v20 }
 0xad9   :  { %2647 = vmatprep.subr.bf16.mxu0 %v3022_v20 }
 0xadc   :  { %2648 = vmatpush3.bf16.msra.mxu0 %v3209_v23 }
 0xadd   :  { %2661 = vmatprep.subr.mxu0 %v3022_v20 }
 0xb97   :  { %v833_v6 = vpop.f32.mrf.mxu0 }
 0xb98   :  { %v848_v14 = vadd.f32 %v833_v6, %v3232_v41  ;;  %v841_v40 = vadd.f32 %v840_v21, %v833_v6 }
 0xb99   :  { %v2635_v13 = vpop.f32.mrf.mxu0 }
 0xb9a   :  { %850 = vrot.lane.b32.xlu1 %v848_v14, %s3021_s0  ;;  %v2394_v42 = vmul.f32 -1.442695, %v841_v40 }
 0xb9b   :  { %v836_v16 = vpop.f32.mrf.mxu0 }
 0xb9c   :  { %2863 = vpow2.f32 %v2394_v42  ;;  %v1012_v42 = vld [vmem:[#allocation2 + $0x30] sm:$0xff] }
 0xb9d   :  { %v2636_v15 = vpop.f32.mrf.mxu0 }
 0xba9   :  { %v2864_v43 = vpop.eup %2863 }
 0xbaa   :  { %v845_v44 = vadd.f32 1.0, %v2864_v43 }
 0xbac   :  { %2865 = vrcp.f32 %v845_v44 }
 0xbb9   :  { %v2866_v45 = vpop.eup %2865 }
 0xbba   :  { %v860_v51 = vsub.f32 1.0, %v2866_v45  ;;  %v866_v54 = vmul.f32 %v2866_v45, %v3413_v36 }
 0xc0c   :  { %v851_v46 = vpop.permute.xlu1 %850 }
 0xc0d   :  { %v853_v47 = vmul.f32 %v2866_v45, %v851_v46 }
 0xc0f   :  { %855 = vrot.lane.b32.xlu0 %v853_v47, %s3021_s0 }
 0xc81   :  { %v856_v48 = vpop.permute.xlu0 %855 }
 0xc82   :  { %v858_v49 = vadd.f32 %v856_v48, %v840_v21 }
 0xc84   :  { %2867 = vtanh.f32 %v858_v49 }
 0xc91   :  { %v2868_v50 = vpop.eup %2867 }
 0xc92   :  { %862 = vrot.lane.b32.xlu1 %v2868_v50, %s3024_s24 }
 0xd04   :  { %v863_v52 = vpop.permute.xlu1 %862 }
 0xd05   :  { %v865_v55 = vmul.f32 %v863_v52, %v860_v51 }
 0xd07   :  { %v3430_v59 = vadd.f32 %v866_v54, %v865_v55 }
 0xd09   :  { %v878_v60 = vpack.c.bf16 %v3430_v59, %v3430_v59 }
 0xd0b   :  { %880 = vrot.lane.b32.xlu0 %v878_v60, %s3024_s24 }
 0xd7d   :  { %v881_v61 = vpop.permute.xlu0 %880 }
 0xd7e   :  { %2642 = vmatmul.mubr.msk.bf16.vlgmr.msra.gmra.mxu1 %vm446_vm2, %v881_v61 }
 0xd7f   :  { %2654 = vmatpush3.bf16.msra.mxu1 %v3192_v18  ;;  %2657 = vmatprep.mubr.msk.bf16.mxu1 %vm3023_vm0, %v3022_v20 }
 0xd80   :  { %2655 = vmatprep.subr.bf16.mxu1 %v3022_v20 }
 0xd83   :  { %2656 = vmatpush3.bf16.msra.mxu1 %v3209_v23 }
 0xd84   :  { %2672 = vmatprep.subr.mxu1 %v3022_v20 }
 0xe3e   :  { %v919_v62 = vpop.f32.mrf.mxu1 }
 0xe3f   :  { %v934_v63 = vadd.f32 %v919_v62, %v3232_v41  ;;  %v927_v10 = vadd.f32 %v926_v8, %v919_v62 }
 0xe40   :  { %v2643_v0 = vpop.f32.mrf.mxu1 }
 0xe41   :  { %936 = vrot.lane.b32.xlu1 %v934_v63, %s3021_s0  ;;  %v2397_v18 = vmul.f32 -1.442695, %v927_v10 }
 0xe42   :  { %v922_v2 = vpop.f32.mrf.mxu1 }
 0xe43   :  { %2869 = vpow2.f32 %v2397_v18 }
 0xe44   :  { %v2644_v4 = vpop.f32.mrf.mxu1 }
 0xe50   :  { %v2870_v11 = vpop.eup %2869 }
 0xe51   :  { %v931_v12 = vadd.f32 1.0, %v2870_v11  ;;  %v3477_v11 = vld [vmem:[%s3875_s27 + $0x38] sm:$0xff] }
 0xe53   :  { %2871 = vrcp.f32 %v931_v12 }
 0xe60   :  { %v2872_v17 = vpop.eup %2871 }
 0xe61   :  { %v946_v28 = vsub.f32 1.0, %v2872_v17  ;;  %v952_v33 = vmul.f32 %v2872_v17, %v3430_v59 }
 0xeb3   :  { %v937_v19 = vpop.permute.xlu1 %936 }
 0xeb4   :  { %v939_v23 = vmul.f32 %v2872_v17, %v937_v19 }
 0xeb6   :  { %941 = vrot.lane.b32.xlu0 %v939_v23, %s3021_s0 }
 0xf28   :  { %v942_v22 = vpop.permute.xlu0 %941 }
 0xf29   :  { %v944_v24 = vadd.f32 %v942_v22, %v926_v8 }
 0xf2b   :  { %2873 = vtanh.f32 %v944_v24  ;;  %v1139_v24 = vld [vmem:[%s3854_s6 + $0x18] sm:$0xff] }
 0xf38   :  { %v2874_v26 = vpop.eup %2873 }
 0xf39   :  { %948 = vrot.lane.b32.xlu1 %v2874_v26, %s3024_s24  ;;  %v1138_v26 = vld [vmem:[%s3854_s6 + $0x10] sm:$0xff] }
 0xfab   :  { %v949_v31 = vpop.permute.xlu1 %948 }
 0xfac   :  { %v951_v5 = vmul.f32 %v949_v31, %v946_v28 }
 0xfae   :  { %v3447_v37 = vadd.f32 %v952_v33, %v951_v5 }
 0xfb0   :  { %v964_v6 = vpack.c.bf16 %v3447_v37, %v3447_v37 }
 0xfb2   :  { %966 = vrot.lane.b32.xlu0 %v964_v6, %s3024_s24 }
0x1024   :  { %v967_v14 = vpop.permute.xlu0 %966 }
0x1025   :  { %2650 = vmatmul.mubr.msk.bf16.vlgmr.msra.gmra.mxu0 %vm446_vm2, %v967_v14 }
0x1026   :  { %2669 = vmatprep.mubr.msk.f32.mxu0 %vm3023_vm0, %v3022_v20  ;;  %2662 = vmatpush3.msra.mxu0 %v1139_v24  ;;  %v1230_v24 = vld [vmem:[%s3856_s8 + $0x8] sm:$0xff] }
0x1027   :  { %2663 = vmatprep.subr.mxu0 %v3022_v20 }
0x1028   :  { %2664 = vmatpush3.msra.mxu0 %v1138_v26  ;;  %v1229_v26 = vld [vmem:[%s3856_s8] sm:$0xff] }
0x1029   :  { %2665 = vmatprep.subr.mxu0 %v3022_v20 }
0x10e5   :  { %v1005_v13 = vpop.f32.mrf.mxu0 }
0x10e6   :  { %v1020_v16 = vadd.f32 %v1005_v13, %v3232_v41  ;;  %v1013_v43 = vadd.f32 %v1012_v42, %v1005_v13 }
0x10e7   :  { %v2651_v15 = vpop.f32.mrf.mxu0 }
0x10e8   :  { %1022 = vrot.lane.b32.xlu1 %v1020_v16, %s3021_s0  ;;  %v2400_v44 = vmul.f32 -1.442695, %v1013_v43 }
0x10e9   :  { %v1008_v21 = vpop.f32.mrf.mxu0 }
0x10ea   :  { %2875 = vpow2.f32 %v2400_v44 }
0x10eb   :  { %v2652_v40 = vpop.f32.mrf.mxu0 }
0x10f7   :  { %v2876_v45 = vpop.eup %2875 }
0x10f8   :  { %v1017_v46 = vadd.f32 1.0, %v2876_v45 }
0x10fa   :  { %2877 = vrcp.f32 %v1017_v46 }
0x1107   :  { %v2878_v47 = vpop.eup %2877 }
0x1108   :  { %v1032_v54 = vsub.f32 1.0, %v2878_v47  ;;  %v1038_v60 = vmul.f32 %v2878_v47, %v3447_v37 }
0x115a   :  { %v1023_v48 = vpop.permute.xlu1 %1022 }
0x115b   :  { %v1025_v49 = vmul.f32 %v2878_v47, %v1023_v48 }
0x115d   :  { %1027 = vrot.lane.b32.xlu0 %v1025_v49, %s3021_s0 }
0x11cf   :  { %v1028_v50 = vpop.permute.xlu0 %1027 }
0x11d0   :  { %v1030_v51 = vadd.f32 %v1028_v50, %v1012_v42 }
0x11d2   :  { %2879 = vtanh.f32 %v1030_v51 }
0x11df   :  { %v2880_v52 = vpop.eup %2879 }
0x11e0   :  { %1034 = vrot.lane.b32.xlu1 %v2880_v52, %s3024_s24 }
0x1252   :  { %v1035_v55 = vpop.permute.xlu1 %1034 }
0x1253   :  { %v1037_v61 = vmul.f32 %v1035_v55, %v1032_v54 }
0x1255   :  { %v3460_v62 = vadd.f32 %v1038_v60, %v1037_v61 }
0x1257   :  { %v1050_v63 = vpack.c.bf16 %v3460_v62, %v3460_v62 }
0x1259   :  { %1052 = vrot.lane.b32.xlu0 %v1050_v63, %s3024_s24 }
0x12cb   :  { %v1053_v0 = vpop.permute.xlu0 %1052 }
0x12cc   :  { %2658 = vmatmul.mubr.msk.bf16.vlgmr.msra.gmra.mxu1 %vm446_vm2, %v1053_v0 }
0x12cd   :  { %2704 = vmatprep.mubr.msk.f32.mxu1 %vm3023_vm0, %v3022_v20 }
0x138c   :  { %v1091_v2 = vpop.f32.mrf.mxu1 }
0x138d   :  { %v1106_v4 = vadd.f32 %v1091_v2, %v3232_v41  ;;  %v1098_v41 = vld [vmem:[#allocation2 + $0x38] sm:$0xff] }
0x138e   :  { %v2659_v8 = vpop.f32.mrf.mxu1  ;;  %v1099_v12 = vadd.f32 %v1098_v41, %v1091_v2 }
0x138f   :  { %1108 = vrot.lane.b32.xlu1 %v1106_v4, %s3021_s0  ;;  %v1244_v8 = vld [vmem:[%s3856_s8 + $0x78] sm:$0xff] }
0x1390   :  { %v1094_v10 = vpop.f32.mrf.mxu1  ;;  %v2403_v17 = vmul.f32 -1.442695, %v1099_v12  ;;  %2673 = vmatpush3.msra.mxu1 %v1244_v8  ;;  %v1239_v12 = vld [vmem:[%s3856_s8 + $0x50] sm:$0xff] }
0x1391   :  { %2674 = vmatprep.subr.mxu1 %v3022_v20  ;;  %v1242_v10 = vld [vmem:[%s3856_s8 + $0x68] sm:$0xff] }
0x1392   :  { %v2660_v18 = vpop.f32.mrf.mxu1  ;;  %2881 = vpow2.f32 %v2403_v17  ;;  %v1238_v17 = vld [vmem:[%s3856_s8 + $0x48] sm:$0xff] }
0x1393   :  { %529 = vperm.xlu1 %2802, %v3242_v56   ;;  %v1241_v18 = vld [vmem:[%s3856_s8 + $0x60] sm:$0xff] }
0x1397   :  { %701 = vperm.xlu1 %2802, %v3279_v3  }
0x139b   :  { %873 = vperm.xlu1 %2802, %v3288_v7  }
0x139f   :  { %1045 = vperm.xlu1 %2802, %v3297_v9   ;;  %v2882_v19 = vpop.eup %2881 }
0x13a0   :  { %v1103_v23 = vadd.f32 1.0, %v2882_v19  ;;  %v1237_v19 = vld [vmem:[%s3856_s8 + $0x40] sm:$0xff] }
0x13a2   :  { %2883 = vrcp.f32 %v1103_v23  ;;  %v1236_v23 = vld [vmem:[%s3856_s8 + $0x38] sm:$0xff] }
0x13a3   :  { %1131 = vperm.xlu1 %2802, %v3477_v11  }
0x13af   :  { %v2884_v56 = vpop.eup %2883 }
0x13b0   :  { %v1118_v54 = vsub.f32 1.0, %v2884_v56 }
0x1401   :  { %v1109_v3 = vpop.permute.xlu1 %1108 }
0x1402   :  { %v1111_v22 = vmul.f32 %v2884_v56, %v1109_v3  ;;  %v1234_v3 = vld [vmem:[%s3856_s8 + $0x28] sm:$0xff] }
0x1404   :  { %1113 = vrot.lane.b32.xlu0 %v1111_v22, %s3021_s0  ;;  %v1233_v22 = vld [vmem:[%s3856_s8 + $0x20] sm:$0xff] }
0x1408   :  { %615 = vperm.xlu0 %2801, %v3270_v1  }
0x140c   :  { %787 = vperm.xlu0 %2801, %v3248_v57   ;;  %v1137_v57 = vld [vmem:[%s3854_s6 + $0x8] sm:$0xff] }
0x140d   :  { %2666 = vmatpush3.msra.mxu0 %v1137_v57  ;;  %v2405_v57 = vld [vmem:[%s3855_s7] ss:$0 sm:$0xff] }
0x140e   :  { %2667 = vmatprep.subr.mxu0 %v3022_v20  ;;  %v530_v1 = vpop.permute.xlu1 %529 }
0x140f   :  { %v532_v31 = vmul.f32 %v530_v1, %v3314_v25 }
0x1410   :  { %959 = vperm.xlu0 %2801, %v3254_v58   ;;  %v1136_v58 = vld [vmem:[%s3854_s6] sm:$0xff] }
0x1411   :  { %2668 = vmatpush3.msra.mxu0 %v1136_v58  ;;  %v612_v5 = vsub.f32 %v3379_v32, %v532_v31 }
0x1412   :  { %2707 = vmatprep.subr.bf16.mxu0 %v3022_v20  ;;  %v702_v16 = vpop.permute.xlu1 %701 }
0x1416   :  { %v874_v46 = vpop.permute.xlu1 %873 }
0x141a   :  { %v1046_v51 = vpop.permute.xlu1 %1045 }
0x141e   :  { %v1132_v0 = vpop.permute.xlu1 %1131 }
0x1476   :  { %v1114_v7 = vpop.permute.xlu0 %1113 }
0x1477   :  { %v1116_v9 = vadd.f32 %v1114_v7, %v1098_v41  ;;  %v1240_v41 = vld [vmem:[%s3856_s8 + $0x58] sm:$0xff] }
0x1478   :  { %v1232_v7 = vld [vmem:[%s3856_s8 + $0x18] sm:$0xff] }
0x1479   :  { %2885 = vtanh.f32 %v1116_v9  ;;  %v1231_v9 = vld [vmem:[%s3856_s8 + $0x10] sm:$0xff] }
0x1483   :  { %v616_v33 = vpop.permute.xlu0 %615 }
0x1484   :  { %v618_v6 = vmul.f32 %v616_v33, %v612_v5 }
0x1486   :  { %v2886_v28 = vpop.eup %2885  ;;  %v619_v14 = vadd.f32 %v618_v6, %v532_v31 }
0x1487   :  { %1120 = vrot.lane.b32.xlu0 %v2886_v28, %s3024_s24  ;;  %v788_v42 = vpop.permute.xlu0 %787  ;;  %v2821_v28 = vld [vmem:[%s3859_s11 + $0x8] sm:$0xff]  }
0x1488   :  { %v698_v13 = vsub.f32 %v3396_v53, %v619_v14 }
0x148a   :  { %v704_v15 = vmul.f32 %v702_v16, %v698_v13  ;;  %v2822_v13 = vld [vmem:[%s3859_s11] sm:$0xff]  }
0x148b   :  { %v960_v32 = vpop.permute.xlu0 %959  ;;  %v2413_v16 = vld [vmem:[%s3861_s13] ss:$0 sm:$0xff] }
0x148c   :  { %v705_v21 = vadd.f32 %v704_v15, %v619_v14  ;;  %1396 = vrot.lane.b32.xlu1 %v2413_v16, %s3021_s0  ;;  %v2408_v15 = vld [vmem:[%s3857_s9] ss:$0 sm:$0xff]  ;;  %s3025_s9 = smov 32  }
0x148e   :  { %v784_v40 = vsub.f32 %v3413_v36, %v705_v21  ;;  %v1124_v36 = vmul.f32 %v2884_v56, %v3460_v62  ;;  %v1235_v56 = vld [vmem:[%s3856_s8 + $0x30] sm:$0xff] }
0x1490   :  { %v790_v43 = vmul.f32 %v788_v42, %v784_v40 }
0x1492   :  { %v791_v44 = vadd.f32 %v790_v43, %v705_v21 }
0x1494   :  { %v870_v45 = vsub.f32 %v3430_v59, %v791_v44 }
0x1496   :  { %v876_v47 = vmul.f32 %v874_v46, %v870_v45 }
0x1498   :  { %v877_v25 = vadd.f32 %v876_v47, %v791_v44 }
0x149a   :  { %v956_v48 = vsub.f32 %v3447_v37, %v877_v25 }
0x149c   :  { %v962_v49 = vmul.f32 %v960_v32, %v956_v48  ;;  %v1383_v32 = vld [vmem:[#allocation3] sm:$0xff] }
0x149e   :  { %v963_v50 = vadd.f32 %v962_v49, %v877_v25 }
0x14a0   :  { %v1042_v53 = vsub.f32 %v3460_v62, %v963_v50  ;;  %v1243_v62 = vld [vmem:[%s3856_s8 + $0x70] sm:$0xff]  ;;  %s2325_s8 = sshll.u32 %s3027_s3, 4  ;;  %s2326_s8 = int_to_ptr.vmem [resolvable:$true] %s2325_s8 }
0x14a1   :  { %2675 = vmatpush3.msra.mxu1 %v1243_v62 }
0x14a2   :  { %v1048_v52 = vmul.f32 %v1046_v51, %v1042_v53  ;;  %2676 = vmatprep.subr.mxu1 %v3022_v20 }
0x14a3   :  { %2677 = vmatpush3.msra.mxu1 %v1242_v10 }
0x14a4   :  { %v1049_v61 = vadd.f32 %v1048_v52, %v963_v50  ;;  %2678 = vmatprep.subr.mxu1 %v3022_v20 }
0x14a5   :  { %2679 = vmatpush3.msra.mxu1 %v1241_v18 }
0x14a6   :  { %2680 = vmatprep.subr.mxu1 %v3022_v20 }
0x14a7   :  { %2681 = vmatpush3.msra.mxu1 %v1240_v41 }
0x14a8   :  { %2682 = vmatprep.subr.mxu1 %v3022_v20 }
0x14a9   :  { %2683 = vmatpush3.msra.mxu1 %v1239_v12 }
0x14aa   :  { %2684 = vmatprep.subr.mxu1 %v3022_v20 }
0x14ab   :  { %2685 = vmatpush3.msra.mxu1 %v1238_v17 }
0x14ac   :  { %2686 = vmatprep.subr.mxu1 %v3022_v20 }
0x14ad   :  { %2687 = vmatpush3.msra.mxu1 %v1237_v19 }
0x14ae   :  { %2688 = vmatprep.subr.mxu1 %v3022_v20 }
0x14af   :  { %2689 = vmatpush3.msra.mxu1 %v1236_v23 }
0x14b0   :  { %2690 = vmatprep.subr.mxu1 %v3022_v20 }
0x14b1   :  { %2691 = vmatpush3.msra.mxu1 %v1235_v56  ;;  %v1491_v56 = vld [vmem:[#allocation3 + $0x8] sm:$0xff] }
0x14b2   :  { %2692 = vmatprep.subr.mxu1 %v3022_v20 }
0x14b3   :  { %2693 = vmatpush3.msra.mxu1 %v1234_v3 }
0x14b4   :  { %2694 = vmatprep.subr.mxu1 %v3022_v20 }
0x14b5   :  { %2695 = vmatpush3.msra.mxu1 %v1233_v22 }
0x14b6   :  { %2696 = vmatprep.subr.mxu1 %v3022_v20 }
0x14b7   :  { %2697 = vmatpush3.msra.mxu1 %v1232_v7 }
0x14b8   :  { %2698 = vmatprep.subr.mxu1 %v3022_v20 }
0x14b9   :  { %2699 = vmatpush3.msra.mxu1 %v1231_v9 }
0x14ba   :  { %2700 = vmatprep.subr.mxu1 %v3022_v20 }
0x14bb   :  { %2701 = vmatpush3.msra.mxu1 %v1230_v24 }
0x14bc   :  { %2702 = vmatprep.subr.mxu1 %v3022_v20 }
0x14bd   :  { %2703 = vmatpush3.msra.mxu1 %v1229_v26 }
0x14be   :  { %2739 = vmatprep.subr.bf16.mxu1 %v3022_v20 }
0x14f9   :  { %v1121_v55 = vpop.permute.xlu0 %1120 }
0x14fa   :  { %v1123_v60 = vmul.f32 %v1121_v55, %v1118_v54 }
0x14fc   :  { %v1125_v63 = vadd.f32 %v1124_v36, %v1123_v60 }
0x14fe   :  { %v1128_v59 = vsub.f32 %v1125_v63, %v1049_v61  ;;  %v3600_v44 = vpop.permute.xlu1 %1396  ;;  %v2824_v63 = vld [vmem:[%s3859_s11] sm:$0xff]  }
0x1500   :  { %v1134_v2 = vmul.f32 %v1132_v0, %v1128_v59 }
0x1502   :  { %v1135_v4 = vadd.f32 %v1134_v2, %v1049_v61  ;;  %v2823_v61 = vld [vmem:[%s3859_s11 + $0x8] sm:$0xff]  }
0x1504   :  { %1148 = vrot.lane.b32.xlu0 %v1135_v4, %s3024_s24 }
0x1576   :  { %v1149_v37 = vpop.permute.xlu0 %1148 }
0x1577   :  { %2670 = vmatmul.mubr.msk.f32.vlgmr.msra.gmra.mxu0 %vm446_vm2, %v1149_v37 }
0x1578   :  { %2711 = vmatprep.mubr.msk.bf16.mxu0 %vm3023_vm0, %v3022_v20  ;;  %2708 = vmatpush3.bf16.msra.mxu0 %v2821_v28 }
0x1579   :  { %2709 = vmatprep.subr.bf16.mxu0 %v3022_v20 }
0x157c   :  { %2710 = vmatpush3.bf16.msra.mxu0 %v2822_v13 }
0x157d   :  { %2715 = vmatprep.subr.bf16.mxu0 %v3022_v20 }
0x1637   :  { %v1218_v58 = vpop.f32.mrf.mxu0 }
0x1638   :  { %v1219_v1 = vadd.f32 %v2405_v57, %v1218_v58 }
0x1639   :  { %v2671_v31 = vpop.f32.mrf.mxu0 }
0x163a   :  { %v2407_v33 = vmul.f32 -1.442695, %v1219_v1  ;;  %v2825_v1 = vld [vmem:[%s3859_s11 + $0x8] sm:$0xff]   ;;  %v2826_v31 = vld [vmem:[%s3859_s11] sm:$0xff]  }
0x163c   :  { %2887 = vpow2.f32 %v2407_v33 }
0x1649   :  { %v2888_v5 = vpop.eup %2887 }
0x164a   :  { %v1225_v6 = vadd.f32 1.0, %v2888_v5 }
0x164c   :  { %2889 = vrcp.f32 %v1225_v6 }
0x1659   :  { %v2890_v14 = vpop.eup %2889 }
0x165a   :  { %1228 = vst [vmem:[#allocation5] sm:$0xff] %v2890_v14  ;;  %2705 = vmatmul.mubr.f32.vlgmr.msra.gmra.mxu1 %v2890_v14 }
0x165b   :  { %2743 = vmatprep.mubr.msk.bf16.mxu1 %vm3023_vm0, %v3022_v20 }
0x171a   :  { %v1318_v21 = vpop.f32.mrf.mxu1 }
0x171b   :  { %v1319_v40 = vadd.f32 %v2408_v15, %v1318_v21 }
0x171c   :  { %v2706_v42 = vpop.f32.mrf.mxu1 }
0x171d   :  { %v1323_v43 = vpack.c.bf16 %v1319_v40, %v1319_v40 }
0x171f   :  { %2712 = vmatmul.mubr.msk.bf16.vlgmr.msra.gmra.mxu0 %vm446_vm2, %v1323_v43 }
0x1720   :  { %2719 = vmatprep.mubr.msk.bf16.mxu0 %vm3023_vm0, %v3022_v20  ;;  %2716 = vmatpush3.bf16.msra.mxu0 %v2823_v61 }
0x1721   :  { %2717 = vmatprep.subr.bf16.mxu0 %v3022_v20 }
0x1724   :  { %2718 = vmatpush3.bf16.msra.mxu0 %v2824_v63 }
0x1725   :  { %2723 = vmatprep.subr.bf16.mxu0 %v3022_v20 }
0x17df   :  { %v1377_v45 = vpop.f32.mrf.mxu0 }
0x17e0   :  { %v1399_v46 = vadd.f32 %v3600_v44, %v1377_v45  ;;  %v1384_v49 = vadd.f32 %v1383_v32, %v1377_v45 }
0x17e1   :  { %v2713_v47 = vpop.f32.mrf.mxu0 }
0x17e2   :  { %1401 = vrot.lane.b32.xlu0 %v1399_v46, %s3021_s0  ;;  %v2412_v50 = vmul.f32 -1.442695, %v1384_v49  ;;  %v1589_v47 = vld [vmem:[#allocation3 + $0x10] sm:$0xff] }
0x17e3   :  { %v1380_v25 = vpop.f32.mrf.mxu0 }
0x17e4   :  { %2891 = vpow2.f32 %v2412_v50 }
0x17e5   :  { %v2714_v48 = vpop.f32.mrf.mxu0 }
0x17f1   :  { %v2892_v53 = vpop.eup %2891 }
0x17f2   :  { %v1388_v51 = vadd.f32 1.0, %v2892_v53 }
0x17f4   :  { %2893 = vrcp.f32 %v1388_v51 }
0x1801   :  { %v2894_v52 = vpop.eup %2893 }
0x1802   :  { %v1411_v2 = vsub.f32 1.0, %v2894_v52 }
0x1854   :  { %v1402_v54 = vpop.permute.xlu0 %1401 }
0x1855   :  { %v1404_v55 = vmul.f32 %v2894_v52, %v1402_v54 }
0x1857   :  { %1406 = vrot.lane.b32.xlu1 %v1404_v55, %s3021_s0  ;;  %v2827_v55 = vld [vmem:[%s3859_s11 + $0x8] sm:$0xff]  }
0x185b   :  { %1418 = vrot.lane.b32.xlu1 %v1319_v40, %s3025_s9 }
0x18c9   :  { %v1407_v36 = vpop.permute.xlu1 %1406 }
0x18ca   :  { %v1409_v60 = vadd.f32 %v1407_v36, %v1383_v32  ;;  %v2828_v36 = vld [vmem:[%s3859_s11] sm:$0xff]  }
0x18cc   :  { %2895 = vtanh.f32 %v1409_v60 }
0x18cd   :  { %v1419_v0 = vpop.permute.xlu1 %1418 }
0x18ce   :  { %v1421_v37 = vmul.f32 %v2894_v52, %v1419_v0 }
0x18d9   :  { %v2896_v59 = vpop.eup %2895 }
0x18da   :  { %1413 = vrot.lane.b32.xlu0 %v2896_v59, %s3024_s24 }
0x194c   :  { %v1414_v4 = vpop.permute.xlu0 %1413 }
0x194d   :  { %v1416_v8 = vmul.f32 %v1414_v4, %v1411_v2 }
0x194f   :  { %v3614_v62 = vadd.f32 %v1421_v37, %v1416_v8 }
0x1951   :  { %v1428_v10 = vpack.c.bf16 %v3614_v62, %v3614_v62 }
0x1953   :  { %1434 = vrot.lane.b32.xlu0 %v1428_v10, %s3024_s24 }
0x19c5   :  { %v1435_v18 = vpop.permute.xlu0 %1434 }
0x19c6   :  { %2720 = vmatmul.mubr.msk.bf16.vlgmr.msra.gmra.mxu0 %vm446_vm2, %v1435_v18 }
0x19c7   :  { %2727 = vmatprep.mubr.msk.bf16.mxu0 %vm3023_vm0, %v3022_v20  ;;  %2724 = vmatpush3.bf16.msra.mxu0 %v2825_v1 }
0x19c8   :  { %2725 = vmatprep.subr.bf16.mxu0 %v3022_v20 }
0x19cb   :  { %2726 = vmatpush3.bf16.msra.mxu0 %v2826_v31 }
0x19cc   :  { %2731 = vmatprep.subr.bf16.mxu0 %v3022_v20 }
0x1a86   :  { %v1485_v41 = vpop.f32.mrf.mxu0 }
0x1a87   :  { %v1499_v12 = vadd.f32 %v1485_v41, %v3600_v44  ;;  %v1492_v3 = vadd.f32 %v1491_v56, %v1485_v41 }
0x1a88   :  { %v2721_v17 = vpop.f32.mrf.mxu0 }
0x1a89   :  { %1501 = vrot.lane.b32.xlu1 %v1499_v12, %s3021_s0  ;;  %v2417_v22 = vmul.f32 -1.442695, %v1492_v3  ;;  %v1687_v17 = vld [vmem:[#allocation3 + $0x18] sm:$0xff] }
0x1a8a   :  { %v1488_v19 = vpop.f32.mrf.mxu0 }
0x1a8b   :  { %2897 = vpow2.f32 %v2417_v22 }
0x1a8c   :  { %v2722_v23 = vpop.f32.mrf.mxu0 }
0x1a98   :  { %v2898_v7 = vpop.eup %2897 }
0x1a99   :  { %v1496_v9 = vadd.f32 1.0, %v2898_v7 }
0x1a9b   :  { %2899 = vrcp.f32 %v1496_v9 }
0x1aa8   :  { %v2900_v24 = vpop.eup %2899 }
0x1aa9   :  { %v1511_v5 = vsub.f32 1.0, %v2900_v24  ;;  %v1517_v14 = vmul.f32 %v2900_v24, %v3614_v62 }
0x1afb   :  { %v1502_v26 = vpop.permute.xlu1 %1501 }
0x1afc   :  { %v1504_v28 = vmul.f32 %v2900_v24, %v1502_v26 }
0x1afe   :  { %1506 = vrot.lane.b32.xlu0 %v1504_v28, %s3021_s0  ;;  %v2829_v28 = vld [vmem:[%s3859_s11 + $0x8] sm:$0xff]  }
0x1aff   :  { %2740 = vmatpush3.bf16.msra.mxu1 %v2829_v28  ;;  %v2834_v28 = vld [vmem:[%s3859_s11] sm:$0xff]  }
0x1b00   :  { %2741 = vmatprep.subr.bf16.mxu1 %v3022_v20 }
0x1b70   :  { %v1507_v57 = vpop.permute.xlu0 %1506 }
0x1b71   :  { %v1509_v58 = vadd.f32 %v1507_v57, %v1491_v56  ;;  %v2830_v57 = vld [vmem:[%s3859_s11] sm:$0xff]  }
0x1b72   :  { %2742 = vmatpush3.bf16.msra.mxu1 %v2830_v57 }
0x1b73   :  { %2901 = vtanh.f32 %v1509_v58  ;;  %2755 = vmatprep.subr.bf16.mxu1 %v3022_v20 }
0x1b80   :  { %v2902_v33 = vpop.eup %2901 }
0x1b81   :  { %1513 = vrot.lane.b32.xlu1 %v2902_v33, %s3024_s24 }
0x1bf3   :  { %v1514_v6 = vpop.permute.xlu1 %1513 }
0x1bf4   :  { %v1516_v13 = vmul.f32 %v1514_v6, %v1511_v5 }
0x1bf6   :  { %v3635_v16 = vadd.f32 %v1517_v14, %v1516_v13 }
0x1bf8   :  { %v1525_v15 = vpack.c.bf16 %v3635_v16, %v3635_v16 }
0x1bfa   :  { %1531 = vrot.lane.b32.xlu0 %v1525_v15, %s3024_s24 }
0x1c6c   :  { %v1532_v21 = vpop.permute.xlu0 %1531 }
0x1c6d   :  { %2728 = vmatmul.mubr.msk.bf16.vlgmr.msra.gmra.mxu0 %vm446_vm2, %v1532_v21 }
0x1c6e   :  { %2735 = vmatprep.mubr.msk.bf16.mxu0 %vm3023_vm0, %v3022_v20  ;;  %2732 = vmatpush3.bf16.msra.mxu0 %v2827_v55 }
0x1c6f   :  { %2733 = vmatprep.subr.bf16.mxu0 %v3022_v20 }
0x1c72   :  { %2734 = vmatpush3.bf16.msra.mxu0 %v2828_v36 }
0x1c73   :  { %2747 = vmatprep.subr.bf16.mxu0 %v3022_v20 }
0x1d2d   :  { %v1582_v40 = vpop.f32.mrf.mxu0 }
0x1d2e   :  { %v1597_v42 = vadd.f32 %v1582_v40, %v3600_v44  ;;  %v1590_v25 = vadd.f32 %v1589_v47, %v1582_v40 }
0x1d2f   :  { %v2729_v43 = vpop.f32.mrf.mxu0 }
0x1d30   :  { %1599 = vrot.lane.b32.xlu1 %v1597_v42, %s3021_s0  ;;  %v2421_v48 = vmul.f32 -1.442695, %v1590_v25 }
0x1d31   :  { %v1585_v45 = vpop.f32.mrf.mxu0 }
0x1d32   :  { %2903 = vpow2.f32 %v2421_v48  ;;  %v1785_v45 = vld [vmem:[#allocation3 + $0x20] sm:$0xff] }
0x1d33   :  { %v2730_v46 = vpop.f32.mrf.mxu0 }
0x1d3f   :  { %v2904_v32 = vpop.eup %2903 }
0x1d40   :  { %v1594_v49 = vadd.f32 1.0, %v2904_v32 }
0x1d42   :  { %2905 = vrcp.f32 %v1594_v49 }
0x1d4f   :  { %v2906_v50 = vpop.eup %2905 }
0x1d50   :  { %v1609_v61 = vsub.f32 1.0, %v2906_v50  ;;  %v1615_v59 = vmul.f32 %v2906_v50, %v3635_v16 }
0x1da2   :  { %v1600_v53 = vpop.permute.xlu1 %1599 }
0x1da3   :  { %v1602_v51 = vmul.f32 %v2906_v50, %v1600_v53 }
0x1da5   :  { %1604 = vrot.lane.b32.xlu0 %v1602_v51, %s3021_s0 }
0x1e17   :  { %v1605_v52 = vpop.permute.xlu0 %1604 }
0x1e18   :  { %v1607_v54 = vadd.f32 %v1605_v52, %v1589_v47  ;;  %v2831_v52 = vld [vmem:[%s3859_s11 + $0x8] sm:$0xff]  }
0x1e1a   :  { %2907 = vtanh.f32 %v1607_v54  ;;  %v2832_v54 = vld [vmem:[%s3859_s11] sm:$0xff]  }
0x1e27   :  { %v2908_v60 = vpop.eup %2907 }
0x1e28   :  { %1611 = vrot.lane.b32.xlu1 %v2908_v60, %s3024_s24 }
0x1e9a   :  { %v1612_v63 = vpop.permute.xlu1 %1611 }
0x1e9b   :  { %v1614_v0 = vmul.f32 %v1612_v63, %v1609_v61 }
0x1e9d   :  { %v3656_v2 = vadd.f32 %v1615_v59, %v1614_v0 }
0x1e9f   :  { %v1623_v4 = vpack.c.bf16 %v3656_v2, %v3656_v2 }
0x1ea1   :  { %1629 = vrot.lane.b32.xlu0 %v1623_v4, %s3024_s24 }
0x1f13   :  { %v1630_v37 = vpop.permute.xlu0 %1629 }
0x1f14   :  { %2736 = vmatmul.mubr.msk.bf16.vlgmr.msra.gmra.mxu0 %vm446_vm2, %v1630_v37 }
0x1f15   :  { %2751 = vmatprep.mubr.msk.bf16.mxu0 %vm3023_vm0, %v3022_v20  ;;  %2748 = vmatpush3.bf16.msra.mxu0 %v2831_v52  ;;  %v2835_v52 = vld [vmem:[%s3859_s11 + $0x8] sm:$0xff]  }
0x1f16   :  { %2749 = vmatprep.subr.bf16.mxu0 %v3022_v20 }
0x1f19   :  { %2750 = vmatpush3.bf16.msra.mxu0 %v2832_v54  ;;  %v2836_v54 = vld [vmem:[%s3859_s11] sm:$0xff]  }
0x1f1a   :  { %2763 = vmatprep.subr.bf16.mxu0 %v3022_v20 }
0x1fd4   :  { %v1680_v8 = vpop.f32.mrf.mxu0 }
0x1fd5   :  { %v1695_v10 = vadd.f32 %v1680_v8, %v3600_v44  ;;  %v1688_v19 = vadd.f32 %v1687_v17, %v1680_v8 }
0x1fd6   :  { %v2737_v18 = vpop.f32.mrf.mxu0 }
0x1fd7   :  { %1697 = vrot.lane.b32.xlu1 %v1695_v10, %s3021_s0  ;;  %v2425_v23 = vmul.f32 -1.442695, %v1688_v19 }
0x1fd8   :  { %v1683_v41 = vpop.f32.mrf.mxu0 }
0x1fd9   :  { %2909 = vpow2.f32 %v2425_v23 }
0x1fda   :  { %v2738_v12 = vpop.f32.mrf.mxu0 }
0x1fdb   :  { %v1883_v12 = vld [vmem:[#allocation3 + $0x28] sm:$0xff] }
0x1fe6   :  { %v2910_v56 = vpop.eup %2909 }
0x1fe7   :  { %v1692_v3 = vadd.f32 1.0, %v2910_v56 }
0x1fe9   :  { %2911 = vrcp.f32 %v1692_v3 }
0x1ff6   :  { %v2912_v22 = vpop.eup %2911 }
0x1ff7   :  { %v1707_v1 = vsub.f32 1.0, %v2912_v22  ;;  %v1713_v33 = vmul.f32 %v2912_v22, %v3656_v2 }
0x2049   :  { %v1698_v7 = vpop.permute.xlu1 %1697 }
0x204a   :  { %v1700_v9 = vmul.f32 %v2912_v22, %v1698_v7 }
0x204c   :  { %1702 = vrot.lane.b32.xlu0 %v1700_v9, %s3021_s0 }
0x20be   :  { %v1703_v24 = vpop.permute.xlu0 %1702 }
0x20bf   :  { %v1705_v26 = vadd.f32 %v1703_v24, %v1687_v17 }
0x20c1   :  { %2913 = vtanh.f32 %v1705_v26  ;;  %v2833_v26 = vld [vmem:[%s3859_s11 + $0x8] sm:$0xff]  }
0x20ce   :  { %v2914_v58 = vpop.eup %2913 }
0x20cf   :  { %1709 = vrot.lane.b32.xlu1 %v2914_v58, %s3024_s24 }
0x2141   :  { %v1710_v31 = vpop.permute.xlu1 %1709 }
0x2142   :  { %v1712_v5 = vmul.f32 %v1710_v31, %v1707_v1 }
0x2144   :  { %v3677_v6 = vadd.f32 %v1713_v33, %v1712_v5 }
0x2146   :  { %v1721_v14 = vpack.c.bf16 %v3677_v6, %v3677_v6 }
0x2148   :  { %1727 = vrot.lane.b32.xlu0 %v1721_v14, %s3024_s24 }
0x21ba   :  { %v1728_v13 = vpop.permute.xlu0 %1727 }
0x21bb   :  { %2744 = vmatmul.mubr.msk.bf16.vlgmr.msra.gmra.mxu1 %vm446_vm2, %v1728_v13 }
0x21bc   :  { %2759 = vmatprep.mubr.msk.bf16.mxu1 %vm3023_vm0, %v3022_v20  ;;  %2756 = vmatpush3.bf16.msra.mxu1 %v2833_v26 }
0x21bd   :  { %2757 = vmatprep.subr.bf16.mxu1 %v3022_v20 }
0x21c0   :  { %2758 = vmatpush3.bf16.msra.mxu1 %v2834_v28 }
0x227b   :  { %v1778_v15 = vpop.f32.mrf.mxu1 }
0x227c   :  { %v1793_v21 = vadd.f32 %v1778_v15, %v3600_v44  ;;  %v1786_v46 = vadd.f32 %v1785_v45, %v1778_v15 }
0x227d   :  { %v2745_v40 = vpop.f32.mrf.mxu1 }
0x227e   :  { %1795 = vrot.lane.b32.xlu1 %v1793_v21, %s3021_s0  ;;  %v2429_v47 = vmul.f32 -1.442695, %v1786_v46 }
0x227f   :  { %v1781_v42 = vpop.f32.mrf.mxu1 }
0x2280   :  { %2915 = vpow2.f32 %v2429_v47 }
0x2281   :  { %v2746_v43 = vpop.f32.mrf.mxu1 }
0x228d   :  { %v2916_v25 = vpop.eup %2915 }
0x228e   :  { %v1790_v48 = vadd.f32 1.0, %v2916_v25 }
0x2290   :  { %2917 = vrcp.f32 %v1790_v48 }
0x229d   :  { %v2918_v32 = vpop.eup %2917 }
0x229e   :  { %v1805_v36 = vsub.f32 1.0, %v2918_v32  ;;  %v1811_v61 = vmul.f32 %v2918_v32, %v3677_v6 }
0x22f0   :  { %v1796_v49 = vpop.permute.xlu1 %1795 }
0x22f1   :  { %v1798_v50 = vmul.f32 %v2918_v32, %v1796_v49 }
0x22f3   :  { %1800 = vrot.lane.b32.xlu0 %v1798_v50, %s3021_s0 }
0x2365   :  { %v1801_v53 = vpop.permute.xlu0 %1800 }
0x2366   :  { %v1803_v51 = vadd.f32 %v1801_v53, %v1785_v45  ;;  %v1981_v45 = vld [vmem:[#allocation3 + $0x30] sm:$0xff] }
0x2368   :  { %2919 = vtanh.f32 %v1803_v51 }
0x2375   :  { %v2920_v55 = vpop.eup %2919 }
0x2376   :  { %1807 = vrot.lane.b32.xlu1 %v2920_v55, %s3024_s24 }
0x23e8   :  { %v1808_v60 = vpop.permute.xlu1 %1807 }
0x23e9   :  { %v1810_v63 = vmul.f32 %v1808_v60, %v1805_v36 }
0x23eb   :  { %v3698_v59 = vadd.f32 %v1811_v61, %v1810_v63 }
0x23ed   :  { %v1819_v0 = vpack.c.bf16 %v3698_v59, %v3698_v59 }
0x23ef   :  { %1825 = vrot.lane.b32.xlu0 %v1819_v0, %s3024_s24 }
0x2461   :  { %v1826_v4 = vpop.permute.xlu0 %1825 }
0x2462   :  { %2752 = vmatmul.mubr.msk.bf16.vlgmr.msra.gmra.mxu0 %vm446_vm2, %v1826_v4 }
0x2463   :  { %2767 = vmatprep.mubr.msk.bf16.mxu0 %vm3023_vm0, %v3022_v20  ;;  %2764 = vmatpush3.bf16.msra.mxu0 %v2835_v52 }
0x2464   :  { %2765 = vmatprep.subr.bf16.mxu0 %v3022_v20 }
0x2467   :  { %2766 = vmatpush3.bf16.msra.mxu0 %v2836_v54 }
0x2522   :  { %v1876_v37 = vpop.f32.mrf.mxu0 }
0x2523   :  { %v1891_v8 = vadd.f32 %v1876_v37, %v3600_v44  ;;  %v1884_v17 = vadd.f32 %v1883_v12, %v1876_v37 }
0x2524   :  { %v2753_v10 = vpop.f32.mrf.mxu0 }
0x2525   :  { %1893 = vrot.lane.b32.xlu1 %v1891_v8, %s3021_s0  ;;  %v2433_v19 = vmul.f32 -1.442695, %v1884_v17 }
0x2526   :  { %v1879_v18 = vpop.f32.mrf.mxu0 }
0x2527   :  { %2921 = vpow2.f32 %v2433_v19 }
0x2528   :  { %v2754_v41 = vpop.f32.mrf.mxu0 }
0x2534   :  { %v2922_v23 = vpop.eup %2921 }
0x2535   :  { %v1888_v56 = vadd.f32 1.0, %v2922_v23 }
0x2537   :  { %2923 = vrcp.f32 %v1888_v56 }
0x2544   :  { %v2924_v3 = vpop.eup %2923 }
0x2545   :  { %v1903_v58 = vsub.f32 1.0, %v2924_v3  ;;  %v1909_v31 = vmul.f32 %v2924_v3, %v3698_v59 }
0x2597   :  { %v1894_v22 = vpop.permute.xlu1 %1893 }
0x2598   :  { %v1896_v7 = vmul.f32 %v2924_v3, %v1894_v22 }
0x259a   :  { %1898 = vrot.lane.b32.xlu0 %v1896_v7, %s3021_s0 }
0x260c   :  { %v1899_v9 = vpop.permute.xlu0 %1898 }
0x260d   :  { %v1901_v24 = vadd.f32 %v1899_v9, %v1883_v12  ;;  %v2079_v12 = vld [vmem:[#allocation3 + $0x38] sm:$0xff] }
0x260f   :  { %2925 = vtanh.f32 %v1901_v24 }
0x261c   :  { %v2926_v57 = vpop.eup %2925 }
0x261d   :  { %1905 = vrot.lane.b32.xlu1 %v2926_v57, %s3024_s24  ;;  %v2838_v57 = vld [vmem:[%s3862_s14] sm:$0xff]  }
0x268f   :  { %v1906_v1 = vpop.permute.xlu1 %1905 }
0x2690   :  { %v1908_v33 = vmul.f32 %v1906_v1, %v1903_v58 }
0x2692   :  { %v3718_v5 = vadd.f32 %v1909_v31, %v1908_v33 }
0x2694   :  { %v1917_v14 = vpack.c.bf16 %v3718_v5, %v3718_v5 }
0x2696   :  { %1923 = vrot.lane.b32.xlu0 %v1917_v14, %s3024_s24 }
0x2708   :  { %v1924_v13 = vpop.permute.xlu0 %1923 }
0x2709   :  { %2760 = vmatmul.mubr.msk.bf16.vlgmr.msra.gmra.mxu1 %vm446_vm2, %v1924_v13 }
0x27c9   :  { %v1974_v15 = vpop.f32.mrf.mxu1 }
0x27ca   :  { %v1989_v21 = vadd.f32 %v1974_v15, %v3600_v44  ;;  %v1982_v46 = vadd.f32 %v1981_v45, %v1974_v15 }
0x27cb   :  { %v2761_v40 = vpop.f32.mrf.mxu1 }
0x27cc   :  { %1991 = vrot.lane.b32.xlu1 %v1989_v21, %s3021_s0  ;;  %v2437_v47 = vmul.f32 -1.442695, %v1982_v46 }
0x27cd   :  { %v1977_v42 = vpop.f32.mrf.mxu1 }
0x27ce   :  { %2927 = vpow2.f32 %v2437_v47 }
0x27cf   :  { %v2762_v43 = vpop.f32.mrf.mxu1 }
0x27db   :  { %v2928_v25 = vpop.eup %2927 }
0x27dc   :  { %v1986_v48 = vadd.f32 1.0, %v2928_v25 }
0x27de   :  { %2929 = vrcp.f32 %v1986_v48 }
0x27eb   :  { %v2930_v32 = vpop.eup %2929 }
0x27ec   :  { %v2001_v36 = vsub.f32 1.0, %v2930_v32  ;;  %v2007_v61 = vmul.f32 %v2930_v32, %v3718_v5 }
0x283e   :  { %v1992_v49 = vpop.permute.xlu1 %1991 }
0x283f   :  { %v1994_v50 = vmul.f32 %v2930_v32, %v1992_v49 }
0x2841   :  { %1996 = vrot.lane.b32.xlu0 %v1994_v50, %s3021_s0  ;;  %v2941_v50 = vld [vmem:[%s3875_s27 + $0x8] sm:$0xff] }
0x28b3   :  { %v1997_v53 = vpop.permute.xlu0 %1996 }
0x28b4   :  { %v1999_v51 = vadd.f32 %v1997_v53, %v1981_v45  ;;  %v2288_v53 = vsel %vm2286_vm3, %v2941_v50, 0.0 }
0x28b6   :  { %2931 = vtanh.f32 %v1999_v51  ;;  %v2942_v51 = vld [vmem:[%s3875_s27] sm:$0xff] }
0x28b7   :  { %v2287_v52 = vsel %vm2286_vm3, %v2942_v51, 0.0 }
0x28b8   :  { %v2289_v54 = vadd.f32 %v2288_v53, %v2287_v52  ;;  %v2954_v52 = vld [vmem:[%s3874_s23 + $0x38] sm:$0xff] }
0x28c3   :  { %v2932_v55 = vpop.eup %2931 }
0x28c4   :  { %2003 = vrot.lane.b32.xlu1 %v2932_v55, %s3024_s24  ;;  %v2943_v55 = vld [vmem:[%s3875_s27 + $0x10] sm:$0xff] }
0x2936   :  { %v2004_v60 = vpop.permute.xlu1 %2003 }
0x2937   :  { %v2006_v63 = vmul.f32 %v2004_v60, %v2001_v36  ;;  %v2290_v36 = vsel %vm2286_vm3, %v2943_v55, 0.0  ;;  %v2955_v55 = vld [vmem:[%s3874_s23 + $0x28] sm:$0xff] }
0x2938   :  { %v2291_v60 = vadd.f32 %v2290_v36, %v2289_v54 }
0x2939   :  { %v2008_v0 = vadd.f32 %v2007_v61, %v2006_v63  ;;  %v2944_v61 = vld [vmem:[%s3875_s27 + $0x18] sm:$0xff] }
0x293a   :  { %v2292_v63 = vsel %vm2286_vm3, %v2944_v61, 0.0 }
0x293b   :  { %v2015_v4 = vpack.c.bf16 %v2008_v0, %v2008_v0 }
0x293d   :  { %2021 = vrot.lane.b32.xlu0 %v2015_v4, %s3024_s24  ;;  %v2945_v4 = vld [vmem:[%s3875_s27 + $0x20] sm:$0xff] }
0x29af   :  { %v2022_v37 = vpop.permute.xlu0 %2021 }
0x29b0   :  { %2768 = vmatmul.mubr.msk.bf16.vlgmr.msra.gmra.mxu0 %vm446_vm2, %v2022_v37  ;;  %v2294_v37 = vsel %vm2286_vm3, %v2945_v4, 0.0 }
0x2a70   :  { %v2072_v8 = vpop.f32.mrf.mxu0 }
0x2a71   :  { %v2087_v10 = vadd.f32 %v2072_v8, %v3600_v44  ;;  %v2080_v17 = vadd.f32 %v2079_v12, %v2072_v8 }
0x2a72   :  { %v2769_v20 = vpop.f32.mrf.mxu0 }
0x2a73   :  { %2089 = vrot.lane.b32.xlu1 %v2087_v10, %s3021_s0  ;;  %v2441_v19 = vmul.f32 -1.442695, %v2080_v17  ;;  %v2946_v10 = vld [vmem:[%s3875_s27 + $0x28] sm:$0xff] }
0x2a74   :  { %v2075_v18 = vpop.f32.mrf.mxu0  ;;  %v2296_v20 = vsel %vm2286_vm3, %v2946_v10, 0.0 }
0x2a75   :  { %2933 = vpow2.f32 %v2441_v19  ;;  %v2300_v19 = vsel %vm2286_vm3, %v3477_v11, 0.0 }
0x2a76   :  { %v2770_v41 = vpop.f32.mrf.mxu0 }
0x2a77   :  { %v2947_v41 = vld [vmem:[%s3875_s27 + $0x30] sm:$0xff] }
0x2a82   :  { %v2934_v23 = vpop.eup %2933 }
0x2a83   :  { %v2084_v56 = vadd.f32 1.0, %v2934_v23 }
0x2a85   :  { %2935 = vrcp.f32 %v2084_v56  ;;  %v2448_v56 = vld [vmem:[%s3863_s15] ss:$0 sm:$0xff] }
0x2a92   :  { %v2936_v3 = vpop.eup %2935 }
0x2a93   :  { %v2099_v58 = vsub.f32 1.0, %v2936_v3  ;;  %v2105_v31 = vmul.f32 %v2936_v3, %v2008_v0 }
0x2ae5   :  { %v2090_v22 = vpop.permute.xlu1 %2089 }
0x2ae6   :  { %v2092_v7 = vmul.f32 %v2936_v3, %v2090_v22 }
0x2ae8   :  { %2094 = vrot.lane.b32.xlu0 %v2092_v7, %s3021_s0 }
0x2aec   :  { %1424 = vrot.lane.b32.xlu0 %v3614_v62, %s3024_s24 }
0x2af0   :  { %1618 = vrot.lane.b32.xlu0 %v3656_v2, %s3024_s24  ;;  %v2837_v2 = vld [vmem:[%s3862_s14 + $0x8] sm:$0xff]  }
0x2af1   :  { %2771 = vmatprep.subr.bf16.mxu1 %v2837_v2 }
0x2af2   :  { %2772 = vmatpush3.bf16.msra.mxu1 %v2837_v2  ;;  %v2949_v2 = vld [vmem:[%s3874_s23 + $0x10] sm:$0xff] }
0x2af3   :  { %2773 = vmatprep.subr.bf16.mxu1 %v2838_v57 }
0x2af4   :  { %1814 = vrot.lane.b32.xlu0 %v3698_v59, %s3024_s24 }
0x2af6   :  { %2774 = vmatpush3.bf16.msra.mxu1 %v2838_v57 }
0x2af8   :  { %2010 = vrot.lane.b32.xlu0 %v2008_v0, %s3024_s24  ;;  %v2293_v0 = vadd.f32 %v2292_v63, %v2291_v60 }
0x2afa   :  { %v2295_v8 = vadd.f32 %v2294_v37, %v2293_v0 }
0x2afc   :  { %2259 = vperm.xlu0 %2801, %v3477_v11   ;;  %v2297_v18 = vadd.f32 %v2296_v20, %v2295_v8 }
0x2b5a   :  { %v2095_v44 = vpop.permute.xlu0 %2094 }
0x2b5b   :  { %v2097_v9 = vadd.f32 %v2095_v44, %v2079_v12  ;;  %v2298_v12 = vsel %vm2286_vm3, %v2947_v41, 0.0 }
0x2b5c   :  { %v2299_v17 = vadd.f32 %v2298_v12, %v2297_v18 }
0x2b5d   :  { %2937 = vtanh.f32 %v2097_v9 }
0x2b5e   :  { %v1425_v24 = vpop.permute.xlu0 %1424  ;;  %v2301_v23 = vadd.f32 %v2300_v19, %v2299_v17 }
0x2b5f   :  { %1427 = vst.msk [vmem:[#allocation4] sm:$0xff] %vm446_vm2, %v1425_v24  ;;  %v2948_v24 = vld [vmem:[%s3874_s23] sm:$0xff] }
0x2b60   :  { %2302 = vadd.xlane.f32.xlu0 %v2301_v23 }
0x2b62   :  { %v1619_v26 = vpop.permute.xlu0 %1618 }
0x2b63   :  { %1622 = vst.msk [vmem:[#allocation4 + $0x10] sm:$0xff] %vm446_vm2, %v1619_v26 }
0x2b66   :  { %v1815_v62 = vpop.permute.xlu0 %1814  ;;  %v2113_v21 = vld [vmem:[#allocation4] sm:$0xff] }
0x2b67   :  { %1818 = vst.msk [vmem:[#allocation4 + $0x20] sm:$0xff] %vm446_vm2, %v1815_v62 }
0x2b6a   :  { %v2938_v59 = vpop.eup %2937  ;;  %v2011_v28 = vpop.permute.xlu0 %2010 }
0x2b6b   :  { %2014 = vst.msk [vmem:[#allocation4 + $0x30] sm:$0xff] %vm446_vm2, %v2011_v28  ;;  %2101 = vrot.lane.b32.xlu1 %v2938_v59, %s3024_s24 }
0x2b6e   :  { %v2117_v45 = vld [vmem:[#allocation4 + $0x20] sm:$0xff] }
0x2b6f   :  { %1520 = vrot.lane.b32.xlu1 %v3635_v16, %s3024_s24 }
0x2b72   :  { %v2119_v48 = vld [vmem:[#allocation4 + $0x30] sm:$0xff] }
0x2b73   :  { %1716 = vrot.lane.b32.xlu1 %v3677_v6, %s3024_s24 }
0x2b77   :  { %1912 = vrot.lane.b32.xlu1 %v3718_v5, %s3024_s24  ;;  %v2115_v5 = vld [vmem:[#allocation4 + $0x10] sm:$0xff]  ;;  %v2260_v8 = vpop.permute.xlu0 %2259 }
0x2bdd   :  { %v2102_v1 = vpop.permute.xlu1 %2101 }
0x2bde   :  { %v2104_v33 = vmul.f32 %v2102_v1, %v2099_v58  ;;  %v2950_v58 = vld [vmem:[%s3874_s23 + $0x18] sm:$0xff] }
0x2be0   :  { %v2106_v14 = vadd.f32 %v2105_v31, %v2104_v33  ;;  %v2951_v31 = vld [vmem:[%s3874_s23 + $0x8] sm:$0xff] }
0x2be1   :  { %v1521_v13 = vpop.permute.xlu1 %1520 }
0x2be2   :  { %1524 = vst.msk [vmem:[#allocation4 + $0x8] sm:$0xff] %vm446_vm2, %v1521_v13  ;;  %2108 = vrot.lane.b32.xlu1 %v2106_v14, %s3024_s24 }
0x2be5   :  { %v1717_v15 = vpop.permute.xlu1 %1716 }
0x2be6   :  { %1720 = vst.msk [vmem:[#allocation4 + $0x18] sm:$0xff] %vm446_vm2, %v1717_v15 }
0x2be9   :  { %v1913_v16 = vpop.permute.xlu1 %1912  ;;  %v2114_v40 = vld [vmem:[#allocation4 + $0x8] sm:$0xff]  ;;  %v2303_v41 = vpop.xlane.xlu0 %2302 }
0x2bea   :  { %1916 = vst.msk [vmem:[#allocation4 + $0x28] sm:$0xff] %vm446_vm2, %v1913_v16  ;;  %v2121_v6 = vpack.c.bf16 %v2114_v40, %v2113_v21  ;;  %v2304_v12 = vrot.slane %v2303_v41, 4 }
0x2bec   :  { %2775 = vmatprep.mubr.msk.bf16.mxu1 %vm446_vm2, %v2121_v6  ;;  %v2305_v17 = vadd.f32 %v2304_v12, %v2303_v41 }
0x2bed   :  { %v2116_v42 = vld [vmem:[#allocation4 + $0x18] sm:$0xff] }
0x2bee   :  { %v2122_v43 = vpack.c.bf16 %v2116_v42, %v2115_v5  ;;  %v2306_v19 = vrot.slane %v2305_v17, 2 }
0x2bf0   :  { %2776 = vmatmul.mubr.msk.bf16.vlgmr.msra.gmra.mxu1 %vm446_vm2, %v2122_v43 }
0x2bf1   :  { %v2118_v46 = vld [vmem:[#allocation4 + $0x28] sm:$0xff] }
0x2bf2   :  { %v2123_v47 = vpack.c.bf16 %v2118_v46, %v2117_v45 }
0x2bf4   :  { %2779 = vmatprep.mubr.msk.bf16.mxu1 %vm446_vm2, %v2123_v47 }
0x2c54   :  { %v2109_v25 = vpop.permute.xlu1 %2108 }
0x2c55   :  { %2112 = vst.msk [vmem:[#allocation4 + $0x38] sm:$0xff] %vm446_vm2, %v2109_v25 }
0x2c5c   :  { %v2120_v32 = vld [vmem:[#allocation4 + $0x38] sm:$0xff] }
0x2c5d   :  { %v2124_v49 = vpack.c.bf16 %v2120_v32, %v2119_v48 }
0x2c5f   :  { %2780 = vmatmul.mubr.msk.bf16.gmra.mxu1 %vm446_vm2, %v2124_v49 }
0x2cb0   :  { %v2777_v3 = vpop.f32.mrf.mxu1 }
0x2cb1   :  { %v2227_v22 = vadd.f32 %v2777_v3, %v2448_v56 }
0x2cb2   :  { %v2187_v7 = vpop.f32.mrf.mxu1 }
0x2cb3   :  { %2235 = vst [vmem:[#allocation7 + $0x10] sm:$0xff] %v2227_v22  ;;  %v2225_v44 = vadd.f32 %v2448_v56, %v2187_v7  ;;  %v2243_v59 = vsub.f32 %v2949_v2, %v2227_v22  ;;  %v2307_v22 = vadd.f32 %v2306_v19, %v2305_v17 }
0x2cb4   :  { %v2778_v9 = vpop.f32.mrf.mxu1 }
0x2cb5   :  { %2233 = vst [vmem:[#allocation7] sm:$0xff] %v2225_v44  ;;  %v2241_v26 = vsub.f32 %v2948_v24, %v2225_v44  ;;  %v2228_v62 = vadd.f32 %v2778_v9, %v2448_v56  ;;  %v2251_v14 = vmul.f32 %v2243_v59, %v2243_v59 }
0x2cb6   :  { %v2190_v11 = vpop.f32.mrf.mxu1 }
0x2cb7   :  { %2236 = vst [vmem:[#allocation7 + $0x18] sm:$0xff] %v2228_v62  ;;  %v2226_v28 = vadd.f32 %v2448_v56, %v2190_v11  ;;  %v2249_v57 = vmul.f32 %v2241_v26, %v2241_v26  ;;  %v2244_v1 = vsub.f32 %v2950_v58, %v2228_v62  ;;  %v2264_v40 = vmul.f32 %v2251_v14, %v3331_v34 }
0x2cb9   :  { %2234 = vst [vmem:[#allocation7 + $0x8] sm:$0xff] %v2226_v28  ;;  %v2242_v33 = vsub.f32 %v2951_v31, %v2226_v28  ;;  %v2262_v15 = vmul.f32 %v2249_v57, %v3319_v27  ;;  %v2252_v16 = vmul.f32 %v2244_v1, %v2244_v1  ;;  %v2952_v27 = vld [vmem:[%s3874_s23 + $0x20] sm:$0xff] }
0x2cbb   :  { %v2250_v13 = vmul.f32 %v2242_v33, %v2242_v33  ;;  %v2265_v5 = vmul.f32 %v2252_v16, %v3325_v30  ;;  %v2953_v30 = vld [vmem:[%s3874_s23 + $0x30] sm:$0xff]  ;;  %s3026_s23 = smov [#allocation7]  }
0x2cbc   :  { %s2334_s6 = sshll.u32 %s3026_s23, 4  ;;  %s2335_s6 = int_to_ptr.vmem [resolvable:$true] %s2334_s6 }
0x2cbd   :  { %v2263_v21 = vmul.f32 %v2250_v13, %v3323_v29  ;;  %s2956_s25 = scalar_lea.vmem %s2335_s6, 1024  ;;  %p2961_p1 = scmp.lt.s32.totalorder %s2335_s6, %s2335_s6 }
0x2cbe   :  { %p2957_p0 = scmp.ne.s32.totalorder %s2335_s6, %s2956_s25  ;;  %p2962_p2 = scmp.lt.s32.totalorder %s2956_s25, %s2956_s25 }
0x2cbf   :  { %v2270_v6 = vadd.f32 %v2263_v21, %v2262_v15 }
0x2cc0   :  { %p2963_p3 = por %p2962_p2, %p2961_p1 }
0x2cc1   :  { %v2271_v42 = vadd.f32 %v2270_v6, %v2264_v40 }
0x2cc2   :  { %p2964_p4 = pnand %p2963_p3, %p2957_p0 }
0x2cc3   :  { %v2272_v43 = vadd.f32 %v2271_v42, %v2265_v5 }
0x2d1f   :  { %v2781_v45 = vpop.f32.mrf.mxu1 }
0x2d20   :  { %v2231_v46 = vadd.f32 %v2781_v45, %v2448_v56 }
0x2d21   :  { %v2203_v47 = vpop.f32.mrf.mxu1 }
0x2d22   :  { %2239 = vst [vmem:[#allocation7 + $0x30] sm:$0xff] %v2231_v46  ;;  %v2229_v25 = vadd.f32 %v2448_v56, %v2203_v47  ;;  %v2247_v34 = vsub.f32 %v2953_v30, %v2231_v46 }
0x2d23   :  { %v2782_v48 = vpop.f32.mrf.mxu1 }
0x2d24   :  { %2237 = vst [vmem:[#allocation7 + $0x20] sm:$0xff] %v2229_v25  ;;  %v2245_v32 = vsub.f32 %v2952_v27, %v2229_v25  ;;  %v2232_v29 = vadd.f32 %v2782_v48, %v2448_v56  ;;  %v2255_v60 = vmul.f32 %v2247_v34, %v2247_v34 }
0x2d25   :  { %v2206_v49 = vpop.f32.mrf.mxu1 }
0x2d26   :  { %v2253_v50 = vmul.f32 %v2245_v32, %v2245_v32  ;;  %2240 = vst [vmem:[#allocation7 + $0x38] sm:$0xff] %v2232_v29  ;;  %v2230_v53 = vadd.f32 %v2448_v56, %v2206_v49  ;;  %v2248_v54 = vsub.f32 %v2954_v52, %v2232_v29  ;;  %v2268_v37 = vmul.f32 %v2255_v60, %v3345_v39 }
0x2d28   :  { %v2266_v51 = vmul.f32 %v2253_v50, %v3339_v38  ;;  %2238 = vst [vmem:[#allocation7 + $0x28] sm:$0xff] %v2230_v53  ;;  %v2246_v36 = vsub.f32 %v2955_v55, %v2230_v53  ;;  %v2256_v0 = vmul.f32 %v2248_v54, %v2248_v54 }
0x2d2a   :  { %v2254_v61 = vmul.f32 %v2246_v36, %v2246_v36  ;;  %v2273_v63 = vadd.f32 %v2272_v43, %v2266_v51  ;;  %v2269_v10 = vmul.f32 %v2260_v8, %v2256_v0 }
0x2d2c   :  { %v2267_v4 = vmul.f32 %v2254_v61, %v3333_v35 }
0x2d2e   :  { %v2274_v38 = vadd.f32 %v2273_v63, %v2267_v4 }
0x2d30   :  { %v2275_v20 = vadd.f32 %v2274_v38, %v2268_v37 }
0x2d32   :  { %v2276_v18 = vadd.f32 %v2275_v20, %v2269_v10 }
0x2d34   :  { %2277 = vadd.xlane.f32.xlu1 %v2276_v18 }
0x2dbd   :  { %v2278_v23 = vpop.xlane.xlu1 %2277 }
0x2dbe   :  { %v2279_v56 = vrot.slane %v2278_v23, 4 }
0x2dc0   :  { %v2280_v3 = vadd.f32 %v2279_v56, %v2278_v23 }
0x2dc2   :  { %v2281_v35 = vrot.slane %v2280_v3, 2 }
0x2dc3   :  { %2967 = shalt.err (!%p2964_p4)
}
0x2dc4   :  { %s3028_s7 = smov 128   ;;  %s3029_s4 = smov 8   ;;  %v2282_v39 = vadd.f32 %v2281_v35, %v2280_v3  ;;  %v2308_v7 = vrot.slane %v2307_v22, 1 }
0x2dc5   :  { %2340 = dma.vmem_to_hbm [thread:$0]  %s2335_s6, 1024, %s3865_s17, [#allocation8], %s3028_s7, %s3028_s7, %s3029_s4  }
0x2dc6   :  { %s2976_s9 = scalar_lea.vmem %s2326_s8, 128  ;;  %p2981_p6 = scmp.lt.s32.totalorder %s2326_s8, %s2326_s8 }
0x2dc7   :  { %p2977_p5 = scmp.ne.s32.totalorder %s2326_s8, %s2976_s9  ;;  %p2982_p7 = scmp.lt.s32.totalorder %s2976_s9, %s2976_s9 }
0x2dc9   :  { %p2983_p8 = por %p2982_p7, %p2981_p6 }
0x2dcb   :  { %p2984_p9 = pnand %p2983_p8, %p2977_p5 }
0x2dcd   :  { %2987 = shalt.err (!%p2984_p9)
}
0x2dce   :  { %2328 = dma.vmem_to_hbm [thread:$0]  %s2326_s8, 128, %s3864_s16, [#allocation6]   ;;  %v2283_v44 = vrot.slane %v2282_v39, 1  ;;  %v2309_v24 = vadd.f32 %v2308_v7, %v2307_v22  ;;  %vm2317_vm4 = vcmask 0  }
0x2dcf   :  { %s3030_s10 = smov 1.0   ;;  %s3031_s19 = smov [#allocation9]  }
0x2dd0   :  { %v2284_v9 = vadd.f32 %v2283_v44, %v2282_v39  ;;  %s2347_s15 = sshll.u32 %s3031_s19, 4  ;;  %s2348_s15 = int_to_ptr.vmem [resolvable:$true] %s2347_s15 }
0x2dd1   :  { %s2996_s16 = scalar_lea.vmem %s2348_s15, 16  ;;  %s3000_s11 = scalar_lea.vmem %s2348_s15, 32 }
0x2dd2   :  { %2783 = vpush %v2284_v9  ;;  %p2997_p10 = scmp.ne.s32.totalorder %s2348_s15, %s2996_s16  ;;  %p3001_p11 = scmp.lt.s32.totalorder %s2348_s15, %s2348_s15 }
0x2dd3   :  { %2785 = vpush %v2309_v24  ;;  %p3002_p12 = scmp.lt.s32.totalorder %s3000_s11, %s2996_s16 }
0x2dd5   :  { %p3003_p13 = por %p3002_p12, %p3001_p11 }
0x2dd7   :  { %p3004_p0 = pnand %p3003_p13, %p2997_p10 }
0x2e03   :  { %s2784_s17 = spop %2783 }
0x2e04   :  { %s2786_s27 = spop %2785 }
0x2e05   :  { %s2311_s12 = smax.f32 %s3030_s10, %s2786_s27 }
0x2e06   :  { %v2312_v26 = vstv %s2311_s12 }
0x2e07   :  { %2939 = vrcp.f32 %v2312_v26 }
0x2e14   :  { %v2940_v62 = vpop.eup %2939 }
0x2e15   :  { %2787 = vpush %v2940_v62 }
0x2e46   :  { %s2788_s29 = spop %2787 }
0x2e47   :  { %s2315_s1 = smul.f32 %s2788_s29, %s2784_s17 }
0x2e49   :  { %v2316_v11 = vstv %s2315_s1 }
0x2e4a   :  { %2318 = vst.msk [vmem:[#allocation9] sm:$0x1] %vm2317_vm4, %v2316_v11 }
0x2e4b   :  { %3007 = shalt.err (!%p3004_p0)
}
0x2e4c   :  { %2350 = dma.vmem_to_hbm [thread:$0]  %s2348_s15, 16, %s3866_s18, [#allocation8]  }
0x2e4d   :  { %3016 = dma.done.wait [#allocation6], 128  }
0x2e4e   :  { %3017 = vsyncadd [#allocation6], 4294967168 }
0x2e4f   :  { %3018 = dma.done.wait [#allocation8], 1040  }
0x2e50   :  { %3019 = vsyncadd [#allocation8], 4294966256 }
0x2e51   :  { %2360 = vsyncpa [#allocation6], 1 }
0x2e52   :  { %2361 = vsyncpa [#allocation8], 1 }

</bundles_post_ra>
